<compile_context>
chip_gen: v7x
topology: tpu7x:2x2x1
jax: 0.10.0
libtpu: 0.0.40
codegen_flags: <defaults>
</compile_context>

<pallas_src>
import math

import jax
import jax.numpy as jnp
from jax import lax
from jax.experimental import pallas as pl
from jax.experimental.pallas import tpu as pltpu

VMEM_SPEC = pl.BlockSpec(memory_space=pltpu.MemorySpace.VMEM)


# ------------------------------ Fused Pallas kernel ------------------------------ #

def _instructions_model_kernel(
        q_ref,            # [B, L, E]  padded question tokens (batch-first)
        lens_ref,         # [B, 1]     int32 sequence lengths
        vocab_ref,        # [V, E]
        tag_w_ref,        # [E, E]     Tagger.weight
        tag_d_ref,        # [1, E]     Tagger.default_embedding
        lstm_wih_t_ref,   # [E, 4E]    LSTM W_ih^T  (gate order i, f, g, o)
        lstm_whh_t_ref,   # [E, 4E]    LSTM W_hh^T
        lstm_b_ref,       # [1, 4E]    b_ih + b_hh
        rnn_wih_t_ref,    # [E, E]     RNNCell W_ih^T
        rnn_whh_t_ref,    # [E, E]     RNNCell W_hh^T
        rnn_b_ref,        # [1, E]     b_ih + b_hh
        instr_ref,        # [B, I, E]  output: instructions
        enc_ref):         # [B, E]     output: encoded (LSTM h_n)
    f32 = jnp.float32
    B, L, E = q_ref.shape
    I = instr_ref.shape[1]

    lens = lens_ref[...]                                          # [B, 1] int32

    # ---- Tagger (per token; padded positions are tagged too but masked later) ----
    tokens = q_ref[...].reshape(B * L, E)                         # [N, E]  (free reshape)
    w = tag_w_ref[...]
    vocab = vocab_ref[...]
    dflt = tag_d_ref[...]
    # Fold: logits = tokens @ (W @ vocab_ext^T); vocab / default kept as separate refs.
    wv = jnp.einsum('ef,vf->ev', w, vocab, preferred_element_type=f32)   # [E, V]
    wd = jnp.einsum('ef,of->eo', w, dflt, preferred_element_type=f32)    # [E, 1]
    logits_v = jnp.dot(tokens, wv, preferred_element_type=f32)           # [N, V]
    logit_d = jnp.dot(tokens, wd, preferred_element_type=f32)            # [N, 1]
    m = jnp.maximum(jnp.max(logits_v, axis=1, keepdims=True), logit_d)   # softmax (dim=1)
    ev = jnp.exp(logits_v - m)
    ed = jnp.exp(logit_d - m)
    inv = 1.0 / (jnp.sum(ev, axis=1, keepdims=True) + ed)
    tagged = (ed * inv) * tokens + jnp.dot(ev * inv, vocab,
                                           preferred_element_type=f32)   # [N, E]

    # ---- LSTM encoder (packed-sequence semantics: state frozen past each length) ----
    # Hoisted input projection: one MXU pass for all timesteps + bias re-broadcast once.
    xp = (jnp.dot(tagged, lstm_wih_t_ref[...], preferred_element_type=f32)
          + lstm_b_ref[...]).reshape(B, L, 4 * E)                 # [B, L, 4E]
    whh_t = lstm_whh_t_ref[...]
    h = jnp.zeros((B, E), f32)
    c = jnp.zeros((B, E), f32)
    for t in range(L):                                            # fully unrolled (L static)
        gates = xp[:, t, :] + jnp.dot(h, whh_t, preferred_element_type=f32)   # [B, 4E]
        sg = jax.nn.sigmoid(gates)                                # whole-vreg EUP ops
        tg = jnp.tanh(gates)
        c_new = sg[:, E:2 * E] * c + sg[:, 0:E] * tg[:, 2 * E:3 * E]
        h_new = sg[:, 3 * E:4 * E] * jnp.tanh(c_new)
        upd = lens > t
        h = jnp.where(upd, h_new, h)
        c = jnp.where(upd, c_new, c)
    enc_ref[...] = h

    # ---- Instruction decoder (relu RNNCell applied I times to the same input) ----
    xproj = jnp.dot(h, rnn_wih_t_ref[...], preferred_element_type=f32) + rnn_b_ref[...]
    rwh = rnn_whh_t_ref[...]
    hx = jnp.zeros((B, E), f32)
    hiddens = []
    for _ in range(I):                                            # fully unrolled (I static)
        hx = jnp.maximum(xproj + jnp.dot(hx, rwh, preferred_element_type=f32), 0.0)
        hiddens.append(hx)
    hidden = jnp.stack(hiddens, axis=1)                           # [B, I, E]

    # ---- Masked attention over the tagged sequence ----
    tagged_ble = tagged.reshape(B, L, E)                          # free reshape
    scores = jnp.einsum('bie,ble->bil', hidden, tagged_ble,
                        preferred_element_type=f32)               # [B, I, L]
    pos = lax.broadcasted_iota(jnp.int32, (B, I, L), 2)
    scores = jnp.where(pos < lens[:, :, None], scores, -jnp.inf)
    # TODO(synk): a zero-length sequence would give an all -inf row (NaN softmax),
    # exactly as the PyTorch module; packed sequences guarantee lengths >= 1.
    mx = jnp.max(scores, axis=-1, keepdims=True)
    e = jnp.exp(scores - mx)
    att = e / jnp.sum(e, axis=-1, keepdims=True)
    instr_ref[...] = jnp.einsum('bil,ble->bie', att, tagged_ble,
                                preferred_element_type=f32)


# --------------------------------- Model wrapper --------------------------------- #

def instructions_model_pallas(vocab, question, lengths, params, n_instructions):
    B, L, E = question.shape
    f32 = jnp.float32
    instructions, encoded = pl.pallas_call(
        _instructions_model_kernel,
        out_shape=(jax.ShapeDtypeStruct((B, n_instructions, E), f32),
                   jax.ShapeDtypeStruct((B, E), f32)),
        in_specs=[VMEM_SPEC] * 11,
        out_specs=(VMEM_SPEC, VMEM_SPEC),
    )(question.astype(f32),
      lengths.reshape(B, 1).astype(jnp.int32),
      vocab.astype(f32),
      params['tag_weight'],
      params['tag_default'][None, :],
      params['lstm_w_ih'].T,
      params['lstm_w_hh'].T,
      (params['lstm_b_ih'] + params['lstm_b_hh'])[None, :],
      params['rnn_w_ih'].T,
      params['rnn_w_hh'].T,
      (params['rnn_b_ih'] + params['rnn_b_hh'])[None, :])
    return instructions, encoded


# ------------------------------- Pure-JAX reference ------------------------------- #

def instructions_model_ref(vocab, question, lengths, params, n_instructions):
    B, L, E = question.shape
    tokens = question.reshape(B * L, E)
    vocab_ext = jnp.concatenate([vocab, params['tag_default'][None, :]], axis=0)
    sim = jax.nn.softmax(tokens @ params['tag_weight'] @ vocab_ext.T, axis=1)
    tagged = (sim[:, -1:] * tokens + sim[:, :-1] @ vocab).reshape(B, L, E)
    valid = (jnp.arange(L)[None, :] < lengths[:, None])[:, :, None]
    tagged = jnp.where(valid, tagged, 0.0)          # pad_packed_sequence zeroing

    wih_t = params['lstm_w_ih'].T
    whh_t = params['lstm_w_hh'].T
    b = params['lstm_b_ih'] + params['lstm_b_hh']

    def lstm_step(carry, xt):
        h, c = carry
        x_t, t = xt
        gates = x_t @ wih_t + h @ whh_t + b
        i = jax.nn.sigmoid(gates[:, :E])
        f = jax.nn.sigmoid(gates[:, E:2 * E])
        g = jnp.tanh(gates[:, 2 * E:3 * E])
        o = jax.nn.sigmoid(gates[:, 3 * E:4 * E])
        c_new = f * c + i * g
        h_new = o * jnp.tanh(c_new)
        upd = (lengths > t)[:, None]
        return (jnp.where(upd, h_new, h), jnp.where(upd, c_new, c)), None

    (encoded, _), _ = lax.scan(
        lstm_step,
        (jnp.zeros((B, E), jnp.float32), jnp.zeros((B, E), jnp.float32)),
        (jnp.transpose(tagged, (1, 0, 2)), jnp.arange(L)))

    r_wih_t = params['rnn_w_ih'].T
    r_whh_t = params['rnn_w_hh'].T
    rb = params['rnn_b_ih'] + params['rnn_b_hh']
    hx = jnp.zeros((B, E), jnp.float32)
    hiddens = []
    for _ in range(n_instructions):
        hx = jnp.maximum(encoded @ r_wih_t + hx @ r_whh_t + rb, 0.0)
        hiddens.append(hx)
    hidden = jnp.stack(hiddens, axis=1)

    tmp = jnp.einsum('bie,ble->bil', hidden, tagged)
    pos = jnp.arange(L)[None, None, :]
    tmp = jnp.where(pos < lengths[:, None, None], tmp, -jnp.inf)
    instructions = jax.nn.softmax(tmp, axis=-1) @ tagged
    return instructions, encoded


# -------------------------------------- main -------------------------------------- #

if __name__ == "__main__":
    E, V, B, L, I = 32, 10, 4, 8, 4
    key = jax.random.PRNGKey(0)
    ks = jax.random.split(key, 11)
    k = 1.0 / math.sqrt(E)
    params = {
        'tag_default': jax.random.uniform(ks[0], (E,), jnp.float32),
        'tag_weight': jnp.eye(E, dtype=jnp.float32),
        'lstm_w_ih': jax.random.uniform(ks[1], (4 * E, E), jnp.float32, -k, k),
        'lstm_w_hh': jax.random.uniform(ks[2], (4 * E, E), jnp.float32, -k, k),
        'lstm_b_ih': jax.random.uniform(ks[3], (4 * E,), jnp.float32, -k, k),
        'lstm_b_hh': jax.random.uniform(ks[4], (4 * E,), jnp.float32, -k, k),
        'rnn_w_ih': jax.random.uniform(ks[5], (E, E), jnp.float32, -k, k),
        'rnn_w_hh': jax.random.uniform(ks[6], (E, E), jnp.float32, -k, k),
        'rnn_b_ih': jax.random.uniform(ks[7], (E,), jnp.float32, -k, k),
        'rnn_b_hh': jax.random.uniform(ks[8], (E,), jnp.float32, -k, k),
    }
    vocab = jax.random.normal(ks[9], (V, E), jnp.float32)
    question = jax.random.normal(ks[10], (B, L, E), jnp.float32)
    lengths = jnp.array([8, 7, 5, 3], dtype=jnp.int32)   # sorted, packed-sequence style

    instructions, encoded = jax.block_until_ready(
        instructions_model_pallas(vocab, question, lengths, params, I))

    ref_instr, ref_enc = instructions_model_ref(vocab, question, lengths, params, I)
    assert instructions.shape == (B, I, E) and encoded.shape == (B, E)
    assert bool(jnp.allclose(instructions, ref_instr, atol=1e-2, rtol=1e-2))
    assert bool(jnp.allclose(encoded, ref_enc, atol=1e-2, rtol=1e-2))
    print("KERNEL_OK")
</pallas_src>

<mosaic_0001>
module attributes {stable_mosaic.version = 11 : i64} {
  func.func @_instructions_model_kernel(%arg0: memref<4x8x32xf32, #tpu.memory_space<vmem>>, %arg1: memref<4x1xi32, #tpu.memory_space<vmem>>, %arg2: memref<10x32xf32, #tpu.memory_space<vmem>>, %arg3: memref<32x32xf32, #tpu.memory_space<vmem>>, %arg4: memref<1x32xf32, #tpu.memory_space<vmem>>, %arg5: memref<32x128xf32, #tpu.memory_space<vmem>>, %arg6: memref<32x128xf32, #tpu.memory_space<vmem>>, %arg7: memref<1x128xf32, #tpu.memory_space<vmem>>, %arg8: memref<32x32xf32, #tpu.memory_space<vmem>>, %arg9: memref<32x32xf32, #tpu.memory_space<vmem>>, %arg10: memref<1x32xf32, #tpu.memory_space<vmem>>, %arg11: memref<4x4x32xf32, #tpu.memory_space<vmem>>, %arg12: memref<4x32xf32, #tpu.memory_space<vmem>>) attributes {dimension_semantics = [], scalar_prefetch = 0 : i64, scratch_operands = 0 : i64, tpu.core_type = #tpu.core_type<tc>} {
    %c0 = arith.constant 0 : index
    %c0_0 = arith.constant 0 : index
    %0 = vector.load %arg1[%c0, %c0_0] : memref<4x1xi32, #tpu.memory_space<vmem>>, vector<4x1xi32>
    %c0_1 = arith.constant 0 : index
    %c0_2 = arith.constant 0 : index
    %c0_3 = arith.constant 0 : index
    %1 = vector.load %arg0[%c0_1, %c0_2, %c0_3] : memref<4x8x32xf32, #tpu.memory_space<vmem>>, vector<4x8x32xf32>
    %2 = vector.shape_cast %1 : vector<4x8x32xf32> to vector<32x32xf32>
    %c0_4 = arith.constant 0 : index
    %c0_5 = arith.constant 0 : index
    %3 = vector.load %arg3[%c0_4, %c0_5] : memref<32x32xf32, #tpu.memory_space<vmem>>, vector<32x32xf32>
    %c0_6 = arith.constant 0 : index
    %c0_7 = arith.constant 0 : index
    %4 = vector.load %arg2[%c0_6, %c0_7] : memref<10x32xf32, #tpu.memory_space<vmem>>, vector<10x32xf32>
    %c0_8 = arith.constant 0 : index
    %c0_9 = arith.constant 0 : index
    %5 = vector.load %arg4[%c0_8, %c0_9] : memref<1x32xf32, #tpu.memory_space<vmem>>, vector<1x32xf32>
    "tpu.trace_start"() <{level = 10 : i32, message = "ef,vf->ev"}> : () -> ()
    %cst = arith.constant dense<0.000000e+00> : vector<32x10xf32>
    %6 = tpu.matmul %3, %4, %cst {dimension_numbers = #tpu.dot_dimension_numbers<[1], [1], [0], [0], [0, 0, 1, 0], [], []>} : vector<32x32xf32>, vector<10x32xf32>, vector<32x10xf32> -> vector<32x10xf32>
    "tpu.trace_stop"() : () -> ()
    "tpu.trace_start"() <{level = 10 : i32, message = "ef,of->eo"}> : () -> ()
    %cst_10 = arith.constant dense<0.000000e+00> : vector<32x1xf32>
    %7 = tpu.matmul %3, %5, %cst_10 {dimension_numbers = #tpu.dot_dimension_numbers<[1], [1], [0], [0], [0, 0, 1, 0], [], []>} : vector<32x32xf32>, vector<1x32xf32>, vector<32x1xf32> -> vector<32x1xf32>
    "tpu.trace_stop"() : () -> ()
    %cst_11 = arith.constant dense<0.000000e+00> : vector<32x10xf32>
    %8 = tpu.matmul %2, %6, %cst_11 {dimension_numbers = #tpu.dot_dimension_numbers<[1], [0], [0], [1], [0, 0, 1, 1], [], []>} : vector<32x32xf32>, vector<32x10xf32>, vector<32x10xf32> -> vector<32x10xf32>
    %cst_12 = arith.constant dense<0.000000e+00> : vector<32x1xf32>
    %9 = tpu.matmul %2, %7, %cst_12 {dimension_numbers = #tpu.dot_dimension_numbers<[1], [0], [0], [1], [0, 0, 1, 1], [], []>} : vector<32x32xf32>, vector<32x1xf32>, vector<32x1xf32> -> vector<32x1xf32>
    %cst_13 = arith.constant dense<0xFF800000> : vector<32xf32>
    %10 = vector.multi_reduction <maximumf>, %8, %cst_13 [1] : vector<32x10xf32> to vector<32xf32>
    %11 = vector.shape_cast %10 : vector<32xf32> to vector<32x1xf32>
    %12 = arith.maximumf %11, %9 : vector<32x1xf32>
    %13 = vector.broadcast %12 : vector<32x1xf32> to vector<32x10xf32>
    %14 = arith.subf %8, %13 : vector<32x10xf32>
    %15 = math.exp %14 : vector<32x10xf32>
    %16 = arith.subf %9, %12 : vector<32x1xf32>
    %17 = math.exp %16 : vector<32x1xf32>
    %cst_14 = arith.constant dense<0.000000e+00> : vector<32xf32>
    %18 = vector.multi_reduction <add>, %15, %cst_14 [1] : vector<32x10xf32> to vector<32xf32>
    %19 = vector.shape_cast %18 : vector<32xf32> to vector<32x1xf32>
    %20 = arith.addf %19, %17 : vector<32x1xf32>
    %cst_15 = arith.constant 1.000000e+00 : f32
    %21 = vector.broadcast %cst_15 : f32 to vector<32x1xf32>
    %22 = arith.divf %21, %20 : vector<32x1xf32>
    %23 = arith.mulf %17, %22 : vector<32x1xf32>
    %24 = vector.broadcast %23 : vector<32x1xf32> to vector<32x32xf32>
    %25 = arith.mulf %24, %2 : vector<32x32xf32>
    %26 = vector.broadcast %22 : vector<32x1xf32> to vector<32x10xf32>
    %27 = arith.mulf %15, %26 : vector<32x10xf32>
    %cst_16 = arith.constant dense<0.000000e+00> : vector<32x32xf32>
    %28 = tpu.matmul %27, %4, %cst_16 {dimension_numbers = #tpu.dot_dimension_numbers<[1], [0], [0], [1], [0, 0, 1, 1], [], []>} : vector<32x10xf32>, vector<10x32xf32>, vector<32x32xf32> -> vector<32x32xf32>
    %29 = arith.addf %25, %28 : vector<32x32xf32>
    %c0_17 = arith.constant 0 : index
    %c0_18 = arith.constant 0 : index
    %30 = vector.load %arg5[%c0_17, %c0_18] : memref<32x128xf32, #tpu.memory_space<vmem>>, vector<32x128xf32>
    %cst_19 = arith.constant dense<0.000000e+00> : vector<32x128xf32>
    %31 = tpu.matmul %29, %30, %cst_19 {dimension_numbers = #tpu.dot_dimension_numbers<[1], [0], [0], [1], [0, 0, 1, 1], [], []>} : vector<32x32xf32>, vector<32x128xf32>, vector<32x128xf32> -> vector<32x128xf32>
    %c0_20 = arith.constant 0 : index
    %c0_21 = arith.constant 0 : index
    %32 = vector.load %arg7[%c0_20, %c0_21] : memref<1x128xf32, #tpu.memory_space<vmem>>, vector<1x128xf32>
    %33 = vector.broadcast %32 : vector<1x128xf32> to vector<32x128xf32>
    %34 = arith.addf %31, %33 : vector<32x128xf32>
    %35 = vector.shape_cast %34 : vector<32x128xf32> to vector<4x8x128xf32>
    %c0_22 = arith.constant 0 : index
    %c0_23 = arith.constant 0 : index
    %36 = vector.load %arg6[%c0_22, %c0_23] : memref<32x128xf32, #tpu.memory_space<vmem>>, vector<32x128xf32>
    %cst_24 = arith.constant 0.000000e+00 : f32
    %37 = vector.broadcast %cst_24 : f32 to vector<4x32xf32>
    %cst_25 = arith.constant 0.000000e+00 : f32
    %38 = vector.broadcast %cst_25 : f32 to vector<4x32xf32>
    %39 = vector.extract_strided_slice %35 {offsets = [0, 0, 0], sizes = [4, 1, 128], strides = [1, 1, 1]} : vector<4x8x128xf32> to vector<4x1x128xf32>
    %40 = vector.shape_cast %39 : vector<4x1x128xf32> to vector<4x128xf32>
    %cst_26 = arith.constant dense<0.000000e+00> : vector<4x128xf32>
    %41 = tpu.matmul %37, %36, %cst_26 {dimension_numbers = #tpu.dot_dimension_numbers<[1], [0], [0], [1], [0, 0, 1, 1], [], []>} : vector<4x32xf32>, vector<32x128xf32>, vector<4x128xf32> -> vector<4x128xf32>
    %42 = arith.addf %40, %41 : vector<4x128xf32>
    %43 = arith.negf %42 : vector<4x128xf32>
    %44 = math.exp %43 : vector<4x128xf32>
    %cst_27 = arith.constant 1.000000e+00 : f32
    %45 = vector.broadcast %cst_27 : f32 to vector<4x128xf32>
    %46 = arith.addf %45, %44 : vector<4x128xf32>
    %47 = arith.divf %45, %46 : vector<4x128xf32>
    %48 = math.tanh %42 : vector<4x128xf32>
    %49 = vector.extract_strided_slice %47 {offsets = [0, 32], sizes = [4, 32], strides = [1, 1]} : vector<4x128xf32> to vector<4x32xf32>
    %50 = arith.mulf %49, %38 : vector<4x32xf32>
    %51 = vector.extract_strided_slice %47 {offsets = [0, 0], sizes = [4, 32], strides = [1, 1]} : vector<4x128xf32> to vector<4x32xf32>
    %52 = vector.extract_strided_slice %48 {offsets = [0, 64], sizes = [4, 32], strides = [1, 1]} : vector<4x128xf32> to vector<4x32xf32>
    %53 = arith.mulf %51, %52 : vector<4x32xf32>
    %54 = arith.addf %50, %53 : vector<4x32xf32>
    %55 = vector.extract_strided_slice %47 {offsets = [0, 96], sizes = [4, 32], strides = [1, 1]} : vector<4x128xf32> to vector<4x32xf32>
    %56 = math.tanh %54 : vector<4x32xf32>
    %57 = arith.mulf %55, %56 : vector<4x32xf32>
    %c0_i32 = arith.constant 0 : i32
    %58 = vector.broadcast %c0_i32 : i32 to vector<4x1xi32>
    %59 = arith.cmpi sgt, %0, %58 : vector<4x1xi32>
    %60 = vector.shape_cast %59 : vector<4x1xi1> to vector<4x1xi1>
    %61 = vector.broadcast %60 : vector<4x1xi1> to vector<4x32xi1>
    %62 = arith.select %61, %57, %37 : vector<4x32xi1>, vector<4x32xf32>
    %63 = vector.shape_cast %59 : vector<4x1xi1> to vector<4x1xi1>
    %64 = vector.broadcast %63 : vector<4x1xi1> to vector<4x32xi1>
    %65 = arith.select %64, %54, %38 : vector<4x32xi1>, vector<4x32xf32>
    %66 = vector.extract_strided_slice %35 {offsets = [0, 1, 0], sizes = [4, 1, 128], strides = [1, 1, 1]} : vector<4x8x128xf32> to vector<4x1x128xf32>
    %67 = vector.shape_cast %66 : vector<4x1x128xf32> to vector<4x128xf32>
    %cst_28 = arith.constant dense<0.000000e+00> : vector<4x128xf32>
    %68 = tpu.matmul %62, %36, %cst_28 {dimension_numbers = #tpu.dot_dimension_numbers<[1], [0], [0], [1], [0, 0, 1, 1], [], []>} : vector<4x32xf32>, vector<32x128xf32>, vector<4x128xf32> -> vector<4x128xf32>
    %69 = arith.addf %67, %68 : vector<4x128xf32>
    %70 = arith.negf %69 : vector<4x128xf32>
    %71 = math.exp %70 : vector<4x128xf32>
    %cst_29 = arith.constant 1.000000e+00 : f32
    %72 = vector.broadcast %cst_29 : f32 to vector<4x128xf32>
    %73 = arith.addf %72, %71 : vector<4x128xf32>
    %74 = arith.divf %72, %73 : vector<4x128xf32>
    %75 = math.tanh %69 : vector<4x128xf32>
    %76 = vector.extract_strided_slice %74 {offsets = [0, 32], sizes = [4, 32], strides = [1, 1]} : vector<4x128xf32> to vector<4x32xf32>
    %77 = arith.mulf %76, %65 : vector<4x32xf32>
    %78 = vector.extract_strided_slice %74 {offsets = [0, 0], sizes = [4, 32], strides = [1, 1]} : vector<4x128xf32> to vector<4x32xf32>
    %79 = vector.extract_strided_slice %75 {offsets = [0, 64], sizes = [4, 32], strides = [1, 1]} : vector<4x128xf32> to vector<4x32xf32>
    %80 = arith.mulf %78, %79 : vector<4x32xf32>
    %81 = arith.addf %77, %80 : vector<4x32xf32>
    %82 = vector.extract_strided_slice %74 {offsets = [0, 96], sizes = [4, 32], strides = [1, 1]} : vector<4x128xf32> to vector<4x32xf32>
    %83 = math.tanh %81 : vector<4x32xf32>
    %84 = arith.mulf %82, %83 : vector<4x32xf32>
    %c1_i32 = arith.constant 1 : i32
    %85 = vector.broadcast %c1_i32 : i32 to vector<4x1xi32>
    %86 = arith.cmpi sgt, %0, %85 : vector<4x1xi32>
    %87 = vector.shape_cast %86 : vector<4x1xi1> to vector<4x1xi1>
    %88 = vector.broadcast %87 : vector<4x1xi1> to vector<4x32xi1>
    %89 = arith.select %88, %84, %62 : vector<4x32xi1>, vector<4x32xf32>
    %90 = vector.shape_cast %86 : vector<4x1xi1> to vector<4x1xi1>
    %91 = vector.broadcast %90 : vector<4x1xi1> to vector<4x32xi1>
    %92 = arith.select %91, %81, %65 : vector<4x32xi1>, vector<4x32xf32>
    %93 = vector.extract_strided_slice %35 {offsets = [0, 2, 0], sizes = [4, 1, 128], strides = [1, 1, 1]} : vector<4x8x128xf32> to vector<4x1x128xf32>
    %94 = vector.shape_cast %93 : vector<4x1x128xf32> to vector<4x128xf32>
    %cst_30 = arith.constant dense<0.000000e+00> : vector<4x128xf32>
    %95 = tpu.matmul %89, %36, %cst_30 {dimension_numbers = #tpu.dot_dimension_numbers<[1], [0], [0], [1], [0, 0, 1, 1], [], []>} : vector<4x32xf32>, vector<32x128xf32>, vector<4x128xf32> -> vector<4x128xf32>
    %96 = arith.addf %94, %95 : vector<4x128xf32>
    %97 = arith.negf %96 : vector<4x128xf32>
    %98 = math.exp %97 : vector<4x128xf32>
    %cst_31 = arith.constant 1.000000e+00 : f32
    %99 = vector.broadcast %cst_31 : f32 to vector<4x128xf32>
    %100 = arith.addf %99, %98 : vector<4x128xf32>
    %101 = arith.divf %99, %100 : vector<4x128xf32>
    %102 = math.tanh %96 : vector<4x128xf32>
    %103 = vector.extract_strided_slice %101 {offsets = [0, 32], sizes = [4, 32], strides = [1, 1]} : vector<4x128xf32> to vector<4x32xf32>
    %104 = arith.mulf %103, %92 : vector<4x32xf32>
    %105 = vector.extract_strided_slice %101 {offsets = [0, 0], sizes = [4, 32], strides = [1, 1]} : vector<4x128xf32> to vector<4x32xf32>
    %106 = vector.extract_strided_slice %102 {offsets = [0, 64], sizes = [4, 32], strides = [1, 1]} : vector<4x128xf32> to vector<4x32xf32>
    %107 = arith.mulf %105, %106 : vector<4x32xf32>
    %108 = arith.addf %104, %107 : vector<4x32xf32>
    %109 = vector.extract_strided_slice %101 {offsets = [0, 96], sizes = [4, 32], strides = [1, 1]} : vector<4x128xf32> to vector<4x32xf32>
    %110 = math.tanh %108 : vector<4x32xf32>
    %111 = arith.mulf %109, %110 : vector<4x32xf32>
    %c2_i32 = arith.constant 2 : i32
    %112 = vector.broadcast %c2_i32 : i32 to vector<4x1xi32>
    %113 = arith.cmpi sgt, %0, %112 : vector<4x1xi32>
    %114 = vector.shape_cast %113 : vector<4x1xi1> to vector<4x1xi1>
    %115 = vector.broadcast %114 : vector<4x1xi1> to vector<4x32xi1>
    %116 = arith.select %115, %111, %89 : vector<4x32xi1>, vector<4x32xf32>
    %117 = vector.shape_cast %113 : vector<4x1xi1> to vector<4x1xi1>
    %118 = vector.broadcast %117 : vector<4x1xi1> to vector<4x32xi1>
    %119 = arith.select %118, %108, %92 : vector<4x32xi1>, vector<4x32xf32>
    %120 = vector.extract_strided_slice %35 {offsets = [0, 3, 0], sizes = [4, 1, 128], strides = [1, 1, 1]} : vector<4x8x128xf32> to vector<4x1x128xf32>
    %121 = vector.shape_cast %120 : vector<4x1x128xf32> to vector<4x128xf32>
    %cst_32 = arith.constant dense<0.000000e+00> : vector<4x128xf32>
    %122 = tpu.matmul %116, %36, %cst_32 {dimension_numbers = #tpu.dot_dimension_numbers<[1], [0], [0], [1], [0, 0, 1, 1], [], []>} : vector<4x32xf32>, vector<32x128xf32>, vector<4x128xf32> -> vector<4x128xf32>
    %123 = arith.addf %121, %122 : vector<4x128xf32>
    %124 = arith.negf %123 : vector<4x128xf32>
    %125 = math.exp %124 : vector<4x128xf32>
    %cst_33 = arith.constant 1.000000e+00 : f32
    %126 = vector.broadcast %cst_33 : f32 to vector<4x128xf32>
    %127 = arith.addf %126, %125 : vector<4x128xf32>
    %128 = arith.divf %126, %127 : vector<4x128xf32>
    %129 = math.tanh %123 : vector<4x128xf32>
    %130 = vector.extract_strided_slice %128 {offsets = [0, 32], sizes = [4, 32], strides = [1, 1]} : vector<4x128xf32> to vector<4x32xf32>
    %131 = arith.mulf %130, %119 : vector<4x32xf32>
    %132 = vector.extract_strided_slice %128 {offsets = [0, 0], sizes = [4, 32], strides = [1, 1]} : vector<4x128xf32> to vector<4x32xf32>
    %133 = vector.extract_strided_slice %129 {offsets = [0, 64], sizes = [4, 32], strides = [1, 1]} : vector<4x128xf32> to vector<4x32xf32>
    %134 = arith.mulf %132, %133 : vector<4x32xf32>
    %135 = arith.addf %131, %134 : vector<4x32xf32>
    %136 = vector.extract_strided_slice %128 {offsets = [0, 96], sizes = [4, 32], strides = [1, 1]} : vector<4x128xf32> to vector<4x32xf32>
    %137 = math.tanh %135 : vector<4x32xf32>
    %138 = arith.mulf %136, %137 : vector<4x32xf32>
    %c3_i32 = arith.constant 3 : i32
    %139 = vector.broadcast %c3_i32 : i32 to vector<4x1xi32>
    %140 = arith.cmpi sgt, %0, %139 : vector<4x1xi32>
    %141 = vector.shape_cast %140 : vector<4x1xi1> to vector<4x1xi1>
    %142 = vector.broadcast %141 : vector<4x1xi1> to vector<4x32xi1>
    %143 = arith.select %142, %138, %116 : vector<4x32xi1>, vector<4x32xf32>
    %144 = vector.shape_cast %140 : vector<4x1xi1> to vector<4x1xi1>
    %145 = vector.broadcast %144 : vector<4x1xi1> to vector<4x32xi1>
    %146 = arith.select %145, %135, %119 : vector<4x32xi1>, vector<4x32xf32>
    %147 = vector.extract_strided_slice %35 {offsets = [0, 4, 0], sizes = [4, 1, 128], strides = [1, 1, 1]} : vector<4x8x128xf32> to vector<4x1x128xf32>
    %148 = vector.shape_cast %147 : vector<4x1x128xf32> to vector<4x128xf32>
    %cst_34 = arith.constant dense<0.000000e+00> : vector<4x128xf32>
    %149 = tpu.matmul %143, %36, %cst_34 {dimension_numbers = #tpu.dot_dimension_numbers<[1], [0], [0], [1], [0, 0, 1, 1], [], []>} : vector<4x32xf32>, vector<32x128xf32>, vector<4x128xf32> -> vector<4x128xf32>
    %150 = arith.addf %148, %149 : vector<4x128xf32>
    %151 = arith.negf %150 : vector<4x128xf32>
    %152 = math.exp %151 : vector<4x128xf32>
    %cst_35 = arith.constant 1.000000e+00 : f32
    %153 = vector.broadcast %cst_35 : f32 to vector<4x128xf32>
    %154 = arith.addf %153, %152 : vector<4x128xf32>
    %155 = arith.divf %153, %154 : vector<4x128xf32>
    %156 = math.tanh %150 : vector<4x128xf32>
    %157 = vector.extract_strided_slice %155 {offsets = [0, 32], sizes = [4, 32], strides = [1, 1]} : vector<4x128xf32> to vector<4x32xf32>
    %158 = arith.mulf %157, %146 : vector<4x32xf32>
    %159 = vector.extract_strided_slice %155 {offsets = [0, 0], sizes = [4, 32], strides = [1, 1]} : vector<4x128xf32> to vector<4x32xf32>
    %160 = vector.extract_strided_slice %156 {offsets = [0, 64], sizes = [4, 32], strides = [1, 1]} : vector<4x128xf32> to vector<4x32xf32>
    %161 = arith.mulf %159, %160 : vector<4x32xf32>
    %162 = arith.addf %158, %161 : vector<4x32xf32>
    %163 = vector.extract_strided_slice %155 {offsets = [0, 96], sizes = [4, 32], strides = [1, 1]} : vector<4x128xf32> to vector<4x32xf32>
    %164 = math.tanh %162 : vector<4x32xf32>
    %165 = arith.mulf %163, %164 : vector<4x32xf32>
    %c4_i32 = arith.constant 4 : i32
    %166 = vector.broadcast %c4_i32 : i32 to vector<4x1xi32>
    %167 = arith.cmpi sgt, %0, %166 : vector<4x1xi32>
    %168 = vector.shape_cast %167 : vector<4x1xi1> to vector<4x1xi1>
    %169 = vector.broadcast %168 : vector<4x1xi1> to vector<4x32xi1>
    %170 = arith.select %169, %165, %143 : vector<4x32xi1>, vector<4x32xf32>
    %171 = vector.shape_cast %167 : vector<4x1xi1> to vector<4x1xi1>
    %172 = vector.broadcast %171 : vector<4x1xi1> to vector<4x32xi1>
    %173 = arith.select %172, %162, %146 : vector<4x32xi1>, vector<4x32xf32>
    %174 = vector.extract_strided_slice %35 {offsets = [0, 5, 0], sizes = [4, 1, 128], strides = [1, 1, 1]} : vector<4x8x128xf32> to vector<4x1x128xf32>
    %175 = vector.shape_cast %174 : vector<4x1x128xf32> to vector<4x128xf32>
    %cst_36 = arith.constant dense<0.000000e+00> : vector<4x128xf32>
    %176 = tpu.matmul %170, %36, %cst_36 {dimension_numbers = #tpu.dot_dimension_numbers<[1], [0], [0], [1], [0, 0, 1, 1], [], []>} : vector<4x32xf32>, vector<32x128xf32>, vector<4x128xf32> -> vector<4x128xf32>
    %177 = arith.addf %175, %176 : vector<4x128xf32>
    %178 = arith.negf %177 : vector<4x128xf32>
    %179 = math.exp %178 : vector<4x128xf32>
    %cst_37 = arith.constant 1.000000e+00 : f32
    %180 = vector.broadcast %cst_37 : f32 to vector<4x128xf32>
    %181 = arith.addf %180, %179 : vector<4x128xf32>
    %182 = arith.divf %180, %181 : vector<4x128xf32>
    %183 = math.tanh %177 : vector<4x128xf32>
    %184 = vector.extract_strided_slice %182 {offsets = [0, 32], sizes = [4, 32], strides = [1, 1]} : vector<4x128xf32> to vector<4x32xf32>
    %185 = arith.mulf %184, %173 : vector<4x32xf32>
    %186 = vector.extract_strided_slice %182 {offsets = [0, 0], sizes = [4, 32], strides = [1, 1]} : vector<4x128xf32> to vector<4x32xf32>
    %187 = vector.extract_strided_slice %183 {offsets = [0, 64], sizes = [4, 32], strides = [1, 1]} : vector<4x128xf32> to vector<4x32xf32>
    %188 = arith.mulf %186, %187 : vector<4x32xf32>
    %189 = arith.addf %185, %188 : vector<4x32xf32>
    %190 = vector.extract_strided_slice %182 {offsets = [0, 96], sizes = [4, 32], strides = [1, 1]} : vector<4x128xf32> to vector<4x32xf32>
    %191 = math.tanh %189 : vector<4x32xf32>
    %192 = arith.mulf %190, %191 : vector<4x32xf32>
    %c5_i32 = arith.constant 5 : i32
    %193 = vector.broadcast %c5_i32 : i32 to vector<4x1xi32>
    %194 = arith.cmpi sgt, %0, %193 : vector<4x1xi32>
    %195 = vector.shape_cast %194 : vector<4x1xi1> to vector<4x1xi1>
    %196 = vector.broadcast %195 : vector<4x1xi1> to vector<4x32xi1>
    %197 = arith.select %196, %192, %170 : vector<4x32xi1>, vector<4x32xf32>
    %198 = vector.shape_cast %194 : vector<4x1xi1> to vector<4x1xi1>
    %199 = vector.broadcast %198 : vector<4x1xi1> to vector<4x32xi1>
    %200 = arith.select %199, %189, %173 : vector<4x32xi1>, vector<4x32xf32>
    %201 = vector.extract_strided_slice %35 {offsets = [0, 6, 0], sizes = [4, 1, 128], strides = [1, 1, 1]} : vector<4x8x128xf32> to vector<4x1x128xf32>
    %202 = vector.shape_cast %201 : vector<4x1x128xf32> to vector<4x128xf32>
    %cst_38 = arith.constant dense<0.000000e+00> : vector<4x128xf32>
    %203 = tpu.matmul %197, %36, %cst_38 {dimension_numbers = #tpu.dot_dimension_numbers<[1], [0], [0], [1], [0, 0, 1, 1], [], []>} : vector<4x32xf32>, vector<32x128xf32>, vector<4x128xf32> -> vector<4x128xf32>
    %204 = arith.addf %202, %203 : vector<4x128xf32>
    %205 = arith.negf %204 : vector<4x128xf32>
    %206 = math.exp %205 : vector<4x128xf32>
    %cst_39 = arith.constant 1.000000e+00 : f32
    %207 = vector.broadcast %cst_39 : f32 to vector<4x128xf32>
    %208 = arith.addf %207, %206 : vector<4x128xf32>
    %209 = arith.divf %207, %208 : vector<4x128xf32>
    %210 = math.tanh %204 : vector<4x128xf32>
    %211 = vector.extract_strided_slice %209 {offsets = [0, 32], sizes = [4, 32], strides = [1, 1]} : vector<4x128xf32> to vector<4x32xf32>
    %212 = arith.mulf %211, %200 : vector<4x32xf32>
    %213 = vector.extract_strided_slice %209 {offsets = [0, 0], sizes = [4, 32], strides = [1, 1]} : vector<4x128xf32> to vector<4x32xf32>
    %214 = vector.extract_strided_slice %210 {offsets = [0, 64], sizes = [4, 32], strides = [1, 1]} : vector<4x128xf32> to vector<4x32xf32>
    %215 = arith.mulf %213, %214 : vector<4x32xf32>
    %216 = arith.addf %212, %215 : vector<4x32xf32>
    %217 = vector.extract_strided_slice %209 {offsets = [0, 96], sizes = [4, 32], strides = [1, 1]} : vector<4x128xf32> to vector<4x32xf32>
    %218 = math.tanh %216 : vector<4x32xf32>
    %219 = arith.mulf %217, %218 : vector<4x32xf32>
    %c6_i32 = arith.constant 6 : i32
    %220 = vector.broadcast %c6_i32 : i32 to vector<4x1xi32>
    %221 = arith.cmpi sgt, %0, %220 : vector<4x1xi32>
    %222 = vector.shape_cast %221 : vector<4x1xi1> to vector<4x1xi1>
    %223 = vector.broadcast %222 : vector<4x1xi1> to vector<4x32xi1>
    %224 = arith.select %223, %219, %197 : vector<4x32xi1>, vector<4x32xf32>
    %225 = vector.shape_cast %221 : vector<4x1xi1> to vector<4x1xi1>
    %226 = vector.broadcast %225 : vector<4x1xi1> to vector<4x32xi1>
    %227 = arith.select %226, %216, %200 : vector<4x32xi1>, vector<4x32xf32>
    %228 = vector.extract_strided_slice %35 {offsets = [0, 7, 0], sizes = [4, 1, 128], strides = [1, 1, 1]} : vector<4x8x128xf32> to vector<4x1x128xf32>
    %229 = vector.shape_cast %228 : vector<4x1x128xf32> to vector<4x128xf32>
    %cst_40 = arith.constant dense<0.000000e+00> : vector<4x128xf32>
    %230 = tpu.matmul %224, %36, %cst_40 {dimension_numbers = #tpu.dot_dimension_numbers<[1], [0], [0], [1], [0, 0, 1, 1], [], []>} : vector<4x32xf32>, vector<32x128xf32>, vector<4x128xf32> -> vector<4x128xf32>
    %231 = arith.addf %229, %230 : vector<4x128xf32>
    %232 = arith.negf %231 : vector<4x128xf32>
    %233 = math.exp %232 : vector<4x128xf32>
    %cst_41 = arith.constant 1.000000e+00 : f32
    %234 = vector.broadcast %cst_41 : f32 to vector<4x128xf32>
    %235 = arith.addf %234, %233 : vector<4x128xf32>
    %236 = arith.divf %234, %235 : vector<4x128xf32>
    %237 = math.tanh %231 : vector<4x128xf32>
    %238 = vector.extract_strided_slice %236 {offsets = [0, 32], sizes = [4, 32], strides = [1, 1]} : vector<4x128xf32> to vector<4x32xf32>
    %239 = arith.mulf %238, %227 : vector<4x32xf32>
    %240 = vector.extract_strided_slice %236 {offsets = [0, 0], sizes = [4, 32], strides = [1, 1]} : vector<4x128xf32> to vector<4x32xf32>
    %241 = vector.extract_strided_slice %237 {offsets = [0, 64], sizes = [4, 32], strides = [1, 1]} : vector<4x128xf32> to vector<4x32xf32>
    %242 = arith.mulf %240, %241 : vector<4x32xf32>
    %243 = arith.addf %239, %242 : vector<4x32xf32>
    %244 = vector.extract_strided_slice %236 {offsets = [0, 96], sizes = [4, 32], strides = [1, 1]} : vector<4x128xf32> to vector<4x32xf32>
    %245 = math.tanh %243 : vector<4x32xf32>
    %246 = arith.mulf %244, %245 : vector<4x32xf32>
    %c7_i32 = arith.constant 7 : i32
    %247 = vector.broadcast %c7_i32 : i32 to vector<4x1xi32>
    %248 = arith.cmpi sgt, %0, %247 : vector<4x1xi32>
    %249 = vector.shape_cast %248 : vector<4x1xi1> to vector<4x1xi1>
    %250 = vector.broadcast %249 : vector<4x1xi1> to vector<4x32xi1>
    %251 = arith.select %250, %246, %224 : vector<4x32xi1>, vector<4x32xf32>
    %c0_42 = arith.constant 0 : index
    %c0_43 = arith.constant 0 : index
    %252 = vector.load %arg12[%c0_42, %c0_43] : memref<4x32xf32, #tpu.memory_space<vmem>>, vector<4x32xf32>
    tpu.vector_store %arg12[%c0_42, %c0_43], %251 {strides = array<i32>} : memref<4x32xf32, #tpu.memory_space<vmem>>, vector<4x32xf32>,
    %c0_44 = arith.constant 0 : index
    %c0_45 = arith.constant 0 : index
    %253 = vector.load %arg8[%c0_44, %c0_45] : memref<32x32xf32, #tpu.memory_space<vmem>>, vector<32x32xf32>
    %cst_46 = arith.constant dense<0.000000e+00> : vector<4x32xf32>
    %254 = tpu.matmul %251, %253, %cst_46 {dimension_numbers = #tpu.dot_dimension_numbers<[1], [0], [0], [1], [0, 0, 1, 1], [], []>} : vector<4x32xf32>, vector<32x32xf32>, vector<4x32xf32> -> vector<4x32xf32>
    %c0_47 = arith.constant 0 : index
    %c0_48 = arith.constant 0 : index
    %255 = vector.load %arg10[%c0_47, %c0_48] : memref<1x32xf32, #tpu.memory_space<vmem>>, vector<1x32xf32>
    %256 = vector.broadcast %255 : vector<1x32xf32> to vector<4x32xf32>
    %257 = arith.addf %254, %256 : vector<4x32xf32>
    %c0_49 = arith.constant 0 : index
    %c0_50 = arith.constant 0 : index
    %258 = vector.load %arg9[%c0_49, %c0_50] : memref<32x32xf32, #tpu.memory_space<vmem>>, vector<32x32xf32>
    %cst_51 = arith.constant 0.000000e+00 : f32
    %259 = vector.broadcast %cst_51 : f32 to vector<4x32xf32>
    %cst_52 = arith.constant dense<0.000000e+00> : vector<4x32xf32>
    %260 = tpu.matmul %259, %258, %cst_52 {dimension_numbers = #tpu.dot_dimension_numbers<[1], [0], [0], [1], [0, 0, 1, 1], [], []>} : vector<4x32xf32>, vector<32x32xf32>, vector<4x32xf32> -> vector<4x32xf32>
    %261 = arith.addf %257, %260 : vector<4x32xf32>
    %cst_53 = arith.constant 0.000000e+00 : f32
    %262 = vector.broadcast %cst_53 : f32 to vector<4x32xf32>
    %263 = arith.maximumf %261, %262 : vector<4x32xf32>
    %cst_54 = arith.constant dense<0.000000e+00> : vector<4x32xf32>
    %264 = tpu.matmul %263, %258, %cst_54 {dimension_numbers = #tpu.dot_dimension_numbers<[1], [0], [0], [1], [0, 0, 1, 1], [], []>} : vector<4x32xf32>, vector<32x32xf32>, vector<4x32xf32> -> vector<4x32xf32>
    %265 = arith.addf %257, %264 : vector<4x32xf32>
    %cst_55 = arith.constant 0.000000e+00 : f32
    %266 = vector.broadcast %cst_55 : f32 to vector<4x32xf32>
    %267 = arith.maximumf %265, %266 : vector<4x32xf32>
    %cst_56 = arith.constant dense<0.000000e+00> : vector<4x32xf32>
    %268 = tpu.matmul %267, %258, %cst_56 {dimension_numbers = #tpu.dot_dimension_numbers<[1], [0], [0], [1], [0, 0, 1, 1], [], []>} : vector<4x32xf32>, vector<32x32xf32>, vector<4x32xf32> -> vector<4x32xf32>
    %269 = arith.addf %257, %268 : vector<4x32xf32>
    %cst_57 = arith.constant 0.000000e+00 : f32
    %270 = vector.broadcast %cst_57 : f32 to vector<4x32xf32>
    %271 = arith.maximumf %269, %270 : vector<4x32xf32>
    %cst_58 = arith.constant dense<0.000000e+00> : vector<4x32xf32>
    %272 = tpu.matmul %271, %258, %cst_58 {dimension_numbers = #tpu.dot_dimension_numbers<[1], [0], [0], [1], [0, 0, 1, 1], [], []>} : vector<4x32xf32>, vector<32x32xf32>, vector<4x32xf32> -> vector<4x32xf32>
    %273 = arith.addf %257, %272 : vector<4x32xf32>
    %cst_59 = arith.constant 0.000000e+00 : f32
    %274 = vector.broadcast %cst_59 : f32 to vector<4x32xf32>
    %275 = arith.maximumf %273, %274 : vector<4x32xf32>
    %276 = vector.shape_cast %263 : vector<4x32xf32> to vector<4x1x32xf32>
    %277 = vector.shape_cast %267 : vector<4x32xf32> to vector<4x1x32xf32>
    %278 = vector.shape_cast %271 : vector<4x32xf32> to vector<4x1x32xf32>
    %279 = vector.shape_cast %275 : vector<4x32xf32> to vector<4x1x32xf32>
    %280 = tpu.concatenate %276, %277, %278, %279 in 1 : vector<4x1x32xf32>, vector<4x1x32xf32>, vector<4x1x32xf32>, vector<4x1x32xf32> -> vector<4x4x32xf32>
    %281 = vector.shape_cast %29 : vector<32x32xf32> to vector<4x8x32xf32>
    "tpu.trace_start"() <{level = 10 : i32, message = "bie,ble->bil"}> : () -> ()
    %cst_60 = arith.constant dense<0.000000e+00> : vector<4x4x8xf32>
    %282 = tpu.matmul %280, %281, %cst_60 {dimension_numbers = #tpu.dot_dimension_numbers<[2], [2], [1], [1], [0, 0, 0, 1, 1, 1], [0], [0]>} : vector<4x4x32xf32>, vector<4x8x32xf32>, vector<4x4x8xf32> -> vector<4x4x8xf32>
    "tpu.trace_stop"() : () -> ()
    %283 = tpu.iota {dimensions = array<i32: 2>} : vector<4x4x8xi32>
    %284 = vector.shape_cast %0 : vector<4x1xi32> to vector<4x1x1xi32>
    %285 = vector.broadcast %284 : vector<4x1x1xi32> to vector<4x4x8xi32>
    %286 = arith.cmpi slt, %283, %285 : vector<4x4x8xi32>
    %cst_61 = arith.constant 0xFF800000 : f32
    %287 = vector.broadcast %cst_61 : f32 to vector<4x4x8xf32>
    %288 = arith.select %286, %282, %287 : vector<4x4x8xi1>, vector<4x4x8xf32>
    %cst_62 = arith.constant dense<0xFF800000> : vector<4x4xf32>
    %289 = vector.multi_reduction <maximumf>, %288, %cst_62 [2] : vector<4x4x8xf32> to vector<4x4xf32>
    %290 = vector.shape_cast %289 : vector<4x4xf32> to vector<4x4x1xf32>
    %291 = vector.broadcast %290 : vector<4x4x1xf32> to vector<4x4x8xf32>
    %292 = arith.subf %288, %291 : vector<4x4x8xf32>
    %293 = math.exp %292 : vector<4x4x8xf32>
    %cst_63 = arith.constant dense<0.000000e+00> : vector<4x4xf32>
    %294 = vector.multi_reduction <add>, %293, %cst_63 [2] : vector<4x4x8xf32> to vector<4x4xf32>
    %295 = vector.shape_cast %294 : vector<4x4xf32> to vector<4x4x1xf32>
    %296 = vector.broadcast %295 : vector<4x4x1xf32> to vector<4x4x8xf32>
    %297 = arith.divf %293, %296 : vector<4x4x8xf32>
    "tpu.trace_start"() <{level = 10 : i32, message = "bil,ble->bie"}> : () -> ()
    %cst_64 = arith.constant dense<0.000000e+00> : vector<4x4x32xf32>
    %298 = tpu.matmul %297, %281, %cst_64 {dimension_numbers = #tpu.dot_dimension_numbers<[2], [1], [1], [2], [0, 0, 0, 1, 1, 2], [0], [0]>} : vector<4x4x8xf32>, vector<4x8x32xf32>, vector<4x4x32xf32> -> vector<4x4x32xf32>
    "tpu.trace_stop"() : () -> ()
    %c0_65 = arith.constant 0 : index
    %c0_66 = arith.constant 0 : index
    %c0_67 = arith.constant 0 : index
    %299 = vector.load %arg11[%c0_65, %c0_66, %c0_67] : memref<4x4x32xf32, #tpu.memory_space<vmem>>, vector<4x4x32xf32>
    tpu.vector_store %arg11[%c0_65, %c0_66, %c0_67], %298 {strides = array<i32>} : memref<4x4x32xf32, #tpu.memory_space<vmem>>, vector<4x4x32xf32>,
    return
  }
}

</mosaic_0001>

<bundles_post_ra>
// kernel: tpu_custom_call.1
= control target key start
LH: loop header
LB: loop body
LE: loop exit
PB: predicated region body
PF: predicated region fallthrough
CT: control target
= control target key end

     0   :  { %18 = vsyncpa [#allocation3], 0  ;;  %s5867_s0 = inlined_call_operand.hbm [shape: f32[4,8,32], index: 0, kind: input, shape index: {}]   ;;  %s5868_s1 = inlined_call_operand.vmem [shape: s32[4,1], index: 1, kind: input, shape index: {}]   ;;  %s5869_s2 = inlined_call_operand.hbm [shape: f32[10,32], index: 2, kind: input, shape index: {}]   ;;  %s5870_s3 = inlined_call_operand.hbm [shape: f32[32,32], index: 3, kind: input, shape index: {}]   ;;  %s5871_s4 = inlined_call_operand.vmem [shape: f32[1,32], index: 4, kind: input, shape index: {}]   ;;  %s5872_s5 = inlined_call_operand.hbm [shape: f32[32,128], index: 5, kind: input, shape index: {}]   ;;  %s5873_s6 = inlined_call_operand.hbm [shape: f32[32,128], index: 6, kind: input, shape index: {}]   ;;  %s5874_s7 = inlined_call_operand.vmem [shape: f32[1,128], index: 7, kind: input, shape index: {}]   ;;  %s5875_s8 = inlined_call_operand.vmem [shape: f32[32,32], index: 8, kind: input, shape index: {}]   ;;  %s5876_s9 = inlined_call_operand.hbm [shape: f32[32,32], index: 9, kind: input, shape index: {}]   ;;  %s5877_s10 = inlined_call_operand.vmem [shape: f32[1,32], index: 10, kind: input, shape index: {}]   ;;  %s5878_s11 = inlined_call_operand.hbm [shape: f32[4,4,32], index: 11, kind: output, shape index: {0}]   ;;  %s5879_s12 = inlined_call_operand.hbm [shape: f32[4,32], index: 12, kind: output, shape index: {1}]  }
   0x1   :  { %19 = vsyncpa [#allocation6], 0 }
   0x2   :  { %20 = vsyncpa [#allocation9], 0 }
   0x3   :  { %21 = vsyncpa [#allocation12], 0 }
   0x4   :  { %22 = vsyncpa [#allocation4], 0 }
   0x5   :  { %23 = vsyncpa [#allocation15], 0  ;;  %s4989_s21 = smov [#allocation5]   ;;  %s4990_s23 = smov [#allocation8]  }
   0x6   :  { %s43_s22 = sshll.u32 %s4989_s21, 4  ;;  %s69_s24 = sshll.u32 %s4990_s23, 4  ;;  %s44_s22 = int_to_ptr.vmem [resolvable:$true] %s43_s22  ;;  %s5074_s24 = int_to_ptr.vmem [resolvable:$true] %s69_s24 }
   0x7   :  { %s4801_s27 = scalar_lea.hbm %s5869_s2, 256 }
   0x8   :  { %p4802_p0 = scmp.ne.s32.totalorder %s5869_s2, %s4801_s27  ;;  %p4805_p1 = scmp.lt.u32.totalorder %s4801_s27, %s5869_s2 }
   0xa   :  { %p4807_p2 = pnand %p4805_p1, %p4802_p0 }
   0xc   :  { %4810 = shalt.err (!%p4807_p2)
}
   0xd   :  { %s4811_s14 = scalar_lea.vmem %s44_s22, 256  ;;  %p4816_p4 = scmp.lt.s32.totalorder %s44_s22, %s44_s22 }
   0xe   :  { %p4812_p3 = scmp.ne.s32.totalorder %s44_s22, %s4811_s14  ;;  %p4817_p5 = scmp.lt.s32.totalorder %s4811_s14, %s4811_s14 }
  0x10   :  { %p4818_p6 = por %p4817_p5, %p4816_p4 }
  0x12   :  { %p4819_p7 = pnand %p4818_p6, %p4812_p3 }
  0x14   :  { %4822 = shalt.err (!%p4819_p7)
}
  0x15   :  { %s4991_s15 = smov 128   ;;  %s4992_s16 = smov 8  }
  0x16   :  { %49 = dma.hbm_to_vmem [thread:$0]  %s5869_s2, 256, %s44_s22, [#allocation6], %s4991_s15, %s4991_s15, %s4992_s16  }
  0x17   :  { %s4823_s21 = scalar_lea.hbm %s5872_s5, 512 }
  0x18   :  { %p4824_p8 = scmp.ne.s32.totalorder %s5872_s5, %s4823_s21  ;;  %p4827_p9 = scmp.lt.u32.totalorder %s4823_s21, %s5872_s5 }
  0x1a   :  { %p4829_p10 = pnand %p4827_p9, %p4824_p8 }
  0x1c   :  { %4832 = shalt.err (!%p4829_p10)
}
  0x1d   :  { %s4833_s28 = scalar_lea.vmem %s5074_s24, 512  ;;  %p4838_p12 = scmp.lt.s32.totalorder %s5074_s24, %s5074_s24 }
  0x1e   :  { %p4834_p11 = scmp.ne.s32.totalorder %s5074_s24, %s4833_s28  ;;  %p4839_p13 = scmp.lt.s32.totalorder %s4833_s28, %s4833_s28 }
  0x20   :  { %p4840_p0 = por %p4839_p13, %p4838_p12 }
  0x22   :  { %p4841_p1 = pnand %p4840_p0, %p4834_p11 }
  0x24   :  { %4844 = shalt.err (!%p4841_p1)
}
  0x25   :  { %75 = dma.hbm_to_vmem [thread:$0]  %s5872_s5, 512, %s5074_s24, [#allocation9], %s4991_s15, %s4991_s15, %s4992_s16  }
  0x26   :  { %s4993_s29 = smov [#allocation2]   ;;  %s4994_s13 = smov [#allocation7]  }
  0x27   :  { %s29_s30 = sshll.u32 %s4993_s29, 4  ;;  %s55_s14 = sshll.u32 %s4994_s13, 4  ;;  %s30_s30 = int_to_ptr.vmem [resolvable:$true] %s29_s30  ;;  %s5111_s14 = int_to_ptr.vmem [resolvable:$true] %s55_s14 }
  0x28   :  { %s4845_s19 = scalar_lea.hbm %s5867_s0, 512 }
  0x29   :  { %p4846_p2 = scmp.ne.s32.totalorder %s5867_s0, %s4845_s19  ;;  %p4849_p3 = scmp.lt.u32.totalorder %s4845_s19, %s5867_s0 }
  0x2b   :  { %p4851_p4 = pnand %p4849_p3, %p4846_p2 }
  0x2d   :  { %4854 = shalt.err (!%p4851_p4)
}
  0x2e   :  { %s4855_s5 = scalar_lea.vmem %s30_s30, 512  ;;  %p4860_p6 = scmp.lt.s32.totalorder %s30_s30, %s30_s30 }
  0x2f   :  { %p4856_p5 = scmp.ne.s32.totalorder %s30_s30, %s4855_s5  ;;  %p4861_p7 = scmp.lt.s32.totalorder %s4855_s5, %s4855_s5 }
  0x31   :  { %p4862_p8 = por %p4861_p7, %p4860_p6 }
  0x33   :  { %p4863_p9 = pnand %p4862_p8, %p4856_p5 }
  0x35   :  { %4866 = shalt.err (!%p4863_p9)
}
  0x36   :  { %35 = dma.hbm_to_vmem [thread:$0]  %s5867_s0, 512, %s30_s30, [#allocation3], %s4991_s15, %s4991_s15, %s4992_s16  }
  0x37   :  { %s4867_s2 = scalar_lea.hbm %s5870_s3, 512 }
  0x38   :  { %p4868_p10 = scmp.ne.s32.totalorder %s5870_s3, %s4867_s2  ;;  %p4871_p11 = scmp.lt.u32.totalorder %s4867_s2, %s5870_s3 }
  0x3a   :  { %p4873_p12 = pnand %p4871_p11, %p4868_p10 }
  0x3c   :  { %4876 = shalt.err (!%p4873_p12)
}
  0x3d   :  { %s4877_s18 = scalar_lea.vmem %s5111_s14, 512  ;;  %p4882_p0 = scmp.lt.s32.totalorder %s5111_s14, %s5111_s14 }
  0x3e   :  { %p4878_p13 = scmp.ne.s32.totalorder %s5111_s14, %s4877_s18  ;;  %p4883_p1 = scmp.lt.s32.totalorder %s4877_s18, %s4877_s18 }
  0x40   :  { %p4884_p2 = por %p4883_p1, %p4882_p0 }
  0x42   :  { %p4885_p3 = pnand %p4884_p2, %p4878_p13 }
  0x44   :  { %4888 = shalt.err (!%p4885_p3)
}
  0x45   :  { %61 = dma.hbm_to_vmem [thread:$0]  %s5870_s3, 512, %s5111_s14, [#allocation6], %s4991_s15, %s4991_s15, %s4992_s16  }
  0x46   :  { %s4995_s19 = smov [#allocation10]   ;;  %s4996_s21 = smov [#allocation11]  }
  0x47   :  { %s81_s20 = sshll.u32 %s4995_s19, 4  ;;  %s97_s23 = sshll.u32 %s4996_s21, 4  ;;  %s82_s20 = int_to_ptr.vmem [resolvable:$true] %s81_s20  ;;  %s5148_s23 = int_to_ptr.vmem [resolvable:$true] %s97_s23 }
  0x48   :  { %s4889_s24 = scalar_lea.hbm %s5873_s6, 512 }
  0x49   :  { %p4890_p4 = scmp.ne.s32.totalorder %s5873_s6, %s4889_s24  ;;  %p4893_p5 = scmp.lt.u32.totalorder %s4889_s24, %s5873_s6 }
  0x4b   :  { %p4895_p6 = pnand %p4893_p5, %p4890_p4 }
  0x4d   :  { %4898 = shalt.err (!%p4895_p6)
}
  0x4e   :  { %s4899_s3 = scalar_lea.vmem %s82_s20, 512  ;;  %p4904_p8 = scmp.lt.s32.totalorder %s82_s20, %s82_s20 }
  0x4f   :  { %p4900_p7 = scmp.ne.s32.totalorder %s82_s20, %s4899_s3  ;;  %p4905_p9 = scmp.lt.s32.totalorder %s4899_s3, %s4899_s3 }
  0x51   :  { %p4906_p10 = por %p4905_p9, %p4904_p8 }
  0x53   :  { %p4907_p11 = pnand %p4906_p10, %p4900_p7 }
  0x55   :  { %4910 = shalt.err (!%p4907_p11)
}
  0x56   :  { %87 = dma.hbm_to_vmem [thread:$0]  %s5873_s6, 512, %s82_s20, [#allocation9], %s4991_s15, %s4991_s15, %s4992_s16  }
  0x57   :  { %s4911_s17 = scalar_lea.hbm %s5876_s9, 512 }
  0x58   :  { %p4912_p12 = scmp.ne.s32.totalorder %s5876_s9, %s4911_s17  ;;  %p4915_p13 = scmp.lt.u32.totalorder %s4911_s17, %s5876_s9 }
  0x5a   :  { %p4917_p0 = pnand %p4915_p13, %p4912_p12 }
  0x5c   :  { %4920 = shalt.err (!%p4917_p0)
}
  0x5d   :  { %s4921_s21 = scalar_lea.vmem %s5148_s23, 512  ;;  %p4926_p2 = scmp.lt.s32.totalorder %s5148_s23, %s5148_s23 }
  0x5e   :  { %p4922_p1 = scmp.ne.s32.totalorder %s5148_s23, %s4921_s21  ;;  %p4927_p3 = scmp.lt.s32.totalorder %s4921_s21, %s4921_s21 }
  0x60   :  { %p4928_p4 = por %p4927_p3, %p4926_p2 }
  0x62   :  { %p4929_p5 = pnand %p4928_p4, %p4922_p1 }
  0x64   :  { %4932 = shalt.err (!%p4929_p5)
}
  0x65   :  { %103 = dma.hbm_to_vmem [thread:$0]  %s5876_s9, 512, %s5148_s23, [#allocation12], %s4991_s15, %s4991_s15, %s4992_s16  }
  0x66   :  { %4977 = dma.done.wait [#allocation3], 512  }
  0x67   :  { %4978 = vsyncadd [#allocation3], 4294966784 }
  0x68   :  { %4979 = dma.done.wait [#allocation6], 768  }
  0x69   :  { %4980 = vsyncadd [#allocation6], 4294966528 }
  0x6a   :  { %4981 = dma.done.wait [#allocation9], 1024  }
  0x6b   :  { %4982 = vsyncadd [#allocation9], 4294966272 }
  0x6c   :  { %4983 = dma.done.wait [#allocation12], 512  }
  0x6d   :  { %4984 = vsyncadd [#allocation12], 4294966784  ;;  %vm136_vm0 = vcmask 261120   ;;  %v133_v0 = vld [vmem:[#allocation5] sm:$0xff]  ;;  %v134_v1 = vld [vmem:[#allocation5 + $0x8] sm:$0x3] }
  0x6e   :  { %vm4369_vm1 = vmpackc.low %vm136_vm0, %vm136_vm0  ;;  %v129_v2 = vld [vmem:[#allocation7] sm:$0xff]  ;;  %v5187_v3 = vpack.c.bf16 %v134_v1, %v133_v0  ;;  %v3931_v4 = vld [vmem:[%s5871_s4] ss:$0 sm:$0xff]  ;;  %vm444_vm2 = vcmask 80896   ;;  %v4997_v42 = vmov 0   ;;  %vm593_vm3 = vcmask 1041408  }
  0x6f   :  { %4127 = vmatprep.mubr.msk.f32.mxu0 %vm136_vm0, %v129_v2  ;;  %v130_v5 = vld [vmem:[#allocation7 + $0x8] sm:$0xff]  ;;  %v131_v6 = vld [vmem:[#allocation7 + $0x10] sm:$0xff]  ;;  %v246_v7 = vmul.f32 %v3931_v4, %v129_v2  ;;  %v132_v13 = vld [vmem:[#allocation7 + $0x18] sm:$0xff]  ;;  %4503 = vset.pattern.permute.xlu1 %v4997_v42  ;;  %vm4998_vm4 = vmmov 1   ;;  %vm5000_vm6 = vmmov 0   ;;  %s5003_s15 = smov 32  }
  0x70   :  { %v248_v8 = vmul.f32 %v3931_v4, %v131_v6  ;;  %v247_v9 = vmul.f32 %v3931_v4, %v130_v5  ;;  %4370 = vmatprep.subr.msk.bf16.mxu0 %vm4369_vm1, %v5187_v3  ;;  %v249_v14 = vmul.f32 %v3931_v4, %v132_v13  ;;  %v5202_v16 = vld [vmem:[#allocation2] sm:$0xff]  ;;  %v5208_v26 = vld [vmem:[#allocation2 + $0x8] sm:$0xff]  ;;  %v5210_v28 = vld [vmem:[#allocation2 + $0x10] sm:$0xff]  ;;  %4502 = vset.pattern.permute.xlu0 %v4997_v42  ;;  %vm989_vm8 = vcmask 1041409   ;;  %s5004_s24 = smov 96  }
  0x71   :  { %4373 = vmatpush3.bf16.xpose.msk.msra.mxu0 %vm4369_vm1, %v5187_v3  ;;  %v250_v10 = vsel %vm136_vm0, %v246_v7, 0.0  ;;  %4141 = vmatprep.mubr.msk.f32.mxu1 %vm136_vm0, %v5202_v16  ;;  %v5216_v29 = vld [vmem:[#allocation2 + $0x18] sm:$0xff]  ;;  %vm4391_vm5 = vmpackc.low %vm593_vm3, %vm4998_vm4  ;;  %vm992_vm9 = vcmask 1042434   ;;  %vm995_vm10 = vcmask 1043459  }
  0x72   :  { %v256_v11 = vsel %vm136_vm0, %v248_v8, 0.0  ;;  %251 = vadd.xlane.f32.xlu0 %v250_v10  ;;  %v253_v12 = vsel %vm136_vm0, %v247_v9, 0.0  ;;  %v259_v15 = vsel %vm136_vm0, %v249_v14, 0.0 }
  0x73   :  { %257 = vadd.xlane.f32.xlu1 %v256_v11 }
  0x76   :  { %254 = vadd.xlane.f32.xlu0 %v253_v12 }
  0x77   :  { %260 = vadd.xlane.f32.xlu1 %v259_v15 }
  0x78   :  { %4128 = vmatmul.mubr.msk.f32.vlgmr.msra.gmra.mrb[0].mxu0 %vm136_vm0, %v130_v5 }
  0x79   :  { %4130 = vmatprep.mubr.msk.f32.mxu0 %vm136_vm0, %v131_v6 }
  0x7c   :  { %4131 = vmatmul.mubr.msk.f32.gmra.mrb[2].mxu0 %vm136_vm0, %v132_v13 }
  0x7d   :  { %4155 = vmatprep.mubr.msk.f32.mxu0 %vm136_vm0, %v5202_v16 }
  0xff   :  { %v252_v17 = vpop.xlane.xlu0 %251 }
 0x100   :  { %v258_v27 = vpop.xlane.xlu1 %257 }
 0x103   :  { %v255_v18 = vpop.xlane.xlu0 %254 }
 0x104   :  { %v4382_v19 = vpack.c.bf16 %v255_v18, %v252_v17  ;;  %v261_v30 = vpop.xlane.xlu1 %260 }
 0x105   :  { %v4386_v31 = vpack.c.bf16 %v261_v30, %v258_v27 }
 0x106   :  { %4383 = vmatprep.subr.bf16.mxu0 %v4382_v19 }
 0x107   :  { %4385 = vmatpush3.bf16.msra.mxu0 %v4382_v19 }
 0x108   :  { %4387 = vmatprep.subr.bf16.mxu0 %v4386_v31 }
 0x10b   :  { %4389 = vmatpush3.bf16.msra.mxu0 %v4386_v31 }
 0x10e   :  { %4156 = vmatmul.mubr.msk.f32.vlgmr.msra.gmra.mrb[4].mxu0 %vm136_vm0, %v5208_v26 }
 0x10f   :  { %4158 = vmatprep.mubr.msk.f32.mxu0 %vm136_vm0, %v5210_v28 }
 0x112   :  { %4159 = vmatmul.mubr.msk.f32.gmra.mrb[6].mxu0 %vm136_vm0, %v5216_v29 }
 0x14b   :  { %v4129_v20 = vpop.f32.mrb[0].mxu0 }
 0x14c   :  { %v221_v21 = vpop.f32.mrb[1].mxu0 }
 0x14d   :  { %v4374_v22 = vpack.c.bf16 %v4129_v20, %v221_v21 }
 0x14f   :  { %v4132_v23 = vpop.f32.mrb[2].mxu0  ;;  %4375 = vmatprep.subr.bf16.mxu1 %v4374_v22 }
 0x150   :  { %v231_v24 = vpop.f32.mrb[3].mxu0  ;;  %4377 = vmatpush3.bf16.msra.mxu1 %v4374_v22 }
 0x151   :  { %v4378_v25 = vpack.c.bf16 %v4132_v23, %v231_v24 }
 0x153   :  { %4379 = vmatprep.subr.bf16.mxu1 %v4378_v25 }
 0x154   :  { %4381 = vmatpush3.bf16.msra.mxu1 %v4378_v25 }
 0x155   :  { %4392 = vmatprep.subr.msk.bf16.mxu1 %vm4391_vm5, %v5187_v3 }
 0x157   :  { %4142 = vmatmul.mubr.msk.f32.vlgmr.msra.gmra.mrb[0].mxu1 %vm136_vm0, %v5208_v26 }
 0x158   :  { %4144 = vmatprep.mubr.msk.f32.mxu1 %vm136_vm0, %v5210_v28  ;;  %4395 = vmatpush3.bf16.msk.msra.mxu1 %vm4391_vm5, %v5187_v3 }
 0x15b   :  { %4145 = vmatmul.mubr.msk.f32.gmra.mrb[2].mxu1 %vm136_vm0, %v5216_v29 }
 0x1e1   :  { %v4157_v40 = vpop.f32.mrb[4].mxu0 }
 0x1e2   :  { %v425_v41 = vpop.f32.mrb[5].mxu0 }
 0x1e5   :  { %v4160_v43 = vpop.f32.mrb[6].mxu0 }
 0x1e6   :  { %v435_v44 = vpop.f32.mrb[7].mxu0 }
 0x22a   :  { %v4143_v32 = vpop.f32.mrb[0].mxu1 }
 0x22b   :  { %v340_v33 = vpop.f32.mrb[1].mxu1  ;;  %v448_v34 = vsel %vm444_vm2, %v4143_v32, -inf }
 0x22c   :  { %449 = vmax.xlane.f32.xlu1 %v448_v34  ;;  %v445_v35 = vsel %vm444_vm2, %v340_v33, -inf }
 0x22d   :  { %446 = vmax.xlane.f32.xlu0 %v445_v35 }
 0x22e   :  { %v4146_v36 = vpop.f32.mrb[2].mxu1 }
 0x22f   :  { %v350_v37 = vpop.f32.mrb[3].mxu1  ;;  %v454_v38 = vsel %vm444_vm2, %v4146_v36, -inf }
 0x230   :  { %455 = vmax.xlane.f32.xlu1 %v454_v38  ;;  %v451_v39 = vsel %vm444_vm2, %v350_v37, -inf }
 0x231   :  { %452 = vmax.xlane.f32.xlu0 %v451_v39 }
 0x2b9   :  { %v450_v45 = vpop.xlane.xlu1 %449 }
 0x2ba   :  { %v458_v46 = vmax.f32 %v450_v45, %v4157_v40  ;;  %v447_v47 = vpop.xlane.xlu0 %446  ;;  %v4999_v45 = vmov 0.0|0.0  }
 0x2bb   :  { %v457_v48 = vmax.f32 %v447_v47, %v425_v41  ;;  %4404 = vmatprep.subr.bf16.mxu1 %v4999_v45  ;;  %v794_v47 = vld [vmem:[#allocation10 + $0x8] sm:$0xff] }
 0x2bc   :  { %v494_v49 = vsub.f32 %v4157_v40, %v458_v46  ;;  %468 = vperm.xlu1 %4503, %v458_v46   ;;  %v793_v46 = vld [vmem:[#allocation10] sm:$0xff] }
 0x2bd   :  { %v493_v50 = vsub.f32 %v425_v41, %v457_v48  ;;  %v456_v51 = vpop.xlane.xlu1 %455  ;;  %463 = vperm.xlu0 %4502, %v457_v48   ;;  %v685_v41 = vld [vmem:[#allocation8] sm:$0xff] }
 0x2be   :  { %v460_v52 = vmax.f32 %v456_v51, %v4160_v43  ;;  %v453_v53 = vpop.xlane.xlu0 %452  ;;  %v499_v14 = vmul.f32 1.442695, %v494_v49  ;;  %v5253_v51 = vpack.c.bf16 %v794_v47, %v793_v46 }
 0x2bf   :  { %v459_v54 = vmax.f32 %v453_v53, %v435_v44  ;;  %v497_v15 = vmul.f32 1.442695, %v493_v50 }
 0x2c0   :  { %v496_v55 = vsub.f32 %v4160_v43, %v460_v52  ;;  %v686_v43 = vld [vmem:[#allocation8 + $0x8] sm:$0xff] }
 0x2c1   :  { %v495_v56 = vsub.f32 %v435_v44, %v459_v54  ;;  %473 = vperm.xlu1 %4503, %v459_v54   ;;  %v4396_v44 = vpack.c.bf16 %v686_v43, %v685_v41 }
 0x2c2   :  { %v503_v18 = vmul.f32 1.442695, %v496_v55 }
 0x2c3   :  { %v501_v17 = vmul.f32 1.442695, %v495_v56  ;;  %4397 = vmatprep.subr.bf16.mxu0 %v4396_v44 }
 0x2c4   :  { %4399 = vmatpush3.bf16.msra.mxu0 %v4396_v44 }
 0x2c5   :  { %478 = vperm.xlu1 %4503, %v460_v52  }
 0x33b   :  { %v469_v57 = vpop.permute.xlu1 %468 }
 0x33c   :  { %v482_v58 = vsub.f32 %v4143_v32, %v469_v57  ;;  %v464_v59 = vpop.permute.xlu0 %463  ;;  %v687_v57 = vld [vmem:[#allocation8 + $0x10] sm:$0xff] }
 0x33d   :  { %v481_v60 = vsub.f32 %v340_v33, %v464_v59 }
 0x33e   :  { %v487_v61 = vmul.f32 1.442695, %v482_v58  ;;  %v688_v58 = vld [vmem:[#allocation8 + $0x18] sm:$0xff] }
 0x33f   :  { %v485_v62 = vmul.f32 1.442695, %v481_v60  ;;  %v4400_v59 = vpack.c.bf16 %v688_v58, %v687_v57  ;;  %v795_v60 = vld [vmem:[#allocation10 + $0x10] sm:$0xff] }
 0x340   :  { %4504 = vpow2.f32 %v487_v61  ;;  %v474_v63 = vpop.permute.xlu1 %473  ;;  %v796_v61 = vld [vmem:[#allocation10 + $0x18] sm:$0xff] }
 0x341   :  { %4506 = vpow2.f32 %v485_v62  ;;  %v483_v0 = vsub.f32 %v350_v37, %v474_v63  ;;  %v5264_v62 = vpack.c.bf16 %v796_v61, %v795_v60  ;;  %4401 = vmatprep.subr.bf16.mxu0 %v4400_v59  ;;  %v5001_v63 = vmov 0.0  }
 0x342   :  { %4403 = vmatpush3.bf16.msra.mxu0 %v4400_v59 }
 0x343   :  { %v489_v1 = vmul.f32 1.442695, %v483_v0  ;;  %4410 = vmatprep.subr.bf16.mxu0 %v4999_v45 }
 0x344   :  { %v479_v2 = vpop.permute.xlu1 %478 }
 0x345   :  { %4508 = vpow2.f32 %v489_v1  ;;  %v484_v4 = vsub.f32 %v4146_v36, %v479_v2 }
 0x347   :  { %v491_v5 = vmul.f32 1.442695, %v484_v4 }
 0x349   :  { %4510 = vpow2.f32 %v491_v5 }
 0x34a   :  { %v5232_v6 = vpop.eup %4504  ;;  %4512 = vpow2.f32 %v499_v14 }
 0x34b   :  { %v5234_v7 = vpop.eup %4506  ;;  %v508_v8 = vsel %vm444_vm2, %v5232_v6, 0.0  ;;  %4514 = vpow2.f32 %v497_v15  ;;  %v3945_v15 = vld [vmem:[%s5874_s7] ss:$0 sm:$0xff]  ;;  %s5002_s7 = smov 64  }
 0x34c   :  { %509 = vadd.xlane.f32.xlu0 %v508_v8  ;;  %v505_v9 = vsel %vm444_vm2, %v5234_v7, 0.0  ;;  %4516 = vpow2.f32 %v501_v17 }
 0x34d   :  { %506 = vadd.xlane.f32.xlu1 %v505_v9  ;;  %4518 = vpow2.f32 %v503_v18 }
 0x34f   :  { %v5240_v10 = vpop.eup %4508 }
 0x350   :  { %v511_v11 = vsel %vm444_vm2, %v5240_v10, 0.0 }
 0x351   :  { %512 = vadd.xlane.f32.xlu1 %v511_v11 }
 0x353   :  { %v5244_v12 = vpop.eup %4510 }
 0x354   :  { %v514_v13 = vsel %vm444_vm2, %v5244_v12, 0.0  ;;  %v4513_v19 = vpop.eup %4512 }
 0x355   :  { %515 = vadd.xlane.f32.xlu1 %v514_v13  ;;  %v4515_v21 = vpop.eup %4514 }
 0x356   :  { %v4517_v25 = vpop.eup %4516 }
 0x357   :  { %v4519_v3 = vpop.eup %4518 }
 0x3d9   :  { %v510_v20 = vpop.xlane.xlu0 %509 }
 0x3da   :  { %v518_v22 = vadd.f32 %v4513_v19, %v510_v20  ;;  %v507_v23 = vpop.xlane.xlu1 %506 }
 0x3db   :  { %v517_v24 = vadd.f32 %v4515_v21, %v507_v23 }
 0x3dc   :  { %4520 = vrcp.f32 %v518_v22 }
 0x3dd   :  { %4522 = vrcp.f32 %v517_v24 }
 0x3de   :  { %v513_v27 = vpop.xlane.xlu1 %512 }
 0x3df   :  { %v519_v30 = vadd.f32 %v4517_v25, %v513_v27 }
 0x3e1   :  { %4524 = vrcp.f32 %v519_v30 }
 0x3e2   :  { %v516_v31 = vpop.xlane.xlu1 %515 }
 0x3e3   :  { %v520_v32 = vadd.f32 %v4519_v3, %v516_v31 }
 0x3e5   :  { %4526 = vrcp.f32 %v520_v32 }
 0x3e6   :  { %v4521_v33 = vpop.eup %4520 }
 0x3e7   :  { %v4523_v34 = vpop.eup %4522  ;;  %564 = vperm.xlu0 %4502, %v4521_v33   ;;  %v530_v35 = vmul.f32 %v4521_v33, %v4513_v19 }
 0x3e8   :  { %559 = vperm.xlu1 %4503, %v4523_v34   ;;  %v529_v39 = vmul.f32 %v4523_v34, %v4515_v21 }
 0x3eb   :  { %v4525_v36 = vpop.eup %4524  ;;  %540 = vperm.xlu0 %4502, %v530_v35  }
 0x3ec   :  { %569 = vperm.xlu1 %4503, %v4525_v36   ;;  %v531_v40 = vmul.f32 %v4525_v36, %v4517_v25 }
 0x3ef   :  { %v4527_v37 = vpop.eup %4526 }
 0x3f0   :  { %574 = vperm.xlu1 %4503, %v4527_v37   ;;  %v532_v38 = vmul.f32 %v4527_v37, %v4519_v3 }
 0x3f2   :  { %550 = vperm.xlu0 %4502, %v532_v38  }
 0x3f4   :  { %535 = vperm.xlu1 %4503, %v529_v39  }
 0x3f8   :  { %545 = vperm.xlu1 %4503, %v531_v40  }
 0x466   :  { %v565_v48 = vpop.permute.xlu0 %564 }
 0x467   :  { %v560_v49 = vpop.permute.xlu1 %559  ;;  %v578_v52 = vmul.f32 %v5232_v6, %v565_v48 }
 0x468   :  { %v577_v50 = vmul.f32 %v5234_v7, %v560_v49 }
 0x46a   :  { %4165 = vmatprep.mubr.msk.f32.mxu1 %vm444_vm2, %v577_v50  ;;  %v541_v1 = vpop.permute.xlu0 %540 }
 0x46b   :  { %v570_v53 = vpop.permute.xlu1 %569  ;;  %4166 = vmatmul.mubr.msk.f32.vlgmr.msra.gmra.mrb[4].mxu1 %vm444_vm2, %v578_v52  ;;  %v554_v5 = vmul.f32 %v541_v1, %v5208_v26 }
 0x46c   :  { %v579_v54 = vmul.f32 %v5240_v10, %v570_v53  ;;  %4406 = vmatpush3.bf16.msra.mxu1 %v5253_v51 }
 0x46d   :  { %4407 = vmatprep.subr.bf16.mxu1 %v4999_v45 }
 0x46e   :  { %4168 = vmatprep.mubr.msk.f32.mxu1 %vm444_vm2, %v579_v54 }
 0x46f   :  { %v575_v55 = vpop.permute.xlu1 %574 }
 0x470   :  { %v580_v56 = vmul.f32 %v5244_v12, %v575_v55  ;;  %4409 = vmatpush3.bf16.msra.mxu1 %v5264_v62 }
 0x471   :  { %4416 = vmatprep.subr.bf16.mxu1 %v4999_v45  ;;  %v551_v10 = vpop.permute.xlu0 %550 }
 0x472   :  { %4169 = vmatmul.mubr.msk.f32.gmra.mrb[6].mxu1 %vm444_vm2, %v580_v56  ;;  %v556_v26 = vmul.f32 %v551_v10, %v5216_v29 }
 0x473   :  { %4193 = vmatprep.mubr.msk.f32.mxu1 %vm5000_vm6, %v5001_v63  ;;  %v536_v0 = vpop.permute.xlu1 %535 }
 0x474   :  { %v553_v2 = vmul.f32 %v536_v0, %v5202_v16 }
 0x476   :  { %4194 = vmatmul.mubr.f32.vlgmr.msra.gmra.mrb[8].mxu1 %v5001_v63 }
 0x477   :  { %4418 = vmatpush3.bf16.msra.mxu1 %v5253_v51  ;;  %4215 = vmatprep.mubr.msk.f32.mxu1 %vm5000_vm6, %v5001_v63  ;;  %v546_v9 = vpop.permute.xlu1 %545 }
 0x478   :  { %4419 = vmatprep.subr.bf16.mxu1 %v4999_v45  ;;  %v555_v16 = vmul.f32 %v546_v9, %v5210_v28 }
 0x47b   :  { %4421 = vmatpush3.bf16.msra.mxu1 %v5264_v62 }
 0x47c   :  { %4428 = vmatprep.subr.bf16.mxu1 %v4999_v45 }
 0x53e   :  { %v4167_v4 = vpop.f32.mrb[4].mxu1 }
 0x53f   :  { %v662_v6 = vpop.f32.mrb[5].mxu1  ;;  %v5282_v8 = vadd.f32 %v4167_v4, %v554_v5 }
 0x540   :  { %v5280_v7 = vadd.f32 %v662_v6, %v553_v2 }
 0x542   :  { %4179 = vmatprep.mubr.msk.f32.mxu0 %vm136_vm0, %v5280_v7 }
 0x543   :  { %4180 = vmatmul.mubr.msk.f32.vlgmr.msra.gmra.mrb[8].mxu0 %vm136_vm0, %v5282_v8 }
 0x544   :  { %4412 = vmatpush3.bf16.msra.mxu0 %v5253_v51 }
 0x545   :  { %v4170_v11 = vpop.f32.mrb[6].mxu1  ;;  %4413 = vmatprep.subr.bf16.mxu0 %v4999_v45 }
 0x546   :  { %v672_v12 = vpop.f32.mrb[7].mxu1  ;;  %v5294_v14 = vadd.f32 %v4170_v11, %v556_v26 }
 0x547   :  { %v5292_v13 = vadd.f32 %v672_v12, %v555_v16 }
 0x548   :  { %4415 = vmatpush3.bf16.msra.mxu0 %v5264_v62 }
 0x549   :  { %4182 = vmatprep.mubr.msk.f32.mxu0 %vm136_vm0, %v5292_v13  ;;  %4422 = vmatprep.subr.bf16.mxu0 %v4999_v45  ;;  %v866_v28 = vpop.f32.mrb[8].mxu1 }
 0x54a   :  { %4183 = vmatmul.mubr.msk.f32.gmra.mrb[10].mxu0 %vm136_vm0, %v5294_v14  ;;  %v4195_v29 = vpop.f32.mrb[9].mxu1  ;;  %v871_v17 = vrot.slane %v866_v28, 1  ;;  %v872_v24 = vrot.slane %v866_v28, 2  ;;  %v873_v30 = vrot.slane %v866_v28, 3 }
 0x54b   :  { %4204 = vmatprep.mubr.msk.f32.mxu0 %vm5000_vm6, %v5001_v63 }
 0x616   :  { %v4181_v18 = vpop.f32.mrb[8].mxu0 }
 0x617   :  { %v5307_v19 = vadd.f32 %v4181_v18, %v3945_v15  ;;  %v774_v20 = vpop.f32.mrb[9].mxu0  ;;  %v5330_v18 = vld [vmem:[%s5868_s1] sm:$0xf] }
 0x618   :  { %v5309_v21 = vadd.f32 %v3945_v15, %v774_v20  ;;  %vm978_vm7 = vcmp.gt.s32.totalorder %v5330_v18, 0  ;;  %vm1212_vm12 = vcmp.gt.s32.totalorder %v5330_v18, 1  ;;  %vm1443_vm14 = vcmp.gt.s32.totalorder %v5330_v18, 2 }
 0x619   :  { %v879_v22 = vadd.f32 %v871_v17, %v5307_v19  ;;  %vm1674_vm1 = vcmp.gt.s32.totalorder %v5330_v18, 3 }
 0x61a   :  { %v878_v23 = vadd.f32 %v866_v28, %v5309_v21 }
 0x61b   :  { %4528 = vtanh.f32 %v879_v22  ;;  %v3951_v38 = vmul.f32 -1.442695, %v879_v22  ;;  %v979_v22 = vsel %vm978_vm7, 1, %v4997_v42 }
 0x61c   :  { %4530 = vtanh.f32 %v878_v23  ;;  %v3950_v39 = vmul.f32 -1.442695, %v878_v23 }
 0x61d   :  { %v4184_v25 = vpop.f32.mrb[10].mxu0 }
 0x61e   :  { %v784_v27 = vpop.f32.mrb[11].mxu0  ;;  %v5313_v3 = vadd.f32 %v4184_v25, %v3945_v15 }
 0x61f   :  { %v5315_v31 = vadd.f32 %v3945_v15, %v784_v27 }
 0x620   :  { %v881_v33 = vadd.f32 %v873_v30, %v5313_v3 }
 0x621   :  { %v880_v32 = vadd.f32 %v872_v24, %v5315_v31 }
 0x622   :  { %v3953_v41 = vmul.f32 -1.442695, %v881_v33 }
 0x623   :  { %4532 = vtanh.f32 %v880_v32  ;;  %v3952_v40 = vmul.f32 -1.442695, %v880_v32 }
 0x624   :  { %4534 = vtanh.f32 %v881_v33 }
 0x625   :  { %v4529_v34 = vpop.eup %4528  ;;  %4536 = vpow2.f32 %v3951_v38 }
 0x626   :  { %920 = vrot.lane.b32.xlu1 %v4529_v34, %s5002_s7  ;;  %v4531_v35 = vpop.eup %4530  ;;  %4538 = vpow2.f32 %v3950_v39 }
 0x627   :  { %4540 = vpow2.f32 %v3952_v40 }
 0x628   :  { %4542 = vpow2.f32 %v3953_v41 }
 0x62a   :  { %918 = vrot.lane.b32.xlu1 %v4531_v35, %s5002_s7 }
 0x62d   :  { %v4533_v36 = vpop.eup %4532 }
 0x62e   :  { %922 = vrot.lane.b32.xlu0 %v4533_v36, %s5002_s7  ;;  %v4535_v37 = vpop.eup %4534 }
 0x62f   :  { %v4537_v43 = vpop.eup %4536 }
 0x630   :  { %v895_v44 = vadd.f32 1.0, %v4537_v43  ;;  %v4539_v46 = vpop.eup %4538 }
 0x631   :  { %v894_v47 = vadd.f32 1.0, %v4539_v46  ;;  %v4541_v48 = vpop.eup %4540 }
 0x632   :  { %924 = vrot.lane.b32.xlu0 %v4535_v37, %s5002_s7  ;;  %4544 = vrcp.f32 %v895_v44  ;;  %v896_v49 = vadd.f32 1.0, %v4541_v48  ;;  %v4543_v50 = vpop.eup %4542 }
 0x633   :  { %4546 = vrcp.f32 %v894_v47  ;;  %v897_v52 = vadd.f32 1.0, %v4543_v50 }
 0x634   :  { %4548 = vrcp.f32 %v896_v49 }
 0x635   :  { %4550 = vrcp.f32 %v897_v52 }
 0x63c   :  { %v4545_v53 = vpop.eup %4544 }
 0x63d   :  { %v4547_v56 = vpop.eup %4546  ;;  %v911_v4 = vmul.f32 0.0, %v4545_v53 }
 0x63e   :  { %v4549_v59 = vpop.eup %4548  ;;  %v910_v9 = vmul.f32 0.0, %v4547_v56 }
 0x63f   :  { %v4551_v0 = vpop.eup %4550  ;;  %v912_v11 = vmul.f32 0.0, %v4549_v59 }
 0x640   :  { %v913_v28 = vmul.f32 0.0, %v4551_v0 }
 0x698   :  { %v921_v54 = vpop.permute.xlu1 %920 }
 0x699   :  { %v931_v55 = vmul.f32 %v4545_v53, %v921_v54 }
 0x69b   :  { %940 = vrot.lane.b32.xlu1 %v931_v55, %s5003_s15 }
 0x69c   :  { %v919_v57 = vpop.permute.xlu1 %918 }
 0x69d   :  { %v930_v58 = vmul.f32 %v4547_v56, %v919_v57 }
 0x69f   :  { %938 = vrot.lane.b32.xlu1 %v930_v58, %s5003_s15 }
 0x6a0   :  { %v923_v60 = vpop.permute.xlu0 %922 }
 0x6a1   :  { %v932_v61 = vmul.f32 %v4549_v59, %v923_v60 }
 0x6a3   :  { %942 = vrot.lane.b32.xlu0 %v932_v61, %s5003_s15 }
 0x6a4   :  { %v925_v1 = vpop.permute.xlu0 %924 }
 0x6a5   :  { %v933_v2 = vmul.f32 %v4551_v0, %v925_v1 }
 0x6a7   :  { %944 = vrot.lane.b32.xlu0 %v933_v2, %s5003_s15 }
 0x70d   :  { %v941_v5 = vpop.permute.xlu1 %940 }
 0x70e   :  { %v951_v6 = vadd.f32 %v941_v5, %v911_v4 }
 0x710   :  { %4552 = vtanh.f32 %v951_v6  ;;  %v1005_v25 = vrot.slane %v951_v6, 7 }
 0x711   :  { %v939_v10 = vpop.permute.xlu1 %938 }
 0x712   :  { %v950_v16 = vadd.f32 %v939_v10, %v910_v9 }
 0x714   :  { %4554 = vtanh.f32 %v950_v16  ;;  %v1006_v30 = vsel %vm989_vm8, %v1005_v25, %v950_v16 }
 0x715   :  { %v943_v26 = vpop.permute.xlu0 %942 }
 0x716   :  { %v952_v12 = vadd.f32 %v943_v26, %v912_v11 }
 0x718   :  { %4556 = vtanh.f32 %v952_v12  ;;  %v1007_v23 = vrot.slane %v952_v12, 6 }
 0x719   :  { %v945_v29 = vpop.permute.xlu0 %944 }
 0x71a   :  { %v4553_v15 = vpop.eup %4552  ;;  %v953_v17 = vadd.f32 %v945_v29, %v913_v28  ;;  %v1008_v32 = vsel %vm992_vm9, %v1007_v23, %v1006_v30 }
 0x71b   :  { %964 = vrot.lane.b32.xlu1 %v4553_v15, %s5002_s7 }
 0x71c   :  { %4558 = vtanh.f32 %v953_v17  ;;  %v1009_v27 = vrot.slane %v953_v17, 5 }
 0x71e   :  { %v4555_v20 = vpop.eup %4554  ;;  %v1010_v34 = vsel %vm995_vm10, %v1009_v27, %v1008_v32 }
 0x71f   :  { %962 = vrot.lane.b32.xlu1 %v4555_v20, %s5002_s7 }
 0x722   :  { %v4557_v24 = vpop.eup %4556 }
 0x723   :  { %966 = vrot.lane.b32.xlu0 %v4557_v24, %s5002_s7  ;;  %981 = vperm.xlu1 %4503, %v979_v22  }
 0x726   :  { %v4559_v33 = vpop.eup %4558 }
 0x727   :  { %968 = vrot.lane.b32.xlu0 %v4559_v33, %s5002_s7  ;;  %1011 = vrot.lane.b32.xlu1 %v1010_v34, %s5004_s24 }
 0x78d   :  { %v965_v35 = vpop.permute.xlu1 %964 }
 0x78e   :  { %v975_v38 = vmul.f32 %v4545_v53, %v965_v35 }
 0x790   :  { %v988_v44 = vrot.slane %v975_v38, 7 }
 0x791   :  { %v963_v36 = vpop.permute.xlu1 %962 }
 0x792   :  { %v974_v40 = vmul.f32 %v4547_v56, %v963_v36 }
 0x794   :  { %v990_v48 = vsel %vm989_vm8, %v988_v44, %v974_v40 }
 0x795   :  { %v967_v37 = vpop.permute.xlu0 %966 }
 0x796   :  { %v976_v39 = vmul.f32 %v4549_v59, %v967_v37 }
 0x798   :  { %v991_v41 = vrot.slane %v976_v39, 6 }
 0x799   :  { %v969_v43 = vpop.permute.xlu0 %968 }
 0x79a   :  { %v977_v46 = vmul.f32 %v4551_v0, %v969_v43  ;;  %v993_v49 = vsel %vm992_vm9, %v991_v41, %v990_v48 }
 0x79c   :  { %v994_v47 = vrot.slane %v977_v46, 5 }
 0x79e   :  { %v996_v50 = vsel %vm995_vm10, %v994_v47, %v993_v49 }
 0x79f   :  { %997 = vrot.lane.b32.xlu0 %v996_v50, %s5003_s15 }
 0x7a2   :  { %v982_v52 = vpop.permute.xlu1 %981 }
 0x7a3   :  { %vm983_vm11 = vcmp.eq.s32.totalorder %v982_v52, 1 }
 0x7a6   :  { %v1012_v4 = vpop.permute.xlu1 %1011 }
 0x7a7   :  { %v5363_v9 = vsel %vm983_vm11, %v1012_v4, 0.0 }
 0x7a8   :  { %v1129_v10 = vrot.slane %v5363_v9, 7  ;;  %v1130_v11 = vrot.slane %v5363_v9, 1  ;;  %v1131_v26 = vrot.slane %v5363_v9, 2 }
 0x811   :  { %v998_v54 = vpop.permute.xlu0 %997 }
 0x812   :  { %v5347_v53 = vsel %vm983_vm11, %v998_v54, 0.0 }
 0x813   :  { %4205 = vmatmul.mubr.msk.f32.vlgmr.msra.gmra.mrb[12].mxu0 %vm136_vm0, %v5347_v53 }
 0x814   :  { %4424 = vmatpush3.bf16.msra.mxu0 %v5253_v51  ;;  %4226 = vmatprep.mubr.msk.f32.mxu0 %vm5000_vm6, %v5001_v63 }
 0x815   :  { %4425 = vmatprep.subr.bf16.mxu0 %v4999_v45 }
 0x818   :  { %4427 = vmatpush3.bf16.msra.mxu0 %v5264_v62 }
 0x819   :  { %4434 = vmatprep.subr.bf16.mxu0 %v4999_v45 }
 0x8e6   :  { %v1084_v55 = vpop.f32.mrb[12].mxu0 }
 0x8e7   :  { %v1089_v56 = vrot.slane %v1084_v55, 7  ;;  %v4206_v57 = vpop.f32.mrb[13].mxu0  ;;  %v1090_v58 = vrot.slane %v1084_v55, 1  ;;  %v1097_v60 = vadd.f32 %v1084_v55, %v5307_v19  ;;  %v1091_v61 = vrot.slane %v1084_v55, 2 }
 0x8e9   :  { %v1096_v59 = vadd.f32 %v1089_v56, %v5309_v21  ;;  %v1098_v0 = vadd.f32 %v1090_v58, %v5315_v31  ;;  %v1099_v1 = vadd.f32 %v1091_v61, %v5313_v3  ;;  %v3956_v28 = vmul.f32 -1.442695, %v1097_v60 }
 0x8eb   :  { %4560 = vtanh.f32 %v1096_v59  ;;  %v3955_v12 = vmul.f32 -1.442695, %v1096_v59  ;;  %v3957_v29 = vmul.f32 -1.442695, %v1098_v0  ;;  %v3958_v15 = vmul.f32 -1.442695, %v1099_v1 }
 0x8ec   :  { %4562 = vtanh.f32 %v1097_v60 }
 0x8ed   :  { %4564 = vtanh.f32 %v1098_v0 }
 0x8ee   :  { %4566 = vtanh.f32 %v1099_v1 }
 0x8ef   :  { %4568 = vpow2.f32 %v3955_v12 }
 0x8f0   :  { %4570 = vpow2.f32 %v3956_v28 }
 0x8f1   :  { %4572 = vpow2.f32 %v3957_v29 }
 0x8f2   :  { %4574 = vpow2.f32 %v3958_v15 }
 0x8f5   :  { %v4561_v2 = vpop.eup %4560 }
 0x8f6   :  { %1152 = vrot.lane.b32.xlu0 %v4561_v2, %s5002_s7  ;;  %v4563_v5 = vpop.eup %4562 }
 0x8f7   :  { %v4565_v6 = vpop.eup %4564 }
 0x8f8   :  { %1156 = vrot.lane.b32.xlu1 %v4565_v6, %s5002_s7  ;;  %v4567_v16 = vpop.eup %4566 }
 0x8f9   :  { %v4569_v17 = vpop.eup %4568 }
 0x8fa   :  { %1154 = vrot.lane.b32.xlu0 %v4563_v5, %s5002_s7  ;;  %v4571_v20 = vpop.eup %4570  ;;  %v1112_v22 = vadd.f32 1.0, %v4569_v17 }
 0x8fb   :  { %v4573_v23 = vpop.eup %4572  ;;  %v1113_v24 = vadd.f32 1.0, %v4571_v20 }
 0x8fc   :  { %1158 = vrot.lane.b32.xlu1 %v4567_v16, %s5002_s7  ;;  %v1114_v25 = vadd.f32 1.0, %v4573_v23  ;;  %4576 = vrcp.f32 %v1112_v22  ;;  %v4575_v27 = vpop.eup %4574 }
 0x8fd   :  { %4578 = vrcp.f32 %v1113_v24  ;;  %v1115_v30 = vadd.f32 1.0, %v4575_v27 }
 0x8fe   :  { %1132 = vrot.lane.b32.xlu0 %v1129_v10, %s5003_s15  ;;  %4580 = vrcp.f32 %v1114_v25  ;;  %v1213_v10 = vsel %vm1212_vm12, 1, %v4997_v42 }
 0x8ff   :  { %4582 = vrcp.f32 %v1115_v30 }
 0x900   :  { %1136 = vrot.lane.b32.xlu1 %v1130_v11, %s5003_s15 }
 0x902   :  { %1134 = vrot.lane.b32.xlu0 %v5363_v9, %s5003_s15 }
 0x904   :  { %1138 = vrot.lane.b32.xlu1 %v1131_v26, %s5003_s15 }
 0x906   :  { %v4577_v32 = vpop.eup %4576 }
 0x907   :  { %v4579_v35 = vpop.eup %4578 }
 0x908   :  { %v4581_v36 = vpop.eup %4580 }
 0x909   :  { %v4583_v41 = vpop.eup %4582 }
 0x968   :  { %v1153_v33 = vpop.permute.xlu0 %1152 }
 0x969   :  { %v1164_v34 = vmul.f32 %v4577_v32, %v1153_v33 }
 0x96a   :  { %v1157_v37 = vpop.permute.xlu1 %1156 }
 0x96b   :  { %1172 = vrot.lane.b32.xlu0 %v1164_v34, %s5003_s15  ;;  %v1166_v39 = vmul.f32 %v4581_v36, %v1157_v37 }
 0x96c   :  { %v1155_v38 = vpop.permute.xlu0 %1154 }
 0x96d   :  { %v1165_v40 = vmul.f32 %v4579_v35, %v1155_v38  ;;  %1176 = vrot.lane.b32.xlu1 %v1166_v39, %s5003_s15 }
 0x96e   :  { %v1159_v43 = vpop.permute.xlu1 %1158 }
 0x96f   :  { %1174 = vrot.lane.b32.xlu0 %v1165_v40, %s5003_s15  ;;  %v1167_v44 = vmul.f32 %v4583_v41, %v1159_v43 }
 0x970   :  { %v1133_v46 = vpop.permute.xlu0 %1132 }
 0x971   :  { %1178 = vrot.lane.b32.xlu1 %v1167_v44, %s5003_s15  ;;  %v1144_v49 = vmul.f32 %v4577_v32, %v1133_v46 }
 0x972   :  { %v1137_v47 = vpop.permute.xlu1 %1136 }
 0x973   :  { %v1146_v55 = vmul.f32 %v4581_v36, %v1137_v47 }
 0x974   :  { %v1135_v48 = vpop.permute.xlu0 %1134 }
 0x975   :  { %v1145_v56 = vmul.f32 %v4579_v35, %v1135_v48 }
 0x976   :  { %v1139_v50 = vpop.permute.xlu1 %1138 }
 0x977   :  { %v1147_v61 = vmul.f32 %v4583_v41, %v1139_v50 }
 0x9dd   :  { %v1173_v52 = vpop.permute.xlu0 %1172 }
 0x9de   :  { %v1184_v54 = vadd.f32 %v1173_v52, %v1144_v49 }
 0x9df   :  { %v1177_v57 = vpop.permute.xlu1 %1176 }
 0x9e0   :  { %4584 = vtanh.f32 %v1184_v54  ;;  %v1186_v59 = vadd.f32 %v1177_v57, %v1146_v55  ;;  %v1236_v6 = vrot.slane %v1184_v54, 1 }
 0x9e1   :  { %v1175_v58 = vpop.permute.xlu0 %1174 }
 0x9e2   :  { %v1185_v60 = vadd.f32 %v1175_v58, %v1145_v56  ;;  %4586 = vtanh.f32 %v1186_v59  ;;  %v1238_v26 = vrot.slane %v1186_v59, 7 }
 0x9e3   :  { %v1179_v0 = vpop.permute.xlu1 %1178 }
 0x9e4   :  { %4588 = vtanh.f32 %v1185_v60  ;;  %v1187_v1 = vadd.f32 %v1179_v0, %v1147_v61  ;;  %v1237_v16 = vsel %vm989_vm8, %v1185_v60, %v1236_v6 }
 0x9e5   :  { %v1239_v28 = vsel %vm992_vm9, %v1238_v26, %v1237_v16 }
 0x9e6   :  { %4590 = vtanh.f32 %v1187_v1  ;;  %v1240_v12 = vrot.slane %v1187_v1, 6 }
 0x9e8   :  { %v1241_v29 = vsel %vm995_vm10, %v1240_v12, %v1239_v28 }
 0x9ea   :  { %v4585_v2 = vpop.eup %4584 }
 0x9eb   :  { %1196 = vrot.lane.b32.xlu0 %v4585_v2, %s5002_s7 }
 0x9ec   :  { %v4587_v4 = vpop.eup %4586 }
 0x9ed   :  { %1200 = vrot.lane.b32.xlu1 %v4587_v4, %s5002_s7 }
 0x9ee   :  { %v4589_v5 = vpop.eup %4588 }
 0x9ef   :  { %1198 = vrot.lane.b32.xlu0 %v4589_v5, %s5002_s7 }
 0x9f0   :  { %v4591_v11 = vpop.eup %4590 }
 0x9f1   :  { %1202 = vrot.lane.b32.xlu1 %v4591_v11, %s5002_s7 }
 0x9f3   :  { %1215 = vperm.xlu0 %4502, %v1213_v10  }
 0x9f7   :  { %1242 = vrot.lane.b32.xlu0 %v1241_v29, %s5004_s24 }
 0xa5d   :  { %v1197_v15 = vpop.permute.xlu0 %1196 }
 0xa5e   :  { %v1208_v17 = vmul.f32 %v4577_v32, %v1197_v15 }
 0xa5f   :  { %v1201_v20 = vpop.permute.xlu1 %1200 }
 0xa60   :  { %v1210_v22 = vmul.f32 %v4581_v36, %v1201_v20  ;;  %v1222_v24 = vrot.slane %v1208_v17, 1 }
 0xa61   :  { %v1199_v23 = vpop.permute.xlu0 %1198 }
 0xa62   :  { %v1209_v25 = vmul.f32 %v4579_v35, %v1199_v23  ;;  %v1224_v27 = vrot.slane %v1210_v22, 7 }
 0xa63   :  { %v1203_v30 = vpop.permute.xlu1 %1202 }
 0xa64   :  { %v1223_v33 = vsel %vm989_vm8, %v1209_v25, %v1222_v24  ;;  %v1211_v34 = vmul.f32 %v4583_v41, %v1203_v30 }
 0xa65   :  { %v1225_v37 = vsel %vm992_vm9, %v1224_v27, %v1223_v33 }
 0xa66   :  { %v1226_v38 = vrot.slane %v1211_v34, 6 }
 0xa68   :  { %v1227_v39 = vsel %vm995_vm10, %v1226_v38, %v1225_v37 }
 0xa69   :  { %1228 = vrot.lane.b32.xlu1 %v1227_v39, %s5003_s15 }
 0xa72   :  { %v1216_v40 = vpop.permute.xlu0 %1215 }
 0xa73   :  { %vm1217_vm13 = vcmp.eq.s32.totalorder %v1216_v40, 1 }
 0xa76   :  { %v1243_v52 = vpop.permute.xlu0 %1242 }
 0xa77   :  { %v5413_v56 = vsel %vm1217_vm13, %v1243_v52, %v5363_v9 }
 0xa78   :  { %v1360_v58 = vrot.slane %v5413_v56, 6  ;;  %v1361_v59 = vrot.slane %v5413_v56, 7  ;;  %v1362_v60 = vrot.slane %v5413_v56, 1 }
 0xadb   :  { %v1229_v32 = vpop.permute.xlu1 %1228 }
 0xadc   :  { %v5396_v36 = vsel %vm1217_vm13, %v1229_v32, %v5347_v53 }
 0xadd   :  { %4216 = vmatmul.mubr.msk.f32.vlgmr.msra.gmra.mrb[10].mxu1 %vm136_vm0, %v5396_v36 }
 0xade   :  { %4430 = vmatpush3.bf16.msra.mxu1 %v5253_v51  ;;  %4237 = vmatprep.mubr.msk.f32.mxu1 %vm5000_vm6, %v5001_v63 }
 0xadf   :  { %4431 = vmatprep.subr.bf16.mxu1 %v4999_v45 }
 0xae2   :  { %4433 = vmatpush3.bf16.msra.mxu1 %v5264_v62 }
 0xae3   :  { %4440 = vmatprep.subr.bf16.mxu1 %v4999_v45 }
 0xbb0   :  { %v1315_v35 = vpop.f32.mrb[10].mxu1 }
 0xbb1   :  { %v1320_v41 = vrot.slane %v1315_v35, 6  ;;  %v4217_v43 = vpop.f32.mrb[11].mxu1  ;;  %v1321_v44 = vrot.slane %v1315_v35, 7  ;;  %v1322_v53 = vrot.slane %v1315_v35, 1  ;;  %v1329_v49 = vadd.f32 %v1315_v35, %v5315_v31 }
 0xbb3   :  { %v1327_v46 = vadd.f32 %v1320_v41, %v5309_v21  ;;  %v1328_v47 = vadd.f32 %v1321_v44, %v5307_v19  ;;  %v1330_v48 = vadd.f32 %v1322_v53, %v5313_v3  ;;  %v3962_v1 = vmul.f32 -1.442695, %v1329_v49 }
 0xbb5   :  { %4592 = vtanh.f32 %v1327_v46  ;;  %v3960_v9 = vmul.f32 -1.442695, %v1327_v46  ;;  %v3961_v61 = vmul.f32 -1.442695, %v1328_v47  ;;  %v3963_v0 = vmul.f32 -1.442695, %v1330_v48 }
 0xbb6   :  { %4594 = vtanh.f32 %v1328_v47 }
 0xbb7   :  { %4596 = vtanh.f32 %v1330_v48 }
 0xbb8   :  { %4598 = vtanh.f32 %v1329_v49 }
 0xbb9   :  { %4600 = vpow2.f32 %v3960_v9 }
 0xbba   :  { %4602 = vpow2.f32 %v3961_v61 }
 0xbbb   :  { %4604 = vpow2.f32 %v3963_v0 }
 0xbbc   :  { %4606 = vpow2.f32 %v3962_v1 }
 0xbbf   :  { %v4593_v50 = vpop.eup %4592 }
 0xbc0   :  { %1383 = vrot.lane.b32.xlu1 %v4593_v50, %s5002_s7  ;;  %v4595_v54 = vpop.eup %4594 }
 0xbc1   :  { %v4597_v55 = vpop.eup %4596  ;;  %1385 = vrot.lane.b32.xlu0 %v4595_v54, %s5002_s7 }
 0xbc2   :  { %v4599_v57 = vpop.eup %4598 }
 0xbc3   :  { %v4601_v2 = vpop.eup %4600 }
 0xbc4   :  { %1389 = vrot.lane.b32.xlu1 %v4597_v55, %s5002_s7  ;;  %v1343_v4 = vadd.f32 1.0, %v4601_v2  ;;  %v4603_v5 = vpop.eup %4602 }
 0xbc5   :  { %1387 = vrot.lane.b32.xlu0 %v4599_v57, %s5002_s7  ;;  %v4605_v6 = vpop.eup %4604  ;;  %v1344_v10 = vadd.f32 1.0, %v4603_v5 }
 0xbc6   :  { %4608 = vrcp.f32 %v1343_v4  ;;  %v4607_v16 = vpop.eup %4606  ;;  %v1346_v11 = vadd.f32 1.0, %v4605_v6 }
 0xbc7   :  { %v1345_v26 = vadd.f32 1.0, %v4607_v16  ;;  %4610 = vrcp.f32 %v1344_v10 }
 0xbc8   :  { %1363 = vrot.lane.b32.xlu1 %v1360_v58, %s5003_s15  ;;  %4612 = vrcp.f32 %v1346_v11 }
 0xbc9   :  { %1365 = vrot.lane.b32.xlu0 %v1361_v59, %s5003_s15  ;;  %4614 = vrcp.f32 %v1345_v26  ;;  %v1444_v59 = vsel %vm1443_vm14, 1, %v4997_v42 }
 0xbcc   :  { %1369 = vrot.lane.b32.xlu1 %v1362_v60, %s5003_s15 }
 0xbcd   :  { %1367 = vrot.lane.b32.xlu0 %v5413_v56, %s5003_s15 }
 0xbd0   :  { %v4609_v12 = vpop.eup %4608 }
 0xbd1   :  { %v4611_v15 = vpop.eup %4610 }
 0xbd2   :  { %v4613_v23 = vpop.eup %4612 }
 0xbd3   :  { %v4615_v25 = vpop.eup %4614 }
 0xc32   :  { %v1384_v28 = vpop.permute.xlu1 %1383 }
 0xc33   :  { %v1395_v29 = vmul.f32 %v4609_v12, %v1384_v28  ;;  %v1386_v17 = vpop.permute.xlu0 %1385 }
 0xc34   :  { %v1396_v20 = vmul.f32 %v4611_v15, %v1386_v17 }
 0xc35   :  { %1403 = vrot.lane.b32.xlu0 %v1395_v29, %s5003_s15 }
 0xc36   :  { %v1390_v22 = vpop.permute.xlu1 %1389  ;;  %1405 = vrot.lane.b32.xlu1 %v1396_v20, %s5003_s15 }
 0xc37   :  { %v1398_v24 = vmul.f32 %v4613_v23, %v1390_v22  ;;  %v1388_v27 = vpop.permute.xlu0 %1387 }
 0xc38   :  { %v1397_v30 = vmul.f32 %v4615_v25, %v1388_v27 }
 0xc3a   :  { %1409 = vrot.lane.b32.xlu1 %v1398_v24, %s5003_s15  ;;  %1407 = vrot.lane.b32.xlu0 %v1397_v30, %s5003_s15  ;;  %v1364_v34 = vpop.permute.xlu1 %1363 }
 0xc3b   :  { %v1366_v33 = vpop.permute.xlu0 %1365  ;;  %v1375_v38 = vmul.f32 %v4609_v12, %v1364_v34 }
 0xc3c   :  { %v1376_v35 = vmul.f32 %v4611_v15, %v1366_v33 }
 0xc3e   :  { %v1370_v39 = vpop.permute.xlu1 %1369 }
 0xc3f   :  { %v1368_v37 = vpop.permute.xlu0 %1367  ;;  %v1378_v53 = vmul.f32 %v4613_v23, %v1370_v39 }
 0xc40   :  { %v1377_v44 = vmul.f32 %v4615_v25, %v1368_v37 }
 0xca7   :  { %v1404_v40 = vpop.permute.xlu0 %1403 }
 0xca8   :  { %v1415_v32 = vadd.f32 %v1404_v40, %v1375_v38  ;;  %v1406_v41 = vpop.permute.xlu1 %1405 }
 0xca9   :  { %v1416_v43 = vadd.f32 %v1406_v41, %v1376_v35 }
 0xcaa   :  { %4616 = vtanh.f32 %v1415_v32  ;;  %v1467_v55 = vrot.slane %v1415_v32, 2 }
 0xcab   :  { %4618 = vtanh.f32 %v1416_v43  ;;  %v1468_v54 = vrot.slane %v1416_v43, 1 }
 0xcac   :  { %v1410_v46 = vpop.permute.xlu1 %1409  ;;  %v1408_v47 = vpop.permute.xlu0 %1407 }
 0xcad   :  { %v1418_v48 = vadd.f32 %v1410_v46, %v1378_v53  ;;  %v1417_v49 = vadd.f32 %v1408_v47, %v1377_v44  ;;  %v1469_v60 = vsel %vm989_vm8, %v1468_v54, %v1467_v55 }
 0xcaf   :  { %4620 = vtanh.f32 %v1418_v48  ;;  %v1471_v9 = vrot.slane %v1418_v48, 7  ;;  %v1470_v61 = vsel %vm992_vm9, %v1417_v49, %v1469_v60 }
 0xcb0   :  { %4622 = vtanh.f32 %v1417_v49 }
 0xcb1   :  { %v1472_v0 = vsel %vm995_vm10, %v1471_v9, %v1470_v61 }
 0xcb4   :  { %v4617_v50 = vpop.eup %4616 }
 0xcb5   :  { %1427 = vrot.lane.b32.xlu1 %v4617_v50, %s5002_s7  ;;  %v4619_v52 = vpop.eup %4618 }
 0xcb6   :  { %1429 = vrot.lane.b32.xlu0 %v4619_v52, %s5002_s7 }
 0xcb9   :  { %v4621_v57 = vpop.eup %4620 }
 0xcba   :  { %v4623_v58 = vpop.eup %4622  ;;  %1433 = vrot.lane.b32.xlu1 %v4621_v57, %s5002_s7 }
 0xcbb   :  { %1431 = vrot.lane.b32.xlu0 %v4623_v58, %s5002_s7 }
 0xcbe   :  { %1446 = vperm.xlu1 %4503, %v1444_v59  }
 0xcc2   :  { %1473 = vrot.lane.b32.xlu1 %v1472_v0, %s5004_s24 }
 0xd27   :  { %v1428_v1 = vpop.permute.xlu1 %1427 }
 0xd28   :  { %v1439_v2 = vmul.f32 %v4609_v12, %v1428_v1  ;;  %v1430_v4 = vpop.permute.xlu0 %1429 }
 0xd29   :  { %v1440_v5 = vmul.f32 %v4611_v15, %v1430_v4 }
 0xd2a   :  { %v1453_v6 = vrot.slane %v1439_v2, 2 }
 0xd2b   :  { %v1454_v10 = vrot.slane %v1440_v5, 1 }
 0xd2c   :  { %v1434_v16 = vpop.permute.xlu1 %1433 }
 0xd2d   :  { %v1432_v11 = vpop.permute.xlu0 %1431  ;;  %v1442_v26 = vmul.f32 %v4613_v23, %v1434_v16  ;;  %v1455_v28 = vsel %vm989_vm8, %v1454_v10, %v1453_v6 }
 0xd2e   :  { %v1441_v29 = vmul.f32 %v4615_v25, %v1432_v11 }
 0xd2f   :  { %v1457_v17 = vrot.slane %v1442_v26, 7 }
 0xd30   :  { %v1456_v20 = vsel %vm992_vm9, %v1441_v29, %v1455_v28 }
 0xd31   :  { %v1458_v22 = vsel %vm995_vm10, %v1457_v17, %v1456_v20 }
 0xd32   :  { %1459 = vrot.lane.b32.xlu0 %v1458_v22, %s5003_s15 }
 0xd3d   :  { %v1447_v24 = vpop.permute.xlu1 %1446 }
 0xd3e   :  { %vm1448_vm15 = vcmp.eq.s32.totalorder %v1447_v24, 1 }
 0xd41   :  { %v1474_v40 = vpop.permute.xlu1 %1473 }
 0xd42   :  { %v5463_v41 = vsel %vm1448_vm15, %v1474_v40, %v5413_v56 }
 0xd43   :  { %v1591_v44 = vrot.slane %v5463_v41, 5  ;;  %v1592_v53 = vrot.slane %v5463_v41, 6  ;;  %v1593_v46 = vrot.slane %v5463_v41, 7 }
 0xda4   :  { %v1460_v12 = vpop.permute.xlu0 %1459 }
 0xda5   :  { %v5446_v15 = vsel %vm1448_vm15, %v1460_v12, %v5396_v36  ;;  %vm2633_vm15 = vcmask 257024  }
 0xda6   :  { %4227 = vmatmul.mubr.msk.f32.vlgmr.msra.gmra.mrb[14].mxu0 %vm136_vm0, %v5446_v15 }
 0xda7   :  { %4436 = vmatpush3.bf16.msra.mxu0 %v5253_v51  ;;  %4248 = vmatprep.mubr.msk.f32.mxu0 %vm5000_vm6, %v5001_v63 }
 0xda8   :  { %4437 = vmatprep.subr.bf16.mxu0 %v4999_v45 }
 0xdab   :  { %4439 = vmatpush3.bf16.msra.mxu0 %v5264_v62 }
 0xdac   :  { %4446 = vmatprep.subr.bf16.mxu0 %v4999_v45 }
 0xe79   :  { %v1546_v23 = vpop.f32.mrb[14].mxu0 }
 0xe7a   :  { %v1551_v25 = vrot.slane %v1546_v23, 5  ;;  %v4228_v27 = vpop.f32.mrb[15].mxu0  ;;  %v1552_v30 = vrot.slane %v1546_v23, 6  ;;  %v1553_v36 = vrot.slane %v1546_v23, 7  ;;  %v1561_v38 = vadd.f32 %v1546_v23, %v5313_v3 }
 0xe7c   :  { %v1558_v33 = vadd.f32 %v1551_v25, %v5309_v21  ;;  %v1559_v34 = vadd.f32 %v1552_v30, %v5307_v19  ;;  %v1560_v37 = vadd.f32 %v1553_v36, %v5315_v31  ;;  %v3968_v49 = vmul.f32 -1.442695, %v1561_v38 }
 0xe7e   :  { %4624 = vtanh.f32 %v1558_v33  ;;  %v3965_v56 = vmul.f32 -1.442695, %v1558_v33  ;;  %v3966_v47 = vmul.f32 -1.442695, %v1559_v34  ;;  %v3967_v48 = vmul.f32 -1.442695, %v1560_v37 }
 0xe7f   :  { %4626 = vtanh.f32 %v1559_v34 }
 0xe80   :  { %4628 = vtanh.f32 %v1560_v37 }
 0xe81   :  { %4630 = vtanh.f32 %v1561_v38 }
 0xe82   :  { %4632 = vpow2.f32 %v3965_v56 }
 0xe83   :  { %4634 = vpow2.f32 %v3966_v47 }
 0xe84   :  { %4636 = vpow2.f32 %v3967_v48 }
 0xe85   :  { %4638 = vpow2.f32 %v3968_v49 }
 0xe88   :  { %v4625_v39 = vpop.eup %4624 }
 0xe89   :  { %1614 = vrot.lane.b32.xlu0 %v4625_v39, %s5002_s7  ;;  %v4627_v32 = vpop.eup %4626 }
 0xe8a   :  { %v4629_v35 = vpop.eup %4628  ;;  %1616 = vrot.lane.b32.xlu1 %v4627_v32, %s5002_s7 }
 0xe8b   :  { %v4631_v43 = vpop.eup %4630 }
 0xe8c   :  { %v4633_v50 = vpop.eup %4632 }
 0xe8d   :  { %1618 = vrot.lane.b32.xlu0 %v4629_v35, %s5002_s7  ;;  %v1574_v52 = vadd.f32 1.0, %v4633_v50  ;;  %v4635_v54 = vpop.eup %4634 }
 0xe8e   :  { %1620 = vrot.lane.b32.xlu1 %v4631_v43, %s5002_s7  ;;  %v4637_v55 = vpop.eup %4636  ;;  %v1575_v57 = vadd.f32 1.0, %v4635_v54 }
 0xe8f   :  { %4640 = vrcp.f32 %v1574_v52  ;;  %v1576_v58 = vadd.f32 1.0, %v4637_v55  ;;  %v4639_v59 = vpop.eup %4638 }
 0xe90   :  { %4642 = vrcp.f32 %v1575_v57  ;;  %v1577_v60 = vadd.f32 1.0, %v4639_v59 }
 0xe91   :  { %1594 = vrot.lane.b32.xlu0 %v1591_v44, %s5003_s15  ;;  %4644 = vrcp.f32 %v1576_v58 }
 0xe92   :  { %1596 = vrot.lane.b32.xlu1 %v1592_v53, %s5003_s15  ;;  %4646 = vrcp.f32 %v1577_v60  ;;  %v1675_v53 = vsel %vm1674_vm1, 1, %v4997_v42 }
 0xe95   :  { %1598 = vrot.lane.b32.xlu0 %v1593_v46, %s5003_s15 }
 0xe99   :  { %v4641_v9 = vpop.eup %4640 }
 0xe9a   :  { %v4643_v1 = vpop.eup %4642 }
 0xe9b   :  { %v4645_v4 = vpop.eup %4644 }
 0xe9c   :  { %v4647_v11 = vpop.eup %4646 }
 0xefb   :  { %v1615_v61 = vpop.permute.xlu0 %1614 }
 0xefc   :  { %v1626_v0 = vmul.f32 %v4641_v9, %v1615_v61  ;;  %v1617_v2 = vpop.permute.xlu1 %1616 }
 0xefd   :  { %v1627_v5 = vmul.f32 %v4643_v1, %v1617_v2 }
 0xefe   :  { %1634 = vrot.lane.b32.xlu1 %v1626_v0, %s5003_s15 }
 0xeff   :  { %v1619_v6 = vpop.permute.xlu0 %1618  ;;  %1636 = vrot.lane.b32.xlu0 %v1627_v5, %s5003_s15 }
 0xf00   :  { %v1628_v10 = vmul.f32 %v4645_v4, %v1619_v6  ;;  %v1621_v16 = vpop.permute.xlu1 %1620 }
 0xf01   :  { %v1629_v26 = vmul.f32 %v4647_v11, %v1621_v16 }
 0xf02   :  { %1638 = vrot.lane.b32.xlu1 %v1628_v10, %s5003_s15 }
 0xf03   :  { %1600 = vrot.lane.b32.xlu0 %v5463_v41, %s5003_s15  ;;  %v1595_v28 = vpop.permute.xlu0 %1594 }
 0xf04   :  { %v1597_v29 = vpop.permute.xlu1 %1596  ;;  %v1606_v17 = vmul.f32 %v4641_v9, %v1595_v28 }
 0xf05   :  { %v1607_v12 = vmul.f32 %v4643_v1, %v1597_v29 }
 0xf06   :  { %1640 = vrot.lane.b32.xlu1 %v1629_v26, %s5003_s15 }
 0xf07   :  { %v1599_v20 = vpop.permute.xlu0 %1598 }
 0xf08   :  { %v1608_v23 = vmul.f32 %v4645_v4, %v1599_v20 }
 0xf70   :  { %v1635_v22 = vpop.permute.xlu1 %1634 }
 0xf71   :  { %v1646_v24 = vadd.f32 %v1635_v22, %v1606_v17  ;;  %v1637_v25 = vpop.permute.xlu0 %1636 }
 0xf72   :  { %v1647_v27 = vadd.f32 %v1637_v25, %v1607_v12 }
 0xf73   :  { %4648 = vtanh.f32 %v1646_v24  ;;  %v1698_v43 = vrot.slane %v1646_v24, 3 }
 0xf74   :  { %v1639_v30 = vpop.permute.xlu1 %1638  ;;  %4650 = vtanh.f32 %v1647_v27  ;;  %v1699_v35 = vrot.slane %v1647_v27, 2 }
 0xf75   :  { %v1648_v36 = vadd.f32 %v1639_v30, %v1608_v23  ;;  %v1601_v33 = vpop.permute.xlu0 %1600 }
 0xf76   :  { %v1609_v34 = vmul.f32 %v4647_v11, %v1601_v33  ;;  %v1700_v46 = vsel %vm989_vm8, %v1699_v35, %v1698_v43 }
 0xf77   :  { %4652 = vtanh.f32 %v1648_v36  ;;  %v1701_v44 = vrot.slane %v1648_v36, 1 }
 0xf78   :  { %v1641_v37 = vpop.permute.xlu1 %1640 }
 0xf79   :  { %v1649_v38 = vadd.f32 %v1641_v37, %v1609_v34  ;;  %v1702_v47 = vsel %vm992_vm9, %v1701_v44, %v1700_v46 }
 0xf7b   :  { %4654 = vtanh.f32 %v1649_v38  ;;  %v1703_v18 = vsel %vm995_vm10, %v1649_v38, %v1702_v47 }
 0xf7d   :  { %v4649_v39 = vpop.eup %4648 }
 0xf7e   :  { %1658 = vrot.lane.b32.xlu0 %v4649_v39, %s5002_s7  ;;  %v4651_v40 = vpop.eup %4650 }
 0xf7f   :  { %1660 = vrot.lane.b32.xlu1 %v4651_v40, %s5002_s7 }
 0xf81   :  { %v4653_v32 = vpop.eup %4652 }
 0xf82   :  { %1662 = vrot.lane.b32.xlu0 %v4653_v32, %s5002_s7 }
 0xf85   :  { %v4655_v56 = vpop.eup %4654 }
 0xf86   :  { %1677 = vperm.xlu0 %4502, %v1675_v53   ;;  %1664 = vrot.lane.b32.xlu1 %v4655_v56, %s5002_s7 }
 0xf8a   :  { %1704 = vrot.lane.b32.xlu0 %v1703_v18, %s5004_s24 }
 0xff0   :  { %v1659_v48 = vpop.permute.xlu0 %1658 }
 0xff1   :  { %v1670_v49 = vmul.f32 %v4641_v9, %v1659_v48  ;;  %v1661_v50 = vpop.permute.xlu1 %1660 }
 0xff2   :  { %v1671_v54 = vmul.f32 %v4643_v1, %v1661_v50 }
 0xff3   :  { %v1684_v52 = vrot.slane %v1670_v49, 3 }
 0xff4   :  { %v1663_v55 = vpop.permute.xlu0 %1662  ;;  %v1685_v58 = vrot.slane %v1671_v54, 2 }
 0xff5   :  { %v1672_v57 = vmul.f32 %v4645_v4, %v1663_v55 }
 0xff6   :  { %v1686_v60 = vsel %vm989_vm8, %v1685_v58, %v1684_v52 }
 0xff7   :  { %v1687_v59 = vrot.slane %v1672_v57, 1 }
 0xff8   :  { %v1665_v0 = vpop.permute.xlu1 %1664 }
 0xff9   :  { %v1688_v61 = vsel %vm992_vm9, %v1687_v59, %v1686_v60  ;;  %v1673_v2 = vmul.f32 %v4647_v11, %v1665_v0 }
 0xffb   :  { %v1689_v5 = vsel %vm995_vm10, %v1673_v2, %v1688_v61 }
 0xffc   :  { %1690 = vrot.lane.b32.xlu1 %v1689_v5, %s5003_s15 }
0x1005   :  { %v1678_v6 = vpop.permute.xlu0 %1677 }
0x1006   :  { %vm1679_vm2 = vcmp.eq.s32.totalorder %v1678_v6, 1 }
0x1009   :  { %v1705_v12 = vpop.permute.xlu0 %1704 }
0x100a   :  { %v5514_v25 = vsel %vm1679_vm2, %v1705_v12, %v5463_v41  ;;  %v5535_v12 = vld [vmem:[%s5868_s1] sm:$0xf] }
0x100b   :  { %v1823_v30 = vrot.slane %v5514_v25, 4  ;;  %v1824_v36 = vrot.slane %v5514_v25, 5  ;;  %v1825_v33 = vrot.slane %v5514_v25, 6  ;;  %v1826_v34 = vrot.slane %v5514_v25, 7 }
0x100c   :  { %vm1907_vm4 = vcmp.gt.s32.totalorder %v5535_v12, 4  ;;  %vm2142_vm7 = vcmp.gt.s32.totalorder %v5535_v12, 5  ;;  %vm2377_vm12 = vcmp.gt.s32.totalorder %v5535_v12, 6  ;;  %vm2612_vm14 = vcmp.gt.s32.totalorder %v5535_v12, 7 }
0x106e   :  { %v1691_v9 = vpop.permute.xlu1 %1690 }
0x106f   :  { %v5496_v1 = vsel %vm1679_vm2, %v1691_v9, %v5446_v15 }
0x1070   :  { %4238 = vmatmul.mubr.msk.f32.vlgmr.msra.gmra.mrb[12].mxu1 %vm136_vm0, %v5496_v1 }
0x1071   :  { %4442 = vmatpush3.bf16.msra.mxu1 %v5253_v51  ;;  %4259 = vmatprep.mubr.msk.f32.mxu1 %vm5000_vm6, %v5001_v63 }
0x1072   :  { %4443 = vmatprep.subr.bf16.mxu1 %v4999_v45 }
0x1075   :  { %4445 = vmatpush3.bf16.msra.mxu1 %v5264_v62 }
0x1076   :  { %4452 = vmatprep.subr.bf16.mxu1 %v4999_v45 }
0x1143   :  { %v1777_v4 = vpop.f32.mrb[12].mxu1 }
0x1144   :  { %v1782_v10 = vrot.slane %v1777_v4, 4  ;;  %v1783_v16 = vrot.slane %v1777_v4, 5  ;;  %v4239_v11 = vpop.f32.mrb[13].mxu1  ;;  %v1784_v15 = vrot.slane %v1777_v4, 6  ;;  %v1785_v29 = vrot.slane %v1777_v4, 7 }
0x1146   :  { %v1790_v26 = vadd.f32 %v1782_v10, %v5309_v21  ;;  %v1791_v28 = vadd.f32 %v1783_v16, %v5307_v19  ;;  %v1792_v17 = vadd.f32 %v1784_v15, %v5315_v31  ;;  %v1793_v20 = vadd.f32 %v1785_v29, %v5313_v3 }
0x1148   :  { %4656 = vtanh.f32 %v1790_v26  ;;  %v3970_v41 = vmul.f32 -1.442695, %v1790_v26  ;;  %v3971_v37 = vmul.f32 -1.442695, %v1791_v28  ;;  %v3972_v38 = vmul.f32 -1.442695, %v1792_v17 }
0x1149   :  { %4658 = vtanh.f32 %v1791_v28  ;;  %v3973_v39 = vmul.f32 -1.442695, %v1793_v20 }
0x114a   :  { %4660 = vtanh.f32 %v1792_v17 }
0x114b   :  { %4662 = vtanh.f32 %v1793_v20 }
0x114c   :  { %4664 = vpow2.f32 %v3970_v41 }
0x114d   :  { %4666 = vpow2.f32 %v3971_v37 }
0x114e   :  { %4668 = vpow2.f32 %v3972_v38 }
0x114f   :  { %4670 = vpow2.f32 %v3973_v39 }
0x1152   :  { %v4657_v22 = vpop.eup %4656 }
0x1153   :  { %v4659_v24 = vpop.eup %4658  ;;  %1847 = vrot.lane.b32.xlu1 %v4657_v22, %s5002_s7 }
0x1154   :  { %1849 = vrot.lane.b32.xlu0 %v4659_v24, %s5002_s7  ;;  %v4661_v23 = vpop.eup %4660 }
0x1155   :  { %v4663_v27 = vpop.eup %4662 }
0x1156   :  { %v4665_v40 = vpop.eup %4664 }
0x1157   :  { %1851 = vrot.lane.b32.xlu1 %v4661_v23, %s5002_s7  ;;  %v4667_v32 = vpop.eup %4666  ;;  %v1806_v35 = vadd.f32 1.0, %v4665_v40 }
0x1158   :  { %1853 = vrot.lane.b32.xlu0 %v4663_v27, %s5002_s7  ;;  %v1807_v43 = vadd.f32 1.0, %v4667_v32  ;;  %v4669_v44 = vpop.eup %4668 }
0x1159   :  { %v4671_v53 = vpop.eup %4670  ;;  %4672 = vrcp.f32 %v1806_v35  ;;  %v1808_v46 = vadd.f32 1.0, %v4669_v44 }
0x115a   :  { %4674 = vrcp.f32 %v1807_v43  ;;  %v1809_v56 = vadd.f32 1.0, %v4671_v53 }
0x115b   :  { %1827 = vrot.lane.b32.xlu1 %v1823_v30, %s5003_s15  ;;  %4676 = vrcp.f32 %v1808_v46 }
0x115c   :  { %1829 = vrot.lane.b32.xlu0 %v1824_v36, %s5003_s15  ;;  %4678 = vrcp.f32 %v1809_v56 }
0x115f   :  { %1831 = vrot.lane.b32.xlu1 %v1825_v33, %s5003_s15 }
0x1160   :  { %1833 = vrot.lane.b32.xlu0 %v1826_v34, %s5003_s15  ;;  %v1908_v34 = vsel %vm1907_vm4, 1, %v4997_v42 }
0x1163   :  { %v4673_v47 = vpop.eup %4672 }
0x1164   :  { %v4675_v48 = vpop.eup %4674 }
0x1165   :  { %v4677_v54 = vpop.eup %4676 }
0x1166   :  { %v4679_v57 = vpop.eup %4678 }
0x11c5   :  { %v1848_v18 = vpop.permute.xlu1 %1847 }
0x11c6   :  { %v1850_v49 = vpop.permute.xlu0 %1849  ;;  %v1859_v50 = vmul.f32 %v4673_v47, %v1848_v18 }
0x11c7   :  { %v1860_v52 = vmul.f32 %v4675_v48, %v1850_v49 }
0x11c8   :  { %1867 = vrot.lane.b32.xlu1 %v1859_v50, %s5003_s15 }
0x11c9   :  { %1869 = vrot.lane.b32.xlu0 %v1860_v52, %s5003_s15  ;;  %v1852_v55 = vpop.permute.xlu1 %1851 }
0x11ca   :  { %v1854_v58 = vpop.permute.xlu0 %1853  ;;  %v1861_v59 = vmul.f32 %v4677_v54, %v1852_v55 }
0x11cb   :  { %v1862_v60 = vmul.f32 %v4679_v57, %v1854_v58 }
0x11cc   :  { %1871 = vrot.lane.b32.xlu1 %v1861_v59, %s5003_s15 }
0x11cd   :  { %1873 = vrot.lane.b32.xlu0 %v1862_v60, %s5003_s15  ;;  %v1828_v61 = vpop.permute.xlu1 %1827 }
0x11ce   :  { %v1830_v0 = vpop.permute.xlu0 %1829  ;;  %v1839_v6 = vmul.f32 %v4673_v47, %v1828_v61 }
0x11cf   :  { %v1840_v9 = vmul.f32 %v4675_v48, %v1830_v0 }
0x11d1   :  { %v1832_v2 = vpop.permute.xlu1 %1831 }
0x11d2   :  { %v1834_v5 = vpop.permute.xlu0 %1833  ;;  %v1841_v15 = vmul.f32 %v4677_v54, %v1832_v2 }
0x11d3   :  { %v1842_v26 = vmul.f32 %v4679_v57, %v1834_v5 }
0x123a   :  { %v1868_v4 = vpop.permute.xlu1 %1867 }
0x123b   :  { %v1870_v10 = vpop.permute.xlu0 %1869  ;;  %v1879_v16 = vadd.f32 %v1868_v4, %v1839_v6 }
0x123c   :  { %v1880_v11 = vadd.f32 %v1870_v10, %v1840_v9 }
0x123d   :  { %4680 = vtanh.f32 %v1879_v16  ;;  %v1932_v30 = vrot.slane %v1879_v16, 4 }
0x123e   :  { %4682 = vtanh.f32 %v1880_v11  ;;  %v1872_v28 = vpop.permute.xlu1 %1871  ;;  %v1933_v27 = vrot.slane %v1880_v11, 3 }
0x123f   :  { %v1874_v29 = vpop.permute.xlu0 %1873  ;;  %v1881_v17 = vadd.f32 %v1872_v28, %v1841_v15 }
0x1240   :  { %v1882_v20 = vadd.f32 %v1874_v29, %v1842_v26  ;;  %v1934_v41 = vsel %vm989_vm8, %v1933_v27, %v1932_v30 }
0x1241   :  { %4684 = vtanh.f32 %v1881_v17  ;;  %v1935_v33 = vrot.slane %v1881_v17, 2 }
0x1242   :  { %4686 = vtanh.f32 %v1882_v20  ;;  %v1937_v37 = vrot.slane %v1882_v20, 1 }
0x1243   :  { %v1936_v38 = vsel %vm992_vm9, %v1935_v33, %v1934_v41 }
0x1244   :  { %v1938_v39 = vsel %vm995_vm10, %v1937_v37, %v1936_v38 }
0x1247   :  { %v4681_v22 = vpop.eup %4680 }
0x1248   :  { %v4683_v24 = vpop.eup %4682  ;;  %1891 = vrot.lane.b32.xlu1 %v4681_v22, %s5002_s7 }
0x1249   :  { %1893 = vrot.lane.b32.xlu0 %v4683_v24, %s5002_s7 }
0x124b   :  { %v4685_v23 = vpop.eup %4684 }
0x124c   :  { %v4687_v36 = vpop.eup %4686  ;;  %1895 = vrot.lane.b32.xlu1 %v4685_v23, %s5002_s7 }
0x124d   :  { %1897 = vrot.lane.b32.xlu0 %v4687_v36, %s5002_s7 }
0x1250   :  { %1910 = vperm.xlu1 %4503, %v1908_v34  }
0x1254   :  { %1939 = vrot.lane.b32.xlu1 %v1938_v39, %s5004_s24 }
0x12ba   :  { %v1892_v40 = vpop.permute.xlu1 %1891 }
0x12bb   :  { %v1894_v32 = vpop.permute.xlu0 %1893  ;;  %v1903_v43 = vmul.f32 %v4673_v47, %v1892_v40 }
0x12bc   :  { %v1904_v35 = vmul.f32 %v4675_v48, %v1894_v32 }
0x12bd   :  { %v1917_v53 = vrot.slane %v1903_v43, 4 }
0x12be   :  { %v1918_v44 = vrot.slane %v1904_v35, 3  ;;  %v1896_v46 = vpop.permute.xlu1 %1895 }
0x12bf   :  { %v1898_v56 = vpop.permute.xlu0 %1897  ;;  %v1905_v18 = vmul.f32 %v4677_v54, %v1896_v46 }
0x12c0   :  { %v1906_v49 = vmul.f32 %v4679_v57, %v1898_v56  ;;  %v1919_v52 = vsel %vm989_vm8, %v1918_v44, %v1917_v53 }
0x12c1   :  { %v1920_v50 = vrot.slane %v1905_v18, 2 }
0x12c2   :  { %v1922_v55 = vrot.slane %v1906_v49, 1 }
0x12c3   :  { %v1921_v58 = vsel %vm992_vm9, %v1920_v50, %v1919_v52 }
0x12c4   :  { %v1923_v59 = vsel %vm995_vm10, %v1922_v55, %v1921_v58 }
0x12c5   :  { %1924 = vrot.lane.b32.xlu0 %v1923_v59, %s5003_s15 }
0x12cf   :  { %v1911_v60 = vpop.permute.xlu1 %1910 }
0x12d0   :  { %vm1912_vm5 = vcmp.eq.s32.totalorder %v1911_v60, 1 }
0x12d3   :  { %v1940_v10 = vpop.permute.xlu1 %1939 }
0x12d4   :  { %v5569_v11 = vsel %vm1912_vm5, %v1940_v10, %v5514_v25 }
0x12d5   :  { %v2058_v26 = vrot.slane %v5569_v11, 3  ;;  %v2059_v28 = vrot.slane %v5569_v11, 4  ;;  %v2060_v29 = vrot.slane %v5569_v11, 5  ;;  %v2061_v17 = vrot.slane %v5569_v11, 6 }
0x1337   :  { %v1925_v48 = vpop.permute.xlu0 %1924 }
0x1338   :  { %v5551_v47 = vsel %vm1912_vm5, %v1925_v48, %v5496_v1  ;;  %vm3594_vm5 = vcmask 64512  }
0x1339   :  { %4249 = vmatmul.mubr.msk.f32.vlgmr.msra.gmra.mrb[16].mxu0 %vm136_vm0, %v5551_v47 }
0x133a   :  { %4448 = vmatpush3.bf16.msra.mxu0 %v5253_v51  ;;  %4270 = vmatprep.mubr.msk.f32.mxu0 %vm5000_vm6, %v5001_v63 }
0x133b   :  { %4449 = vmatprep.subr.bf16.mxu0 %v4999_v45 }
0x133e   :  { %4451 = vmatpush3.bf16.msra.mxu0 %v5264_v62 }
0x133f   :  { %4458 = vmatprep.subr.bf16.mxu0 %v4999_v45 }
0x140c   :  { %v2012_v54 = vpop.f32.mrb[16].mxu0 }
0x140d   :  { %v2017_v57 = vrot.slane %v2012_v54, 3  ;;  %v2018_v61 = vrot.slane %v2012_v54, 4  ;;  %v4250_v0 = vpop.f32.mrb[17].mxu0  ;;  %v2019_v1 = vrot.slane %v2012_v54, 5  ;;  %v2020_v6 = vrot.slane %v2012_v54, 6 }
0x140f   :  { %v2025_v2 = vadd.f32 %v2017_v57, %v5309_v21  ;;  %v2026_v5 = vadd.f32 %v2018_v61, %v5307_v19  ;;  %v2027_v51 = vadd.f32 %v2019_v1, %v5315_v31  ;;  %v2028_v9 = vadd.f32 %v2020_v6, %v5313_v3 }
0x1411   :  { %4688 = vtanh.f32 %v2025_v2  ;;  %v3975_v25 = vmul.f32 -1.442695, %v2025_v2  ;;  %v3976_v20 = vmul.f32 -1.442695, %v2026_v5  ;;  %v3977_v22 = vmul.f32 -1.442695, %v2027_v51 }
0x1412   :  { %4690 = vtanh.f32 %v2026_v5  ;;  %v3978_v24 = vmul.f32 -1.442695, %v2028_v9 }
0x1413   :  { %4692 = vtanh.f32 %v2027_v51 }
0x1414   :  { %4694 = vtanh.f32 %v2028_v9 }
0x1415   :  { %4696 = vpow2.f32 %v3975_v25 }
0x1416   :  { %4698 = vpow2.f32 %v3976_v20 }
0x1417   :  { %4700 = vpow2.f32 %v3977_v22 }
0x1418   :  { %4702 = vpow2.f32 %v3978_v24 }
0x141b   :  { %v4689_v62 = vpop.eup %4688 }
0x141c   :  { %v4691_v4 = vpop.eup %4690  ;;  %2082 = vrot.lane.b32.xlu0 %v4689_v62, %s5002_s7 }
0x141d   :  { %2084 = vrot.lane.b32.xlu1 %v4691_v4, %s5002_s7  ;;  %v4693_v16 = vpop.eup %4692 }
0x141e   :  { %v4695_v15 = vpop.eup %4694 }
0x141f   :  { %v4697_v23 = vpop.eup %4696 }
0x1420   :  { %2086 = vrot.lane.b32.xlu0 %v4693_v16, %s5002_s7  ;;  %v4699_v27 = vpop.eup %4698  ;;  %v2041_v30 = vadd.f32 1.0, %v4697_v23 }
0x1421   :  { %2088 = vrot.lane.b32.xlu1 %v4695_v15, %s5002_s7  ;;  %v2042_v36 = vadd.f32 1.0, %v4699_v27  ;;  %v4701_v33 = vpop.eup %4700 }
0x1422   :  { %v4703_v34 = vpop.eup %4702  ;;  %4704 = vrcp.f32 %v2041_v30  ;;  %v2043_v41 = vadd.f32 1.0, %v4701_v33 }
0x1423   :  { %4706 = vrcp.f32 %v2042_v36  ;;  %v2044_v37 = vadd.f32 1.0, %v4703_v34 }
0x1424   :  { %2062 = vrot.lane.b32.xlu0 %v2058_v26, %s5003_s15  ;;  %4708 = vrcp.f32 %v2043_v41 }
0x1425   :  { %2064 = vrot.lane.b32.xlu1 %v2059_v28, %s5003_s15  ;;  %4710 = vrcp.f32 %v2044_v37  ;;  %v2143_v28 = vsel %vm2142_vm7, 1, %v4997_v42 }
0x1428   :  { %2066 = vrot.lane.b32.xlu0 %v2060_v29, %s5003_s15 }
0x1429   :  { %2068 = vrot.lane.b32.xlu1 %v2061_v17, %s5003_s15 }
0x142c   :  { %v4705_v38 = vpop.eup %4704 }
0x142d   :  { %v4707_v40 = vpop.eup %4706 }
0x142e   :  { %v4709_v44 = vpop.eup %4708 }
0x142f   :  { %v4711_v46 = vpop.eup %4710 }
0x148e   :  { %v2083_v39 = vpop.permute.xlu0 %2082 }
0x148f   :  { %v2094_v32 = vmul.f32 %v4705_v38, %v2083_v39  ;;  %v2085_v35 = vpop.permute.xlu1 %2084 }
0x1490   :  { %v2095_v43 = vmul.f32 %v4707_v40, %v2085_v35 }
0x1491   :  { %2102 = vrot.lane.b32.xlu0 %v2094_v32, %s5003_s15 }
0x1492   :  { %2104 = vrot.lane.b32.xlu1 %v2095_v43, %s5003_s15  ;;  %v2087_v53 = vpop.permute.xlu0 %2086 }
0x1493   :  { %v2096_v56 = vmul.f32 %v4709_v44, %v2087_v53  ;;  %v2089_v18 = vpop.permute.xlu1 %2088 }
0x1494   :  { %v2097_v49 = vmul.f32 %v4711_v46, %v2089_v18 }
0x1495   :  { %2106 = vrot.lane.b32.xlu0 %v2096_v56, %s5003_s15 }
0x1496   :  { %2108 = vrot.lane.b32.xlu1 %v2097_v49, %s5003_s15  ;;  %v2063_v50 = vpop.permute.xlu0 %2062 }
0x1497   :  { %v2065_v52 = vpop.permute.xlu1 %2064  ;;  %v2074_v59 = vmul.f32 %v4705_v38, %v2063_v50 }
0x1498   :  { %v2075_v60 = vmul.f32 %v4707_v40, %v2065_v52 }
0x149a   :  { %v2067_v55 = vpop.permute.xlu0 %2066 }
0x149b   :  { %v2069_v58 = vpop.permute.xlu1 %2068  ;;  %v2076_v0 = vmul.f32 %v4709_v44, %v2067_v55 }
0x149c   :  { %v2077_v1 = vmul.f32 %v4711_v46, %v2069_v58 }
0x1503   :  { %v2103_v48 = vpop.permute.xlu0 %2102 }
0x1504   :  { %v2114_v54 = vadd.f32 %v2103_v48, %v2074_v59  ;;  %v2105_v57 = vpop.permute.xlu1 %2104 }
0x1505   :  { %v2115_v61 = vadd.f32 %v2105_v57, %v2075_v60 }
0x1506   :  { %4712 = vtanh.f32 %v2114_v54  ;;  %v2167_v10 = vrot.slane %v2114_v54, 5 }
0x1507   :  { %4714 = vtanh.f32 %v2115_v61  ;;  %v2107_v2 = vpop.permute.xlu0 %2106  ;;  %v2168_v16 = vrot.slane %v2115_v61, 4 }
0x1508   :  { %v2116_v5 = vadd.f32 %v2107_v2, %v2076_v0  ;;  %v2109_v6 = vpop.permute.xlu1 %2108 }
0x1509   :  { %v2117_v51 = vadd.f32 %v2109_v6, %v2077_v1  ;;  %v2169_v29 = vsel %vm989_vm8, %v2168_v16, %v2167_v10 }
0x150a   :  { %4716 = vtanh.f32 %v2116_v5  ;;  %v2170_v26 = vrot.slane %v2116_v5, 3 }
0x150b   :  { %4718 = vtanh.f32 %v2117_v51  ;;  %v2172_v17 = vrot.slane %v2117_v51, 2 }
0x150c   :  { %v2171_v25 = vsel %vm992_vm9, %v2170_v26, %v2169_v29 }
0x150d   :  { %v2173_v20 = vsel %vm995_vm10, %v2172_v17, %v2171_v25 }
0x1510   :  { %v4713_v9 = vpop.eup %4712 }
0x1511   :  { %v4715_v62 = vpop.eup %4714  ;;  %2126 = vrot.lane.b32.xlu0 %v4713_v9, %s5002_s7 }
0x1512   :  { %2128 = vrot.lane.b32.xlu1 %v4715_v62, %s5002_s7 }
0x1514   :  { %v4717_v4 = vpop.eup %4716 }
0x1515   :  { %v4719_v15 = vpop.eup %4718  ;;  %2130 = vrot.lane.b32.xlu0 %v4717_v4, %s5002_s7 }
0x1516   :  { %2132 = vrot.lane.b32.xlu1 %v4719_v15, %s5002_s7 }
0x1519   :  { %2145 = vperm.xlu0 %4502, %v2143_v28  }
0x151d   :  { %2174 = vrot.lane.b32.xlu0 %v2173_v20, %s5004_s24 }
0x1583   :  { %v2127_v22 = vpop.permute.xlu0 %2126 }
0x1584   :  { %v2129_v24 = vpop.permute.xlu1 %2128  ;;  %v2138_v23 = vmul.f32 %v4705_v38, %v2127_v22 }
0x1585   :  { %v2139_v27 = vmul.f32 %v4707_v40, %v2129_v24 }
0x1586   :  { %v2152_v30 = vrot.slane %v2138_v23, 5 }
0x1587   :  { %v2153_v36 = vrot.slane %v2139_v27, 4  ;;  %v2131_v33 = vpop.permute.xlu0 %2130 }
0x1588   :  { %v2140_v34 = vmul.f32 %v4709_v44, %v2131_v33  ;;  %v2133_v41 = vpop.permute.xlu1 %2132 }
0x1589   :  { %v2141_v37 = vmul.f32 %v4711_v46, %v2133_v41  ;;  %v2154_v32 = vsel %vm989_vm8, %v2153_v36, %v2152_v30 }
0x158a   :  { %v2155_v39 = vrot.slane %v2140_v34, 3 }
0x158b   :  { %v2157_v35 = vrot.slane %v2141_v37, 2 }
0x158c   :  { %v2156_v43 = vsel %vm992_vm9, %v2155_v39, %v2154_v32 }
0x158d   :  { %v2158_v53 = vsel %vm995_vm10, %v2157_v35, %v2156_v43 }
0x158e   :  { %2159 = vrot.lane.b32.xlu1 %v2158_v53, %s5003_s15 }
0x1598   :  { %v2146_v56 = vpop.permute.xlu0 %2145 }
0x1599   :  { %vm2147_vm11 = vcmp.eq.s32.totalorder %v2146_v56, 1 }
0x159c   :  { %v2175_v54 = vpop.permute.xlu0 %2174 }
0x159d   :  { %v5615_v61 = vsel %vm2147_vm11, %v2175_v54, %v5569_v11 }
0x159e   :  { %v2293_v1 = vrot.slane %v5615_v61, 2  ;;  %v2294_v2 = vrot.slane %v5615_v61, 3  ;;  %v2295_v5 = vrot.slane %v5615_v61, 4  ;;  %v2296_v6 = vrot.slane %v5615_v61, 5 }
0x1600   :  { %v2160_v38 = vpop.permute.xlu1 %2159 }
0x1601   :  { %v5601_v40 = vsel %vm2147_vm11, %v2160_v38, %v5551_v47 }
0x1602   :  { %4260 = vmatmul.mubr.msk.f32.vlgmr.msra.gmra.mrb[14].mxu1 %vm136_vm0, %v5601_v40 }
0x1603   :  { %4281 = vmatprep.mubr.msk.f32.mxu1 %vm5000_vm6, %v5001_v63 }
0x16d5   :  { %v2247_v44 = vpop.f32.mrb[14].mxu1 }
0x16d6   :  { %v2252_v46 = vrot.slane %v2247_v44, 2  ;;  %v2253_v18 = vrot.slane %v2247_v44, 3  ;;  %v4261_v49 = vpop.f32.mrb[15].mxu1  ;;  %v2254_v50 = vrot.slane %v2247_v44, 4  ;;  %v2255_v58 = vrot.slane %v2247_v44, 5 }
0x16d8   :  { %v2260_v52 = vadd.f32 %v2252_v46, %v5309_v21  ;;  %v2261_v55 = vadd.f32 %v2253_v18, %v5307_v19  ;;  %v2262_v47 = vadd.f32 %v2254_v50, %v5315_v31  ;;  %v2263_v59 = vadd.f32 %v2255_v58, %v5313_v3 }
0x16da   :  { %4720 = vtanh.f32 %v2260_v52  ;;  %v3980_v11 = vmul.f32 -1.442695, %v2260_v52  ;;  %v3981_v51 = vmul.f32 -1.442695, %v2261_v55  ;;  %v3982_v9 = vmul.f32 -1.442695, %v2262_v47 }
0x16db   :  { %4722 = vtanh.f32 %v2261_v55  ;;  %v3983_v62 = vmul.f32 -1.442695, %v2263_v59 }
0x16dc   :  { %4724 = vtanh.f32 %v2262_v47 }
0x16dd   :  { %4726 = vtanh.f32 %v2263_v59 }
0x16de   :  { %4728 = vpow2.f32 %v3980_v11 }
0x16df   :  { %4730 = vpow2.f32 %v3981_v51 }
0x16e0   :  { %4732 = vpow2.f32 %v3982_v9 }
0x16e1   :  { %4734 = vpow2.f32 %v3983_v62 }
0x16e4   :  { %v4721_v60 = vpop.eup %4720 }
0x16e5   :  { %v4723_v48 = vpop.eup %4722  ;;  %2317 = vrot.lane.b32.xlu1 %v4721_v60, %s5002_s7 }
0x16e6   :  { %2319 = vrot.lane.b32.xlu0 %v4723_v48, %s5002_s7  ;;  %v4725_v57 = vpop.eup %4724 }
0x16e7   :  { %v4727_v0 = vpop.eup %4726 }
0x16e8   :  { %v4729_v4 = vpop.eup %4728 }
0x16e9   :  { %2321 = vrot.lane.b32.xlu1 %v4725_v57, %s5002_s7  ;;  %v4731_v10 = vpop.eup %4730  ;;  %v2276_v16 = vadd.f32 1.0, %v4729_v4 }
0x16ea   :  { %2323 = vrot.lane.b32.xlu0 %v4727_v0, %s5002_s7  ;;  %v2277_v15 = vadd.f32 1.0, %v4731_v10  ;;  %v4733_v26 = vpop.eup %4732 }
0x16eb   :  { %v4735_v28 = vpop.eup %4734  ;;  %4736 = vrcp.f32 %v2276_v16  ;;  %v2278_v29 = vadd.f32 1.0, %v4733_v26 }
0x16ec   :  { %4738 = vrcp.f32 %v2277_v15  ;;  %v2279_v17 = vadd.f32 1.0, %v4735_v28 }
0x16ed   :  { %2297 = vrot.lane.b32.xlu1 %v2293_v1, %s5003_s15  ;;  %4740 = vrcp.f32 %v2278_v29 }
0x16ee   :  { %2299 = vrot.lane.b32.xlu0 %v2294_v2, %s5003_s15  ;;  %4742 = vrcp.f32 %v2279_v17  ;;  %v2378_v2 = vsel %vm2377_vm12, 1, %v4997_v42 }
0x16f1   :  { %2301 = vrot.lane.b32.xlu1 %v2295_v5, %s5003_s15 }
0x16f2   :  { %2303 = vrot.lane.b32.xlu0 %v2296_v6, %s5003_s15 }
0x16f5   :  { %v4737_v25 = vpop.eup %4736 }
0x16f6   :  { %v4739_v22 = vpop.eup %4738 }
0x16f7   :  { %v4741_v30 = vpop.eup %4740 }
0x16f8   :  { %v4743_v33 = vpop.eup %4742 }
0x1757   :  { %v2318_v20 = vpop.permute.xlu1 %2317 }
0x1758   :  { %v2320_v24 = vpop.permute.xlu0 %2319  ;;  %v2329_v23 = vmul.f32 %v4737_v25, %v2318_v20 }
0x1759   :  { %v2330_v27 = vmul.f32 %v4739_v22, %v2320_v24 }
0x175a   :  { %2337 = vrot.lane.b32.xlu1 %v2329_v23, %s5003_s15 }
0x175b   :  { %2339 = vrot.lane.b32.xlu0 %v2330_v27, %s5003_s15  ;;  %v2322_v36 = vpop.permute.xlu1 %2321 }
0x175c   :  { %v2324_v34 = vpop.permute.xlu0 %2323  ;;  %v2331_v41 = vmul.f32 %v4741_v30, %v2322_v36 }
0x175d   :  { %v2332_v37 = vmul.f32 %v4743_v33, %v2324_v34 }
0x175e   :  { %2341 = vrot.lane.b32.xlu1 %v2331_v41, %s5003_s15 }
0x175f   :  { %2343 = vrot.lane.b32.xlu0 %v2332_v37, %s5003_s15  ;;  %v2298_v39 = vpop.permute.xlu1 %2297 }
0x1760   :  { %v2300_v32 = vpop.permute.xlu0 %2299  ;;  %v2309_v53 = vmul.f32 %v4737_v25, %v2298_v39 }
0x1761   :  { %v2310_v56 = vmul.f32 %v4739_v22, %v2300_v32 }
0x1763   :  { %v2302_v35 = vpop.permute.xlu1 %2301 }
0x1764   :  { %v2304_v43 = vpop.permute.xlu0 %2303  ;;  %v2311_v49 = vmul.f32 %v4741_v30, %v2302_v35 }
0x1765   :  { %v2312_v50 = vmul.f32 %v4743_v33, %v2304_v43 }
0x17cc   :  { %v2338_v38 = vpop.permute.xlu1 %2337 }
0x17cd   :  { %v2340_v44 = vpop.permute.xlu0 %2339  ;;  %v2349_v46 = vadd.f32 %v2338_v38, %v2309_v53 }
0x17ce   :  { %v2350_v18 = vadd.f32 %v2340_v44, %v2310_v56 }
0x17cf   :  { %4744 = vtanh.f32 %v2349_v46  ;;  %v2402_v57 = vrot.slane %v2349_v46, 6 }
0x17d0   :  { %4746 = vtanh.f32 %v2350_v18  ;;  %v2342_v52 = vpop.permute.xlu1 %2341  ;;  %v2403_v54 = vrot.slane %v2350_v18, 5 }
0x17d1   :  { %v2344_v55 = vpop.permute.xlu0 %2343  ;;  %v2351_v58 = vadd.f32 %v2342_v52, %v2311_v49 }
0x17d2   :  { %v2352_v47 = vadd.f32 %v2344_v55, %v2312_v50  ;;  %v2404_v5 = vsel %vm989_vm8, %v2403_v54, %v2402_v57 }
0x17d3   :  { %4748 = vtanh.f32 %v2351_v58  ;;  %v2405_v1 = vrot.slane %v2351_v58, 4 }
0x17d4   :  { %4750 = vtanh.f32 %v2352_v47  ;;  %v2407_v6 = vrot.slane %v2352_v47, 3 }
0x17d5   :  { %v2406_v11 = vsel %vm992_vm9, %v2405_v1, %v2404_v5 }
0x17d6   :  { %v2408_v51 = vsel %vm995_vm10, %v2407_v6, %v2406_v11 }
0x17d9   :  { %v4745_v59 = vpop.eup %4744 }
0x17da   :  { %v4747_v60 = vpop.eup %4746  ;;  %2361 = vrot.lane.b32.xlu1 %v4745_v59, %s5002_s7 }
0x17db   :  { %2363 = vrot.lane.b32.xlu0 %v4747_v60, %s5002_s7 }
0x17dd   :  { %v4749_v48 = vpop.eup %4748 }
0x17de   :  { %v4751_v0 = vpop.eup %4750  ;;  %2365 = vrot.lane.b32.xlu1 %v4749_v48, %s5002_s7 }
0x17df   :  { %2367 = vrot.lane.b32.xlu0 %v4751_v0, %s5002_s7 }
0x17e2   :  { %2380 = vperm.xlu1 %4503, %v2378_v2  }
0x17e6   :  { %2409 = vrot.lane.b32.xlu1 %v2408_v51, %s5004_s24 }
0x184c   :  { %v2362_v9 = vpop.permute.xlu1 %2361 }
0x184d   :  { %v2364_v62 = vpop.permute.xlu0 %2363  ;;  %v2373_v10 = vmul.f32 %v4737_v25, %v2362_v9 }
0x184e   :  { %v2374_v4 = vmul.f32 %v4739_v22, %v2364_v62 }
0x184f   :  { %v2387_v15 = vrot.slane %v2373_v10, 6 }
0x1850   :  { %v2388_v16 = vrot.slane %v2374_v4, 5  ;;  %v2366_v26 = vpop.permute.xlu1 %2365 }
0x1851   :  { %v2368_v28 = vpop.permute.xlu0 %2367  ;;  %v2375_v29 = vmul.f32 %v4741_v30, %v2366_v26 }
0x1852   :  { %v2376_v17 = vmul.f32 %v4743_v33, %v2368_v28  ;;  %v2389_v24 = vsel %vm989_vm8, %v2388_v16, %v2387_v15 }
0x1853   :  { %v2390_v20 = vrot.slane %v2375_v29, 4 }
0x1854   :  { %v2392_v23 = vrot.slane %v2376_v17, 3 }
0x1855   :  { %v2391_v27 = vsel %vm992_vm9, %v2390_v20, %v2389_v24 }
0x1856   :  { %v2393_v36 = vsel %vm995_vm10, %v2392_v23, %v2391_v27 }
0x1857   :  { %2394 = vrot.lane.b32.xlu0 %v2393_v36, %s5003_s15 }
0x1861   :  { %v2381_v34 = vpop.permute.xlu1 %2380 }
0x1862   :  { %vm2382_vm13 = vcmp.eq.s32.totalorder %v2381_v34, 1 }
0x1865   :  { %v2410_v44 = vpop.permute.xlu1 %2409 }
0x18c9   :  { %v2395_v22 = vpop.permute.xlu0 %2394 }
0x18ca   :  { %v5647_v25 = vsel %vm2382_vm13, %v2395_v22, %v5601_v40  ;;  %v5005_v22 = vmov 1966171168  }
0x18cb   :  { %4271 = vmatmul.mubr.msk.f32.vlgmr.msra.gmra.mrb[18].mxu0 %vm136_vm0, %v5647_v25 }
0x18cc   :  { %4292 = vmatprep.mubr.msk.f32.mxu0 %vm5000_vm6, %v5001_v63 }
0x199e   :  { %v2482_v30 = vpop.f32.mrb[18].mxu0 }
0x199f   :  { %v2487_v33 = vrot.slane %v2482_v30, 1  ;;  %v2488_v41 = vrot.slane %v2482_v30, 2  ;;  %v4272_v37 = vpop.f32.mrb[19].mxu0  ;;  %v2489_v39 = vrot.slane %v2482_v30, 3  ;;  %v2490_v43 = vrot.slane %v2482_v30, 4 }
0x19a0   :  { %v3021_v30 = vunpack.c.l.s4 %v5005_v22 }
0x19a1   :  { %v2495_v32 = vadd.f32 %v2487_v33, %v5309_v21  ;;  %v2496_v35 = vadd.f32 %v2488_v41, %v5307_v19  ;;  %v2497_v40 = vadd.f32 %v2489_v39, %v5315_v31  ;;  %v2498_v53 = vadd.f32 %v2490_v43, %v5313_v3 }
0x19a2   :  { %v2412_v19 = vsel %vm2382_vm13, %v2410_v44, %v5615_v61  ;;  %v3023_v33 = vlaneseq }
0x19a3   :  { %4752 = vtanh.f32 %v2495_v32  ;;  %v2528_v31 = vrot.slane %v2412_v19, 1  ;;  %v2529_v3 = vrot.slane %v2412_v19, 2  ;;  %v2530_v18 = vrot.slane %v2412_v19, 3 }
0x19a4   :  { %4754 = vtanh.f32 %v2496_v35  ;;  %v2531_v49 = vrot.slane %v2412_v19, 4  ;;  %v3985_v50 = vmul.f32 -1.442695, %v2495_v32  ;;  %v3986_v52 = vmul.f32 -1.442695, %v2496_v35 }
0x19a5   :  { %4756 = vtanh.f32 %v2497_v40  ;;  %v3987_v61 = vmul.f32 -1.442695, %v2497_v40  ;;  %v3988_v55 = vmul.f32 -1.442695, %v2498_v53  ;;  %v3022_v40 = vunpack.c.0.s8 %v3021_v30 }
0x19a6   :  { %4758 = vtanh.f32 %v2498_v53  ;;  %v3024_v53 = vshrl.u32 %v3023_v33, 7 }
0x19a7   :  { %4760 = vpow2.f32 %v3985_v50 }
0x19a8   :  { %4762 = vpow2.f32 %v3986_v52 }
0x19a9   :  { %4764 = vpow2.f32 %v3987_v61  ;;  %v2636_v61 = vld [vmem:[%s5875_s8 + $0x8] sm:$0xff] }
0x19aa   :  { %4766 = vpow2.f32 %v3988_v55  ;;  %v2719_v55 = vld [vmem:[#allocation11] sm:$0xff] }
0x19ad   :  { %v4753_v56 = vpop.eup %4752 }
0x19ae   :  { %v4755_v38 = vpop.eup %4754  ;;  %2552 = vrot.lane.b32.xlu0 %v4753_v56, %s5002_s7  ;;  %v5688_v56 = vsub.s32 %v3022_v40, %v3024_v53 }
0x19af   :  { %2554 = vrot.lane.b32.xlu1 %v4755_v38, %s5002_s7  ;;  %v4757_v46 = vpop.eup %4756 }
0x19b0   :  { %v4759_v21 = vpop.eup %4758 }
0x19b1   :  { %v4761_v58 = vpop.eup %4760 }
0x19b2   :  { %2556 = vrot.lane.b32.xlu0 %v4757_v46, %s5002_s7  ;;  %v4763_v47 = vpop.eup %4762  ;;  %v2511_v59 = vadd.f32 1.0, %v4761_v58  ;;  %v3495_v46 = vrot.slane %v5535_v12, %v5688_v56  ;;  %v2635_v12 = vld [vmem:[%s5875_s8] sm:$0xff] }
0x19b3   :  { %2558 = vrot.lane.b32.xlu1 %v4759_v21, %s5002_s7  ;;  %v2512_v60 = vadd.f32 1.0, %v4763_v47  ;;  %v4765_v48 = vpop.eup %4764  ;;  %v4453_v58 = vpack.c.bf16 %v2636_v61, %v2635_v12  ;;  %v2720_v47 = vld [vmem:[#allocation11 + $0x8] sm:$0xff] }
0x19b4   :  { %v4767_v54 = vpop.eup %4766  ;;  %4768 = vrcp.f32 %v2511_v59  ;;  %v2513_v57 = vadd.f32 1.0, %v4765_v48  ;;  %v2638_v59 = vld [vmem:[%s5875_s8 + $0x18] sm:$0xff]  ;;  %v2721_v48 = vld [vmem:[#allocation11 + $0x10] sm:$0xff] }
0x19b5   :  { %4770 = vrcp.f32 %v2512_v60  ;;  %v2514_v0 = vadd.f32 1.0, %v4767_v54  ;;  %v5715_v60 = vpack.c.bf16 %v2720_v47, %v2719_v55  ;;  %v2722_v54 = vld [vmem:[#allocation11 + $0x18] sm:$0xff]  ;;  %4454 = vmatpush3.bf16.msra.mxu1 %v4453_v58 }
0x19b6   :  { %2532 = vrot.lane.b32.xlu0 %v2528_v31, %s5003_s15  ;;  %4772 = vrcp.f32 %v2513_v57  ;;  %v5696_v31 = vsub.s32 0, %v3024_v53  ;;  %4455 = vmatprep.subr.bf16.mxu1 %v4999_v45 }
0x19b7   :  { %2534 = vrot.lane.b32.xlu1 %v2529_v3, %s5003_s15  ;;  %4774 = vrcp.f32 %v2514_v0  ;;  %v3503_v3 = vrot.slane %v3495_v46, %v5688_v56  ;;  %4460 = vmatpush3.bf16.msra.mxu0 %v5715_v60  ;;  %v4462_v0 = vpack.c.bf16 %v2722_v54, %v2721_v48 }
0x19b8   :  { %4461 = vmatprep.subr.bf16.mxu0 %v4999_v45 }
0x19b9   :  { %v3511_v50 = vcombine.high %v3503_v3, %v3503_v3 }
0x19ba   :  { %2536 = vrot.lane.b32.xlu0 %v2530_v18, %s5003_s15  ;;  %v2613_v18 = vsel %vm2612_vm14, 1, %v4997_v42  ;;  %v2637_v42 = vld [vmem:[%s5875_s8 + $0x10] sm:$0xff] }
0x19bb   :  { %2538 = vrot.lane.b32.xlu1 %v2531_v49, %s5003_s15  ;;  %v3516_v49 = vrot.slane %v3503_v3, %v5696_v31  ;;  %v3524_v52 = vrot.slane %v3511_v50, %v5696_v31  ;;  %v4456_v57 = vpack.c.bf16 %v2638_v59, %v2637_v42  ;;  %4463 = vmatpush3.bf16.msra.mxu0 %v4462_v0 }
0x19bc   :  { %4470 = vmatprep.subr.bf16.mxu0 %v4999_v45 }
0x19bd   :  { %4457 = vmatpush3.bf16.msra.mxu1 %v4456_v57 }
0x19be   :  { %v5667_v1 = vpop.eup %4768  ;;  %4464 = vmatprep.subr.bf16.mxu1 %v4999_v45  ;;  %4293 = vmatmul.mubr.f32.vlgmr.msra.gmra.mrb[20].mxu0 %v5001_v63 }
0x19bf   :  { %v5669_v5 = vpop.eup %4770  ;;  %4472 = vmatpush3.bf16.msra.mxu0 %v5715_v60  ;;  %4314 = vmatprep.mubr.msk.f32.mxu0 %vm5000_vm6, %v5001_v63 }
0x19c0   :  { %v5675_v9 = vpop.eup %4772  ;;  %4473 = vmatprep.subr.bf16.mxu0 %v4999_v45 }
0x19c1   :  { %v5677_v4 = vpop.eup %4774 }
0x19c3   :  { %4475 = vmatpush3.bf16.msra.mxu0 %v4462_v0 }
0x19c4   :  { %4328 = vmatprep.subr.mxu0 %v5001_v63 }
0x1a20   :  { %v2553_v2 = vpop.permute.xlu0 %2552 }
0x1a21   :  { %v2564_v6 = vmul.f32 %v5667_v1, %v2553_v2  ;;  %v2555_v11 = vpop.permute.xlu1 %2554 }
0x1a22   :  { %v2565_v51 = vmul.f32 %v5669_v5, %v2555_v11 }
0x1a23   :  { %2572 = vrot.lane.b32.xlu0 %v2564_v6, %s5003_s15 }
0x1a24   :  { %2574 = vrot.lane.b32.xlu1 %v2565_v51, %s5003_s15  ;;  %v2557_v62 = vpop.permute.xlu0 %2556 }
0x1a25   :  { %v2566_v10 = vmul.f32 %v5675_v9, %v2557_v62  ;;  %v2559_v16 = vpop.permute.xlu1 %2558  ;;  %v3496_v62 = vcombine.high %v3495_v46, %v3495_v46 }
0x1a26   :  { %v2567_v15 = vmul.f32 %v5677_v4, %v2559_v16 }
0x1a27   :  { %2576 = vrot.lane.b32.xlu0 %v2566_v10, %s5003_s15 }
0x1a28   :  { %2578 = vrot.lane.b32.xlu1 %v2567_v15, %s5003_s15  ;;  %v2533_v26 = vpop.permute.xlu0 %2532 }
0x1a29   :  { %v2535_v28 = vpop.permute.xlu1 %2534  ;;  %v2544_v20 = vmul.f32 %v5667_v1, %v2533_v26 }
0x1a2a   :  { %v2545_v24 = vmul.f32 %v5669_v5, %v2535_v28 }
0x1a2c   :  { %v2537_v29 = vpop.permute.xlu0 %2536 }
0x1a2d   :  { %v2539_v17 = vpop.permute.xlu1 %2538  ;;  %v2546_v41 = vmul.f32 %v5675_v9, %v2537_v29 }
0x1a2e   :  { %v2547_v37 = vmul.f32 %v5677_v4, %v2539_v17 }
0x1a91   :  { %v2789_v30 = vpop.f32.mrb[20].mxu0 }
0x1a95   :  { %v2573_v23 = vpop.permute.xlu0 %2572 }
0x1a96   :  { %v2584_v27 = vadd.f32 %v2573_v23, %v2544_v20  ;;  %v2575_v36 = vpop.permute.xlu1 %2574  ;;  %v3510_v20 = vrot.slane %v3496_v62, %v5688_v56 }
0x1a97   :  { %v2585_v34 = vadd.f32 %v2575_v36, %v2545_v24 }
0x1a98   :  { %4776 = vtanh.f32 %v2584_v27  ;;  %v3512_v36 = vcombine.high %v3510_v20, %v3510_v20 }
0x1a99   :  { %4778 = vtanh.f32 %v2585_v34  ;;  %v2577_v39 = vpop.permute.xlu0 %2576 }
0x1a9a   :  { %v2586_v32 = vadd.f32 %v2577_v39, %v2546_v41  ;;  %v2579_v35 = vpop.permute.xlu1 %2578  ;;  %v4294_v41 = vpop.f32.mrb[21].mxu0 }
0x1a9b   :  { %v2587_v43 = vadd.f32 %v2579_v35, %v2547_v37 }
0x1a9c   :  { %4780 = vtanh.f32 %v2586_v32 }
0x1a9d   :  { %4782 = vtanh.f32 %v2587_v43 }
0x1aa2   :  { %v4777_v38 = vpop.eup %4776 }
0x1aa3   :  { %v4779_v44 = vpop.eup %4778  ;;  %2596 = vrot.lane.b32.xlu0 %v4777_v38, %s5002_s7 }
0x1aa4   :  { %2598 = vrot.lane.b32.xlu1 %v4779_v44, %s5002_s7 }
0x1aa6   :  { %v4781_v19 = vpop.eup %4780 }
0x1aa7   :  { %v4783_v21 = vpop.eup %4782  ;;  %2600 = vrot.lane.b32.xlu0 %v4781_v19, %s5002_s7 }
0x1aa8   :  { %2602 = vrot.lane.b32.xlu1 %v4783_v21, %s5002_s7 }
0x1aab   :  { %2615 = vperm.xlu0 %4502, %v2613_v18  }
0x1aaf   :  { %3530 = vperm.xlu0 %4502, %v3516_v49  }
0x1ab3   :  { %3536 = vperm.xlu0 %4502, %v3524_v52  }
0x1b15   :  { %v2597_v2 = vpop.permute.xlu0 %2596 }
0x1b16   :  { %v2599_v6 = vpop.permute.xlu1 %2598  ;;  %v2608_v11 = vmul.f32 %v5667_v1, %v2597_v2 }
0x1b17   :  { %v2609_v51 = vmul.f32 %v5669_v5, %v2599_v6  ;;  %v3520_v5 = vrot.slane %v3510_v20, %v5696_v31 }
0x1b18   :  { %v2622_v10 = vrot.slane %v2608_v11, 7 }
0x1b19   :  { %v2623_v16 = vrot.slane %v2609_v51, 6  ;;  %v2601_v15 = vpop.permute.xlu0 %2600 }
0x1b1a   :  { %v2610_v26 = vmul.f32 %v5675_v9, %v2601_v15  ;;  %v2603_v28 = vpop.permute.xlu1 %2602  ;;  %v3528_v9 = vrot.slane %v3512_v36, %v5696_v31 }
0x1b1b   :  { %v2611_v29 = vmul.f32 %v5677_v4, %v2603_v28  ;;  %v2624_v24 = vsel %vm989_vm8, %v2623_v16, %v2622_v10  ;;  %vm3181_vm8 = vcmask 1040384  }
0x1b1c   :  { %v2625_v17 = vrot.slane %v2610_v26, 5 }
0x1b1d   :  { %v2627_v23 = vrot.slane %v2611_v29, 4 }
0x1b1e   :  { %v2626_v27 = vsel %vm992_vm9, %v2625_v17, %v2624_v24  ;;  %vm3190_vm9 = vcmask 1042432  }
0x1b1f   :  { %v2628_v1 = vsel %vm995_vm10, %v2627_v23, %v2626_v27 }
0x1b20   :  { %2629 = vrot.lane.b32.xlu1 %v2628_v1, %s5003_s15 }
0x1b24   :  { %3533 = vperm.xlu1 %4503, %v3520_v5  }
0x1b28   :  { %3539 = vperm.xlu1 %4503, %v3528_v9  }
0x1b2a   :  { %v2616_v4 = vpop.permute.xlu0 %2615 }
0x1b2b   :  { %vm2617_vm1 = vcmp.eq.s32.totalorder %v2616_v4, 1 }
0x1b92   :  { %v2630_v34 = vpop.permute.xlu1 %2629 }
0x1b93   :  { %v2632_v22 = vsel %vm2617_vm1, %v2630_v34, %v5647_v25  ;;  %v3989_v25 = vld [vmem:[%s5877_s10] ss:$0 sm:$0xff]  ;;  %s5006_s10 = smov [#allocation14]  }
0x1b94   :  { %4282 = vmatmul.mubr.msk.f32.vlgmr.msra.gmra.mrb[16].mxu1 %vm136_vm0, %v2632_v22  ;;  %2634 = vst.msk [vmem:[#allocation14] sm:$0xf] %vm2633_vm15, %v2632_v22  ;;  %s3909_s18 = sshll.u32 %s5006_s10, 4  ;;  %s3910_s18 = int_to_ptr.vmem [resolvable:$true] %s3909_s18 }
0x1b95   :  { %4466 = vmatpush3.bf16.msra.mxu1 %v5715_v60  ;;  %4303 = vmatprep.mubr.msk.f32.mxu1 %vm5000_vm6, %v5001_v63  ;;  %s4933_s0 = scalar_lea.vmem %s3910_s18, 64  ;;  %p4938_p7 = scmp.lt.s32.totalorder %s3910_s18, %s3910_s18 }
0x1b96   :  { %4467 = vmatprep.subr.bf16.mxu1 %v4999_v45  ;;  %p4934_p6 = scmp.ne.s32.totalorder %s3910_s18, %s4933_s0  ;;  %p4939_p8 = scmp.lt.s32.totalorder %s4933_s0, %s4933_s0 }
0x1b98   :  { %p4940_p9 = por %p4939_p8, %p4938_p7 }
0x1b99   :  { %4469 = vmatpush3.bf16.msra.mxu1 %v4462_v0 }
0x1b9a   :  { %4476 = vmatprep.subr.bf16.mxu1 %v4999_v45  ;;  %p4941_p10 = pnand %p4940_p9, %p4934_p6 }
0x1c67   :  { %v2715_v37 = vpop.f32.mrb[16].mxu1 }
0x1c68   :  { %v2716_v39 = vadd.f32 %v3989_v25, %v2715_v37  ;;  %v4283_v32 = vpop.f32.mrb[17].mxu1 }
0x1c6a   :  { %v2793_v35 = vadd.f32 %v2789_v30, %v2716_v39 }
0x1c6c   :  { %v2794_v43 = vmax.f32 %v2793_v35, 0.0 }
0x1c6e   :  { %4304 = vmatmul.mubr.msk.f32.vlgmr.msra.gmra.mrb[18].mxu1 %vm136_vm0, %v2794_v43  ;;  %v3026_v53 = vrot.slane %v2794_v43, %v5688_v56 }
0x1c6f   :  { %4478 = vmatpush3.bf16.msra.mxu1 %v5715_v60  ;;  %4325 = vmatprep.mubr.msk.f32.mxu1 %vm5000_vm6, %v5001_v63 }
0x1c70   :  { %4479 = vmatprep.subr.bf16.mxu1 %v4999_v45  ;;  %v3027_v19 = vcombine.high %v3026_v53, %v3026_v53  ;;  %v3034_v3 = vrot.slane %v3026_v53, %v5688_v56 }
0x1c72   :  { %v3041_v49 = vrot.slane %v3027_v19, %v5688_v56  ;;  %v3042_v61 = vcombine.high %v3034_v3, %v3034_v3 }
0x1c73   :  { %4481 = vmatpush3.bf16.msra.mxu1 %v4462_v0 }
0x1c74   :  { %4333 = vmatprep.subr.mxu1 %v5001_v63  ;;  %v3043_v59 = vcombine.high %v3041_v49, %v3041_v49 }
0x1d41   :  { %v2864_v40 = vpop.f32.mrb[18].mxu1 }
0x1d42   :  { %v2868_v38 = vadd.f32 %v2864_v40, %v2716_v39  ;;  %v4305_v44 = vpop.f32.mrb[19].mxu1 }
0x1d43   :  { %v3488_v44 = vand.u32 127, %v3023_v33 }
0x1d44   :  { %v2869_v46 = vmax.f32 %v2868_v38, 0.0 }
0x1d46   :  { %v3054_v21 = vrot.slane %v2869_v46, %v5688_v56  ;;  %4315 = vmatmul.mubr.msk.f32.vlgmr.msra.gmra.mrb[22].mxu0 %vm136_vm0, %v2869_v46  ;;  %v3534_v46 = vpop.permute.xlu1 %3533 }
0x1d47   :  { %4329 = vmatpush3.xpose.msk.msra.mxu0 %vm136_vm0, %v5280_v7  ;;  %4330 = vmatprep.mubr.msk.f32.mxu0 %vm5000_vm6, %v5001_v63 }
0x1d48   :  { %v3055_v45 = vcombine.high %v3054_v21, %v3054_v21  ;;  %v3062_v18 = vrot.slane %v3054_v21, %v5688_v56  ;;  %4338 = vmatprep.subr.mxu0 %v5001_v63 }
0x1d4a   :  { %v3069_v50 = vrot.slane %v3055_v45, %v5688_v56  ;;  %v3070_v52 = vcombine.high %v3062_v18, %v3062_v18  ;;  %v3124_v12 = vrot.slane %v3062_v18, %v5696_v31 }
0x1d4c   :  { %v3071_v55 = vcombine.high %v3069_v50, %v3069_v50  ;;  %v3128_v58 = vrot.slane %v3069_v50, %v5696_v31  ;;  %v3132_v47 = vrot.slane %v3070_v52, %v5696_v31  ;;  %v3182_v42 = vsel %vm3181_vm8, %v3034_v3, %v3124_v12 }
0x1d4e   :  { %v3136_v60 = vrot.slane %v3071_v55, %v5696_v31  ;;  %v3183_v48 = vsel %vm3181_vm8, %v3041_v49, %v3128_v58  ;;  %v3184_v54 = vsel %vm3181_vm8, %v3042_v61, %v3132_v47 }
0x1d50   :  { %v3185_v57 = vsel %vm3181_vm8, %v3043_v59, %v3136_v60 }
0x1e19   :  { %v2939_v0 = vpop.f32.mrb[22].mxu0 }
0x1e1a   :  { %v2943_v2 = vadd.f32 %v2939_v0, %v2716_v39  ;;  %v4316_v6 = vpop.f32.mrb[23].mxu0 }
0x1e1c   :  { %v2944_v11 = vmax.f32 %v2943_v2, 0.0 }
0x1e1e   :  { %v3078_v51 = vrot.slane %v2944_v11, %v5688_v56  ;;  %4326 = vmatmul.mubr.msk.f32.vlgmr.msra.gmra.mrb[20].mxu1 %vm136_vm0, %v2944_v11 }
0x1e1f   :  { %4334 = vmatpush3.xpose.msk.msra.mxu1 %vm136_vm0, %v5282_v8  ;;  %4335 = vmatprep.mubr.msk.f32.mxu1 %vm5000_vm6, %v5001_v63 }
0x1e20   :  { %v3079_v62 = vcombine.high %v3078_v51, %v3078_v51  ;;  %v3086_v10 = vrot.slane %v3078_v51, %v5688_v56  ;;  %4343 = vmatprep.subr.mxu1 %v5001_v63 }
0x1e22   :  { %v3093_v16 = vrot.slane %v3079_v62, %v5688_v56  ;;  %v3094_v15 = vcombine.high %v3086_v10, %v3086_v10  ;;  %v3144_v26 = vrot.slane %v3086_v10, %v5696_v31 }
0x1e24   :  { %v3095_v28 = vcombine.high %v3093_v16, %v3093_v16  ;;  %v3148_v29 = vrot.slane %v3093_v16, %v5696_v31  ;;  %v3152_v17 = vrot.slane %v3094_v15, %v5696_v31  ;;  %v3186_v20 = vsel %vm593_vm3, %v3182_v42, %v3144_v26 }
0x1e26   :  { %v3156_v24 = vrot.slane %v3095_v28, %v5696_v31  ;;  %v3187_v23 = vsel %vm593_vm3, %v3183_v48, %v3148_v29  ;;  %v3188_v27 = vsel %vm593_vm3, %v3184_v54, %v3152_v17 }
0x1e28   :  { %v3189_v1 = vsel %vm593_vm3, %v3185_v57, %v3156_v24  ;;  %vm3549_vm3 = vcmask 60416  }
0x1ef1   :  { %v3014_v5 = vpop.f32.mrb[20].mxu1 }
0x1ef2   :  { %v3018_v36 = vadd.f32 %v3014_v5, %v2716_v39  ;;  %v4327_v9 = vpop.f32.mrb[21].mxu1 }
0x1ef4   :  { %v3019_v4 = vmax.f32 %v3018_v36, 0.0 }
0x1ef6   :  { %v3103_v34 = vrot.slane %v3019_v4, %v5688_v56 }
0x1ef8   :  { %v3104_v22 = vcombine.high %v3103_v34, %v3103_v34  ;;  %v3111_v30 = vrot.slane %v3103_v34, %v5688_v56 }
0x1efa   :  { %v3118_v41 = vrot.slane %v3104_v22, %v5688_v56  ;;  %v3119_v25 = vcombine.high %v3111_v30, %v3111_v30  ;;  %v3164_v37 = vrot.slane %v3111_v30, %v5696_v31 }
0x1efc   :  { %v3120_v32 = vcombine.high %v3118_v41, %v3118_v41  ;;  %v3168_v35 = vrot.slane %v3118_v41, %v5696_v31  ;;  %v3172_v43 = vrot.slane %v3119_v25, %v5696_v31  ;;  %v3191_v39 = vsel %vm3190_vm9, %v3186_v20, %v3164_v37 }
0x1efd   :  { %4331 = vmatmul.mubr.msk.f32.vlgmr.msra.gmra.mrb[24].mxu0 %vm136_vm0, %v3191_v39 }
0x1efe   :  { %4339 = vmatpush3.xpose.msk.msra.mxu0 %vm136_vm0, %v5292_v13  ;;  %v3192_v40 = vsel %vm3190_vm9, %v3187_v23, %v3168_v35  ;;  %4340 = vmatprep.mubr.msk.f32.mxu0 %vm5000_vm6, %v5001_v63  ;;  %v3193_v56 = vsel %vm3190_vm9, %v3188_v27, %v3172_v43  ;;  %v3176_v53 = vrot.slane %v3120_v32, %v5696_v31  ;;  %v3531_v31 = vpop.permute.xlu0 %3530 }
0x1eff   :  { %4336 = vmatmul.mubr.msk.f32.vlgmr.msra.gmra.mrb[22].mxu1 %vm136_vm0, %v3192_v40  ;;  %4348 = vmatprep.subr.mxu0 %v5001_v63  ;;  %vm3541_vm10 = vcmp.lt.s32.totalorder %v3488_v44, %v3531_v31 }
0x1f00   :  { %4344 = vmatpush3.xpose.msk.msra.mxu1 %vm136_vm0, %v5294_v14  ;;  %4345 = vmatprep.mubr.msk.f32.mxu1 %vm5000_vm6, %v5001_v63  ;;  %v3194_v38 = vsel %vm3190_vm9, %v3189_v1, %v3176_v53 }
0x1f01   :  { %4341 = vmatmul.mubr.msk.f32.vlgmr.msra.gmra.mrb[26].mxu0 %vm136_vm0, %v3193_v56  ;;  %4353 = vmatprep.subr.mxu1 %v5001_v63 }
0x1f02   :  { %4349 = vmatpush3.msra.mxu0 %v5280_v7  ;;  %4350 = vmatprep.mubr.msk.f32.mxu0 %vm5000_vm6, %v5001_v63  ;;  %v3537_v19 = vpop.permute.xlu0 %3536 }
0x1f03   :  { %4346 = vmatmul.mubr.msk.f32.vlgmr.msra.gmra.mrb[24].mxu1 %vm136_vm0, %v3194_v38  ;;  %4358 = vmatprep.subr.mxu0 %v5001_v63  ;;  %vm3542_vm0 = vcmp.lt.s32.totalorder %v3488_v44, %v3534_v46  ;;  %vm3543_vm2 = vcmp.lt.s32.totalorder %v3488_v44, %v3537_v19 }
0x1f04   :  { %4354 = vmatpush3.msra.mxu1 %v5282_v8  ;;  %4355 = vmatprep.mubr.msk.f32.mxu1 %vm5000_vm6, %v5001_v63  ;;  %v3540_v8 = vpop.permute.xlu1 %3539 }
0x1f05   :  { %4363 = vmatprep.subr.mxu1 %v5001_v63  ;;  %vm3544_vm4 = vcmp.lt.s32.totalorder %v3488_v44, %v3540_v8 }
0x1fd0   :  { %v3264_v7 = vpop.f32.mrb[24].mxu0 }
0x1fd1   :  { %v3545_v21 = vsel %vm3541_vm10, %v3264_v7, -inf  ;;  %v4332_v3 = vpop.f32.mrb[25].mxu0 }
0x1fd2   :  { %v3550_v45 = vsel %vm3549_vm3, %v3545_v21, -inf  ;;  %v3337_v18 = vpop.f32.mrb[22].mxu1 }
0x1fd3   :  { %v3546_v49 = vsel %vm3542_vm0, %v3337_v18, -inf  ;;  %3551 = vmax.xlane.f32.xlu0 %v3550_v45  ;;  %v4337_v50 = vpop.f32.mrb[23].mxu1 }
0x1fd4   :  { %v3553_v52 = vsel %vm3549_vm3, %v3546_v49, -inf  ;;  %v3410_v12 = vpop.f32.mrb[26].mxu0 }
0x1fd5   :  { %v3547_v33 = vsel %vm3543_vm2, %v3410_v12, -inf  ;;  %v4342_v61 = vpop.f32.mrb[27].mxu0  ;;  %3554 = vmax.xlane.f32.xlu1 %v3553_v52 }
0x1fd6   :  { %v3556_v55 = vsel %vm3549_vm3, %v3547_v33, -inf  ;;  %v3483_v58 = vpop.f32.mrb[24].mxu1 }
0x1fd7   :  { %v3548_v47 = vsel %vm3544_vm4, %v3483_v58, -inf  ;;  %3557 = vmax.xlane.f32.xlu0 %v3556_v55  ;;  %v4347_v42 = vpop.f32.mrb[25].mxu1 }
0x1fd8   :  { %v3559_v59 = vsel %vm3549_vm3, %v3548_v47, -inf }
0x1fdb   :  { %3560 = vmax.xlane.f32.xlu0 %v3559_v59 }
0x2060   :  { %v3552_v60 = vpop.xlane.xlu0 %3551 }
0x2061   :  { %v3562_v48 = vsub.f32 %v3545_v21, %v3552_v60 }
0x2062   :  { %v3555_v54 = vpop.xlane.xlu1 %3554 }
0x2063   :  { %v3566_v57 = vmul.f32 1.442695, %v3562_v48  ;;  %v3563_v0 = vsub.f32 %v3546_v49, %v3555_v54 }
0x2064   :  { %v3558_v2 = vpop.xlane.xlu0 %3557 }
0x2065   :  { %4784 = vpow2.f32 %v3566_v57  ;;  %v3568_v6 = vmul.f32 1.442695, %v3563_v0  ;;  %v3564_v11 = vsub.f32 %v3547_v33, %v3558_v2 }
0x2067   :  { %4786 = vpow2.f32 %v3568_v6  ;;  %v3570_v51 = vmul.f32 1.442695, %v3564_v11 }
0x2068   :  { %v3561_v62 = vpop.xlane.xlu0 %3560 }
0x2069   :  { %4788 = vpow2.f32 %v3570_v51  ;;  %v3565_v10 = vsub.f32 %v3548_v47, %v3561_v62 }
0x206b   :  { %v3572_v16 = vmul.f32 1.442695, %v3565_v10 }
0x206d   :  { %4790 = vpow2.f32 %v3572_v16 }
0x206f   :  { %v4785_v15 = vpop.eup %4784 }
0x2070   :  { %v3574_v26 = vsel %vm3549_vm3, %v4785_v15, 0.0 }
0x2071   :  { %v4787_v28 = vpop.eup %4786  ;;  %3575 = vadd.xlane.f32.xlu1 %v3574_v26 }
0x2072   :  { %v3577_v29 = vsel %vm3549_vm3, %v4787_v28, 0.0 }
0x2073   :  { %v4789_v17 = vpop.eup %4788  ;;  %3578 = vadd.xlane.f32.xlu0 %v3577_v29 }
0x2074   :  { %v3580_v20 = vsel %vm3549_vm3, %v4789_v17, 0.0 }
0x2075   :  { %3581 = vadd.xlane.f32.xlu1 %v3580_v20 }
0x2077   :  { %v4791_v24 = vpop.eup %4790 }
0x2078   :  { %v3583_v23 = vsel %vm3549_vm3, %v4791_v24, 0.0 }
0x2079   :  { %3584 = vadd.xlane.f32.xlu0 %v3583_v23 }
0x20fe   :  { %v3576_v27 = vpop.xlane.xlu1 %3575 }
0x20ff   :  { %4792 = vrcp.f32 %v3576_v27 }
0x2100   :  { %v3579_v1 = vpop.xlane.xlu0 %3578 }
0x2101   :  { %4794 = vrcp.f32 %v3579_v1 }
0x2102   :  { %v3582_v5 = vpop.xlane.xlu1 %3581 }
0x2103   :  { %4796 = vrcp.f32 %v3582_v5 }
0x2106   :  { %v3585_v36 = vpop.xlane.xlu0 %3584 }
0x2107   :  { %4798 = vrcp.f32 %v3585_v36 }
0x2109   :  { %v4793_v9 = vpop.eup %4792 }
0x210a   :  { %v3587_v4 = vmul.f32 %v4793_v9, %v4785_v15 }
0x210b   :  { %v4795_v34 = vpop.eup %4794 }
0x210c   :  { %v3589_v22 = vmul.f32 %v4795_v34, %v4787_v28  ;;  %4351 = vmatmul.mubr.msk.f32.vlgmr.msra.gmra.mrb[28].mxu0 %vm3594_vm5, %v3587_v4 }
0x210d   :  { %v4797_v30 = vpop.eup %4796  ;;  %4359 = vmatpush3.msra.mxu0 %v5292_v13  ;;  %4360 = vmatprep.mubr.msk.f32.mxu0 %vm5000_vm6, %v5001_v63 }
0x210e   :  { %v3591_v41 = vmul.f32 %v4797_v30, %v4789_v17  ;;  %4356 = vmatmul.mubr.msk.f32.vlgmr.msra.gmra.mrb[26].mxu1 %vm3594_vm5, %v3589_v22 }
0x210f   :  { %4364 = vmatpush3.msra.mxu1 %v5294_v14  ;;  %4365 = vmatprep.mubr.msk.f32.mxu1 %vm5000_vm6, %v5001_v63 }
0x2110   :  { %4361 = vmatmul.mubr.msk.f32.vlgmr.msra.gmra.mrb[30].mxu0 %vm3594_vm5, %v3591_v41 }
0x2111   :  { %v4799_v25 = vpop.eup %4798 }
0x2112   :  { %v3593_v37 = vmul.f32 %v4799_v25, %v4791_v24 }
0x2114   :  { %4366 = vmatmul.mubr.msk.f32.vlgmr.msra.gmra.mrb[28].mxu1 %vm3594_vm5, %v3593_v37 }
0x2115   :  { %4944 = shalt.err (!%p4941_p10)
}
0x2116   :  { %s4945_s21 = scalar_lea.hbm %s5879_s12, 64 }
0x2117   :  { %p4946_p11 = scmp.ne.s32.totalorder %s5879_s12, %s4945_s21  ;;  %p4949_p12 = scmp.lt.u32.totalorder %s4945_s21, %s5879_s12 }
0x2119   :  { %p4951_p13 = pnand %p4949_p12, %p4946_p11 }
0x211b   :  { %4954 = shalt.err (!%p4951_p13)
}
0x211c   :  { %3912 = dma.vmem_to_hbm [thread:$0]  %s3910_s18, 64, %s5879_s12, [#allocation15]  }
0x211d   :  { %s5007_s15 = smov [#allocation13]  }
0x211e   :  { %s3896_s16 = sshll.u32 %s5007_s15, 4  ;;  %s3897_s16 = int_to_ptr.vmem [resolvable:$true] %s3896_s16 }
0x211f   :  { %s4955_s12 = scalar_lea.vmem %s3897_s16, 256  ;;  %p4960_p1 = scmp.lt.s32.totalorder %s3897_s16, %s3897_s16 }
0x2120   :  { %p4956_p0 = scmp.ne.s32.totalorder %s3897_s16, %s4955_s12  ;;  %p4961_p2 = scmp.lt.s32.totalorder %s4955_s12, %s4955_s12 }
0x2122   :  { %p4962_p3 = por %p4961_p2, %p4960_p1 }
0x2124   :  { %p4963_p4 = pnand %p4962_p3, %p4956_p0 }
0x21df   :  { %v3664_v63 = vpop.f32.mrb[28].mxu0 }
0x21e0   :  { %3887 = vst.msk [vmem:[#allocation13] sm:$0xf] %vm2633_vm15, %v3664_v63  ;;  %v4352_v13 = vpop.f32.mrb[29].mxu0 }
0x21e1   :  { %v3737_v14 = vpop.f32.mrb[26].mxu1 }
0x21e2   :  { %3888 = vst.msk [vmem:[#allocation13 + $0x4] sm:$0xf] %vm2633_vm15, %v3737_v14  ;;  %v4357_v32 = vpop.f32.mrb[27].mxu1 }
0x21e3   :  { %v3810_v35 = vpop.f32.mrb[30].mxu0 }
0x21e4   :  { %3889 = vst.msk [vmem:[#allocation13 + $0x8] sm:$0xf] %vm2633_vm15, %v3810_v35  ;;  %v4362_v43 = vpop.f32.mrb[31].mxu0 }
0x21e7   :  { %v3883_v39 = vpop.f32.mrb[28].mxu1 }
0x21e8   :  { %3890 = vst.msk [vmem:[#allocation13 + $0xc] sm:$0xf] %vm2633_vm15, %v3883_v39  ;;  %v4367_v40 = vpop.f32.mrb[29].mxu1 }
0x21e9   :  { %4966 = shalt.err (!%p4963_p4)
}
0x21ea   :  { %s4967_s26 = scalar_lea.hbm %s5878_s11, 256 }
0x21eb   :  { %p4968_p5 = scmp.ne.s32.totalorder %s5878_s11, %s4967_s26  ;;  %p4971_p6 = scmp.lt.u32.totalorder %s4967_s26, %s5878_s11 }
0x21ed   :  { %p4973_p7 = pnand %p4971_p6, %p4968_p5 }
0x21ef   :  { %4976 = shalt.err (!%p4973_p7)
}
0x21f0   :  { %s5008_s3 = smov 4  }
0x21f1   :  { %3902 = dma.vmem_to_hbm [thread:$0]  %s3897_s16, 256, %s5878_s11, [#allocation4], %s5002_s7, %s5002_s7, %s5008_s3  }
0x21f2   :  { %4985 = dma.done.wait [#allocation4], 256  }
0x21f3   :  { %4986 = vsyncadd [#allocation4], 4294967040 }
0x21f4   :  { %4987 = dma.done.wait [#allocation15], 64  }
0x21f5   :  { %4988 = vsyncadd [#allocation15], 4294967232 }
0x21f6   :  { %3919 = vsyncpa [#allocation3], 1 }
0x21f7   :  { %3920 = vsyncpa [#allocation6], 1 }
0x21f8   :  { %3921 = vsyncpa [#allocation9], 1 }
0x21f9   :  { %3922 = vsyncpa [#allocation12], 1 }
0x21fa   :  { %3923 = vsyncpa [#allocation4], 1 }
0x21fb   :  { %3924 = vsyncpa [#allocation15], 1 }

</bundles_post_ra>
